<compile_context>
chip_gen: v5e
topology: v5e:2x2
jax: 0.10.0
libtpu: 0.0.40
codegen_flags: <defaults>
</compile_context>

<pallas_src>
import math
import functools

import jax
import jax.numpy as jnp
from jax.experimental import pallas as pl
from jax.experimental.pallas import tpu as pltpu

MIN_NORM = 1e-15
MIN_NORM_SQ = MIN_NORM * MIN_NORM
EPS = 1e-7


# ------------------------- projection matrix (parameter setup) -----------------------
def create_projection_matrix(m, d, key):
    """JAX port of _create_projection_matrix (scaling=0, struct_mode=False).
    Argument order (m = in_channels-1, d = nb_random_features) matches the PyTorch call
    site; torch RNG is replaced with jax.random for deterministic init."""
    nb_full_blocks = m // d
    blocks = []
    for _ in range(nb_full_blocks + 1):
        key, sub = jax.random.split(key)
        blk = jax.random.normal(sub, (d, d), dtype=jnp.float32)
        q, _ = jnp.linalg.qr(blk)
        blocks.append(q.T)
    rows = list(blocks[:nb_full_blocks])
    remaining = m - nb_full_blocks * d
    if remaining > 0:
        rows.append(blocks[nb_full_blocks][:remaining])
    final = jnp.concatenate(rows, axis=0)                            # (m, d)
    key, sub = jax.random.split(key)
    multiplier = jnp.sqrt(jnp.sum(jax.random.normal(sub, (m, d), jnp.float32) ** 2, axis=1))
    return multiplier[:, None] * final


# ------------------------------- fused Pallas kernel ----------------------------------
def _fused_kernel(z_ref, w_ref, b_ref, g_ref, p_ref, f_ref, o_ref, *,
                  tau, curve, num_heads, nh, dout, m_feat, m_scale):
    H = num_heads
    N = H * nh
    M = m_feat
    K = 1.0 / curve
    sqrtK = math.sqrt(K)
    inv_sqrtK = 1.0 / sqrtK
    inv_sqrt_c = 1.0 / math.sqrt(curve)
    half_inv_tau = 0.5 / tau
    front_const = (curve - K) * half_inv_tau       # (c/tau - K/tau)/2 ; t^2 = K + ||space||^2
    inv_H = 1.0 / H
    HD = H * dout
    HD2 = 2 * H * dout

    def _sinh(v):                                  # clamp=15, exp-based (Mosaic-safe)
        vc = jnp.clip(v, -15.0, 15.0)
        return 0.5 * (jnp.exp(vc) - jnp.exp(-vc))

    def _arcosh(v):                                # acosh(max(v, 1+eps)) via log/sqrt
        vm = jnp.maximum(v, 1.0 + EPS)
        return jnp.log(vm + jnp.sqrt(vm * vm - 1.0))

    def mink_coef(v):                              # (rows, Dout) -> 1/sqrt(c)/sqrt(|<v,v>_L|)
        sq = v * v
        mn = jnp.sum(sq, axis=-1, keepdims=True) - 2.0 * sq[:, 0:1]
        return inv_sqrt_c * jax.lax.rsqrt(jnp.maximum(jnp.abs(mn), MIN_NORM))

    # ---- hyperboloid glue on the input:  u = logmap0(proj(expmap0(z)))  (tangent time == 0)
    zp = z_ref[...]                                                          # (N, Din)
    space_mask = jax.lax.broadcasted_iota(jnp.int32, zp.shape, 1) != 0
    x = jnp.where(space_mask, zp, 0.0)                                       # zero time lane -> full-width reduces
    ss_x = jnp.sum(x * x, axis=-1, keepdims=True)
    ssc_x = jnp.maximum(ss_x, MIN_NORM_SQ)
    inv_xn = jax.lax.rsqrt(ssc_x)
    xn = ssc_x * inv_xn                                                      # clamp(||x||, MIN_NORM)
    s = (sqrtK * _sinh(xn * inv_sqrtK) * inv_xn) * x                         # expmap0 space part (time lane 0)
    s_sq = jnp.sum(s * s, axis=-1, keepdims=True)
    t = jnp.sqrt(jnp.maximum(K + s_sq, EPS))                                 # proj time
    ssc_s = jnp.maximum(s_sq, MIN_NORM_SQ)
    inv_sn = jax.lax.rsqrt(ssc_s)
    u = (sqrtK * _arcosh(t * inv_sqrtK) * inv_sn) * s                        # logmap0, time lane stays 0 (N, Din)

    # ---- all 3H HypLinear tangent projections: one lane-dense MXU pass (K = Din sublane-aligned)
    mu = jnp.dot(u, w_ref[...], preferred_element_type=jnp.float32) + b_ref[...]   # (N, 3H*Dout), time cols == 0

    # ---- slab-wide expmap0 + proj for all 3H head groups at once
    #      per-head ||space||^2 sums + broadcast via the trace-time block-ones matrix G (one MXU pass)
    ssb = jnp.dot(mu * mu, g_ref[...], preferred_element_type=jnp.float32)   # (N, 3H*Dout), group-constant
    ssbc = jnp.maximum(ssb, MIN_NORM_SQ)
    inv_n = jax.lax.rsqrt(ssbc)
    nrm = ssbc * inv_n                                                       # clamp(||space||, MIN_NORM)
    coef = (sqrtK * _sinh(nrm * inv_sqrtK)) * inv_n
    sp = mu * coef                                                           # hyperboloid space parts (time cols 0)
    sp_sq = coef * coef * ssb                                                # per-head ||space||^2 after expmap0

    # ---- Performer feature maps for all K|Q heads: one block-diagonal P matmul + front broadcast matmul
    wx_arg = jnp.dot(sp[:, :HD2], p_ref[...], preferred_element_type=jnp.float32)   # (N, 2H*M), 1/sqrt(tau) folded
    front_d = front_const - sp_sq[:, :HD2] * half_inv_tau                            # uses t^2 = K + ||space||^2
    front_arg = jnp.dot(front_d, f_ref[...], preferred_element_type=jnp.float32)     # broadcast to M feature cols
    feat = jnp.exp(wx_arg + front_arg) * m_scale                                     # (N, 2H*M): K groups then Q groups

    # ---- hyperboloid V points (time col = sqrt(K + ||space||^2))
    sp_v = sp[:, HD2:]                                                       # (N, H*Dout)
    t_v = jnp.sqrt(jnp.maximum(K + sp_sq[:, HD2:], EPS))
    col_v = jax.lax.broadcasted_iota(jnp.int32, (N, HD), 1)
    is_time = col_v == 0
    for g in range(1, H):
        is_time = jnp.logical_or(is_time, col_v == g * dout)
    hyp_v = jnp.where(is_time, t_v, sp_v)

    # ---- kernelized attention.  Effective head hp attends over [head-g projection of nodes hp::H, g=0..H-1];
    #      output row n' = g*nh + a receives one normalized contribution per hp (torch's flat reshape/permute).
    acc = jnp.zeros((N, dout), jnp.float32)
    for hp in range(H):
        kf = feat[hp * nh:(hp + 1) * nh, :]                                   # (nh, 2H*M)
        vv = hyp_v[hp * nh:(hp + 1) * nh, :]                                  # (nh, H*Dout)
        # stack the H head groups along the contraction axis -> ONE deep K'^T V dot_general
        k_stack = jnp.concatenate([kf[:, g * M:(g + 1) * M] for g in range(H)], axis=0)        # (N, M)
        v_stack = jnp.concatenate([vv[:, g * dout:(g + 1) * dout] for g in range(H)], axis=0)  # (N, Dout)
        last = jax.lax.dot_general(k_stack, v_stack, (((0,), (0,)), ((), ())),
                                   preferred_element_type=jnp.float32)                         # (M, Dout)
        # stacked Q rows are already in output-row order (g*nh + a)
        q_stack = jnp.concatenate([kf[:, (H + g) * M:(H + g + 1) * M] for g in range(H)], axis=0)
        z_hp = jnp.dot(q_stack, last, preferred_element_type=jnp.float32)                      # (N, Dout)
        acc = acc + z_hp * mink_coef(z_hp)

    # ---- hyper_agg finalize: euclidean mean over heads + Minkowski renormalization (single store)
    a = acc * inv_H
    o_ref[...] = (a * mink_coef(a)).astype(o_ref.dtype)


# ------------------------------------ forward ------------------------------------------
def light_hyperformer_forward(z, Wk, Wq, Wv, bk, bq, bv, proj_mat, tau, curve, adjs=None):
    # adjs (edge_index) only feeds the edge-loss branch; with use_edge_loss=False
    # (the module default) it does not influence the returned embeddings.
    del adjs
    H, Dout, Din = Wq.shape
    B, N, _ = z.shape
    assert B == 1, "module squeezes the batch dim; only B == 1 is supported"
    assert N % H == 0, "node count must be divisible by num_heads"
    Nh = N // H
    Ds, M = proj_mat.shape
    assert Ds == Dout - 1, "module requires in_channels == out_channels"

    # Reproduce torch's stack(dim=0).reshape(-1, N, H, D).permute(2, 0, 1, 3) flat
    # reinterpretation exactly: effective head hp attends over the hp::H node slice under
    # every original head.  Done once at trace time so the kernel needs no gathers.
    # TODO(synk): when N-tiling is added, fold this row permutation into the input BlockSpec index_map.
    z_perm = z[0].reshape(Nh, H, Din).transpose(1, 0, 2).reshape(N, Din)

    # TODO(synk): HypLinear source is not provided; we keep the Lorentz formulation
    # proj(expmap0(logmap0(x) @ W^T + tangent-bias)) used previously.
    W = jnp.concatenate([Wk, Wq, Wv], axis=0)                        # (3H, Dout, Din)
    Wt = jnp.transpose(W, (2, 0, 1))                                 # (Din, 3H, Dout)
    Wt = Wt.at[0].set(0.0)                                           # tangent time lane of u is exactly 0
    Wt = Wt.at[:, :, 0].set(0.0)                                     # expmap0 ignores tangent time -> zero time-out cols
    Wt = Wt.reshape(Din, 3 * H * Dout)
    b = jnp.concatenate([bk, bq, bv], axis=0)                        # (3H, Dout)
    b = b.at[:, 0].set(0.0).reshape(1, 3 * H * Dout)                 # proj_tan0 on the bias

    # Trace-time constant matrices: all per-head reductions / projections become lane-dense MXU passes.
    gid = jnp.arange(3 * H * Dout) // Dout
    G = (gid[:, None] == gid[None, :]).astype(jnp.float32)           # block-ones: per-head sums + broadcast

    P_ext = jnp.concatenate([jnp.zeros((1, M), jnp.float32), proj_mat.astype(jnp.float32)], axis=0)  # zero time row
    Pblk = jnp.kron(jnp.eye(2 * H, dtype=jnp.float32), P_ext) * (1.0 / math.sqrt(tau))  # (2H*Dout, 2H*M) block-diag

    rid = jnp.arange(2 * H * Dout) // Dout
    cid = jnp.arange(2 * H * M) // M
    Fb = (rid[:, None] == cid[None, :]).astype(jnp.float32) / Dout   # per-head front exponent -> M feature cols

    kern = functools.partial(_fused_kernel, tau=float(tau), curve=float(curve),
                             num_heads=H, nh=Nh, dout=Dout, m_feat=M,
                             m_scale=1.0 / math.sqrt(Din - 1))

    # TODO(synk): single-grid-step kernel keeps all (N, .) operands VMEM-resident.  For large N add a
    # node-tiling grid axis marked "parallel" (uses v7x's 2nd TensorCore), re-derive the tile for v7x's
    # 64 MiB VMEM, cast the MXU operands to bf16, and switch to a lane-dense (transposed) output layout.
    return pl.pallas_call(
        kern,
        out_shape=jax.ShapeDtypeStruct((N, Dout), jnp.float32),
        grid_spec=pltpu.PrefetchScalarGridSpec(
            num_scalar_prefetch=0,
            grid=(1,),
            in_specs=[
                pl.BlockSpec((N, Din), lambda i: (0, 0)),
                pl.BlockSpec((Din, 3 * H * Dout), lambda i: (0, 0)),
                pl.BlockSpec((1, 3 * H * Dout), lambda i: (0, 0)),
                pl.BlockSpec((3 * H * Dout, 3 * H * Dout), lambda i: (0, 0)),
                pl.BlockSpec((2 * H * Dout, 2 * H * M), lambda i: (0, 0)),
                pl.BlockSpec((2 * H * Dout, 2 * H * M), lambda i: (0, 0)),
            ],
            out_specs=pl.BlockSpec((N, Dout), lambda i: (0, 0)),
        ),
        compiler_params=pltpu.CompilerParams(dimension_semantics=("arbitrary",)),
    )(z_perm, Wt, b, G, Pblk, Fb)


# -------------------------------------- main -------------------------------------------
if __name__ == "__main__":
    key = jax.random.PRNGKey(0)
    B, N = 1, 64
    in_channels = out_channels = 8          # shared data-space dim (as the module requires)
    num_heads = 2
    nb_random_features = 10
    tau, curve = 0.5, 1.0

    (k_z, k_wk, k_wq, k_wv, k_bk, k_bq, k_bv, k_proj, k_edge) = jax.random.split(key, 9)

    z = 0.1 * jax.random.normal(k_z, (B, N, in_channels), dtype=jnp.float32)
    scale = 1.0 / math.sqrt(in_channels)
    Wk = scale * jax.random.normal(k_wk, (num_heads, out_channels, in_channels), jnp.float32)
    Wq = scale * jax.random.normal(k_wq, (num_heads, out_channels, in_channels), jnp.float32)
    Wv = scale * jax.random.normal(k_wv, (num_heads, out_channels, in_channels), jnp.float32)
    bk = 0.01 * jax.random.normal(k_bk, (num_heads, out_channels), jnp.float32)
    bq = 0.01 * jax.random.normal(k_bq, (num_heads, out_channels), jnp.float32)
    bv = 0.01 * jax.random.normal(k_bv, (num_heads, out_channels), jnp.float32)
    proj_mat = create_projection_matrix(in_channels - 1, nb_random_features, k_proj)

    # adjs[0] (edge_index) — only used by the (disabled) edge-loss branch.
    edge_index = jax.random.randint(k_edge, (2, 16), 0, N)

    fwd = jax.jit(functools.partial(light_hyperformer_forward, tau=tau, curve=curve))
    out = fwd(z, Wk, Wq, Wv, bk, bq, bv, proj_mat, adjs=(edge_index,))
    jax.block_until_ready(out)

    assert out.shape == (N, out_channels), out.shape
    assert bool(jnp.all(jnp.isfinite(out)))
    print("KERNEL_OK")
</pallas_src>

<mosaic_0001>
module attributes {stable_mosaic.version = 11 : i64} {
  func.func @_fused_kernel(%arg0: i32, %arg1: memref<64x8xf32, #tpu.memory_space<vmem>>, %arg2: memref<8x48xf32, #tpu.memory_space<vmem>>, %arg3: memref<1x48xf32, #tpu.memory_space<vmem>>, %arg4: memref<48x48xf32, #tpu.memory_space<vmem>>, %arg5: memref<32x40xf32, #tpu.memory_space<vmem>>, %arg6: memref<32x40xf32, #tpu.memory_space<vmem>>, %arg7: memref<64x8xf32, #tpu.memory_space<vmem>>) attributes {dimension_semantics = [#tpu.dimension_semantics<arbitrary>], iteration_bounds = array<i64: 1>, scalar_prefetch = 0 : i64, scratch_operands = 0 : i64, tpu.core_type = #tpu.core_type<tc>, window_params = [{pipeline_mode = #tpu.pipeline_mode<synchronous>, transform_indices = @transform_0, window_bounds = array<i64: 64, 8>}, {pipeline_mode = #tpu.pipeline_mode<synchronous>, transform_indices = @transform_1, window_bounds = array<i64: 8, 48>}, {pipeline_mode = #tpu.pipeline_mode<synchronous>, transform_indices = @transform_2, window_bounds = array<i64: 1, 48>}, {pipeline_mode = #tpu.pipeline_mode<synchronous>, transform_indices = @transform_3, window_bounds = array<i64: 48, 48>}, {pipeline_mode = #tpu.pipeline_mode<synchronous>, transform_indices = @transform_4, window_bounds = array<i64: 32, 40>}, {pipeline_mode = #tpu.pipeline_mode<synchronous>, transform_indices = @transform_5, window_bounds = array<i64: 32, 40>}, {pipeline_mode = #tpu.pipeline_mode<synchronous>, transform_indices = @transform_6, window_bounds = array<i64: 64, 8>}]} {
    %c0 = arith.constant 0 : index
    %c0_0 = arith.constant 0 : index
    %0 = vector.load %arg1[%c0, %c0_0] : memref<64x8xf32, #tpu.memory_space<vmem>>, vector<64x8xf32>
    %1 = tpu.iota {dimensions = array<i32: 1>} : vector<64x8xi32>
    %c0_i32 = arith.constant 0 : i32
    %2 = vector.broadcast %c0_i32 : i32 to vector<64x8xi32>
    %3 = arith.cmpi ne, %1, %2 : vector<64x8xi32>
    %cst = arith.constant 0.000000e+00 : f32
    %4 = vector.broadcast %cst : f32 to vector<64x8xf32>
    %5 = arith.select %3, %0, %4 : vector<64x8xi1>, vector<64x8xf32>
    %6 = arith.mulf %5, %5 : vector<64x8xf32>
    %cst_1 = arith.constant dense<0.000000e+00> : vector<64xf32>
    %7 = vector.multi_reduction <add>, %6, %cst_1 [1] : vector<64x8xf32> to vector<64xf32>
    %8 = vector.shape_cast %7 : vector<64xf32> to vector<64x1xf32>
    %cst_2 = arith.constant 1.000000e-30 : f32
    %9 = vector.broadcast %cst_2 : f32 to vector<64x1xf32>
    %10 = arith.maximumf %8, %9 : vector<64x1xf32>
    %11 = math.rsqrt %10 : vector<64x1xf32>
    %12 = arith.mulf %10, %11 : vector<64x1xf32>
    %cst_3 = arith.constant 1.000000e+00 : f32
    %13 = vector.broadcast %cst_3 : f32 to vector<64x1xf32>
    %14 = arith.mulf %12, %13 : vector<64x1xf32>
    %cst_4 = arith.constant -1.500000e+01 : f32
    %cst_5 = arith.constant 1.500000e+01 : f32
    %15 = vector.broadcast %cst_4 : f32 to vector<64x1xf32>
    %16 = arith.maximumf %15, %14 : vector<64x1xf32>
    %17 = vector.broadcast %cst_5 : f32 to vector<64x1xf32>
    %18 = arith.minimumf %17, %16 : vector<64x1xf32>
    %19 = math.exp %18 : vector<64x1xf32>
    %cst_6 = arith.constant 0.000000e+00 : f32
    %20 = vector.broadcast %cst_6 : f32 to vector<64x1xf32>
    %21 = arith.subf %20, %18 : vector<64x1xf32>
    %22 = math.exp %21 : vector<64x1xf32>
    %23 = arith.subf %19, %22 : vector<64x1xf32>
    %cst_7 = arith.constant 5.000000e-01 : f32
    %24 = vector.broadcast %cst_7 : f32 to vector<64x1xf32>
    %25 = arith.mulf %24, %23 : vector<64x1xf32>
    %cst_8 = arith.constant 1.000000e+00 : f32
    %26 = vector.broadcast %cst_8 : f32 to vector<64x1xf32>
    %27 = arith.mulf %26, %25 : vector<64x1xf32>
    %28 = arith.mulf %27, %11 : vector<64x1xf32>
    %29 = vector.broadcast %28 : vector<64x1xf32> to vector<64x8xf32>
    %30 = arith.mulf %29, %5 : vector<64x8xf32>
    %31 = arith.mulf %30, %30 : vector<64x8xf32>
    %cst_9 = arith.constant dense<0.000000e+00> : vector<64xf32>
    %32 = vector.multi_reduction <add>, %31, %cst_9 [1] : vector<64x8xf32> to vector<64xf32>
    %33 = vector.shape_cast %32 : vector<64xf32> to vector<64x1xf32>
    %cst_10 = arith.constant 1.000000e+00 : f32
    %34 = vector.broadcast %cst_10 : f32 to vector<64x1xf32>
    %35 = arith.addf %34, %33 : vector<64x1xf32>
    %cst_11 = arith.constant 1.000000e-07 : f32
    %36 = vector.broadcast %cst_11 : f32 to vector<64x1xf32>
    %37 = arith.maximumf %35, %36 : vector<64x1xf32>
    %38 = math.sqrt %37 : vector<64x1xf32>
    %cst_12 = arith.constant 1.000000e-30 : f32
    %39 = vector.broadcast %cst_12 : f32 to vector<64x1xf32>
    %40 = arith.maximumf %33, %39 : vector<64x1xf32>
    %41 = math.rsqrt %40 : vector<64x1xf32>
    %cst_13 = arith.constant 1.000000e+00 : f32
    %42 = vector.broadcast %cst_13 : f32 to vector<64x1xf32>
    %43 = arith.mulf %38, %42 : vector<64x1xf32>
    %cst_14 = arith.constant 1.00000012 : f32
    %44 = vector.broadcast %cst_14 : f32 to vector<64x1xf32>
    %45 = arith.maximumf %43, %44 : vector<64x1xf32>
    %46 = arith.mulf %45, %45 : vector<64x1xf32>
    %cst_15 = arith.constant 1.000000e+00 : f32
    %47 = vector.broadcast %cst_15 : f32 to vector<64x1xf32>
    %48 = arith.subf %46, %47 : vector<64x1xf32>
    %49 = math.sqrt %48 : vector<64x1xf32>
    %50 = arith.addf %45, %49 : vector<64x1xf32>
    %51 = math.log %50 : vector<64x1xf32>
    %cst_16 = arith.constant 1.000000e+00 : f32
    %52 = vector.broadcast %cst_16 : f32 to vector<64x1xf32>
    %53 = arith.mulf %52, %51 : vector<64x1xf32>
    %54 = arith.mulf %53, %41 : vector<64x1xf32>
    %55 = vector.broadcast %54 : vector<64x1xf32> to vector<64x8xf32>
    %56 = arith.mulf %55, %30 : vector<64x8xf32>
    %c0_17 = arith.constant 0 : index
    %c0_18 = arith.constant 0 : index
    %57 = vector.load %arg2[%c0_17, %c0_18] : memref<8x48xf32, #tpu.memory_space<vmem>>, vector<8x48xf32>
    %cst_19 = arith.constant dense<0.000000e+00> : vector<64x48xf32>
    %58 = tpu.matmul %56, %57, %cst_19 {dimension_numbers = #tpu.dot_dimension_numbers<[1], [0], [0], [1], [0, 0, 1, 1], [], []>} : vector<64x8xf32>, vector<8x48xf32>, vector<64x48xf32> -> vector<64x48xf32>
    %c0_20 = arith.constant 0 : index
    %c0_21 = arith.constant 0 : index
    %59 = vector.load %arg3[%c0_20, %c0_21] : memref<1x48xf32, #tpu.memory_space<vmem>>, vector<1x48xf32>
    %60 = vector.broadcast %59 : vector<1x48xf32> to vector<64x48xf32>
    %61 = arith.addf %58, %60 : vector<64x48xf32>
    %62 = arith.mulf %61, %61 : vector<64x48xf32>
    %c0_22 = arith.constant 0 : index
    %c0_23 = arith.constant 0 : index
    %63 = vector.load %arg4[%c0_22, %c0_23] : memref<48x48xf32, #tpu.memory_space<vmem>>, vector<48x48xf32>
    %cst_24 = arith.constant dense<0.000000e+00> : vector<64x48xf32>
    %64 = tpu.matmul %62, %63, %cst_24 {dimension_numbers = #tpu.dot_dimension_numbers<[1], [0], [0], [1], [0, 0, 1, 1], [], []>} : vector<64x48xf32>, vector<48x48xf32>, vector<64x48xf32> -> vector<64x48xf32>
    %cst_25 = arith.constant 1.000000e-30 : f32
    %65 = vector.broadcast %cst_25 : f32 to vector<64x48xf32>
    %66 = arith.maximumf %64, %65 : vector<64x48xf32>
    %67 = math.rsqrt %66 : vector<64x48xf32>
    %68 = arith.mulf %66, %67 : vector<64x48xf32>
    %cst_26 = arith.constant 1.000000e+00 : f32
    %69 = vector.broadcast %cst_26 : f32 to vector<64x48xf32>
    %70 = arith.mulf %68, %69 : vector<64x48xf32>
    %cst_27 = arith.constant -1.500000e+01 : f32
    %cst_28 = arith.constant 1.500000e+01 : f32
    %71 = vector.broadcast %cst_27 : f32 to vector<64x48xf32>
    %72 = arith.maximumf %71, %70 : vector<64x48xf32>
    %73 = vector.broadcast %cst_28 : f32 to vector<64x48xf32>
    %74 = arith.minimumf %73, %72 : vector<64x48xf32>
    %75 = math.exp %74 : vector<64x48xf32>
    %cst_29 = arith.constant 0.000000e+00 : f32
    %76 = vector.broadcast %cst_29 : f32 to vector<64x48xf32>
    %77 = arith.subf %76, %74 : vector<64x48xf32>
    %78 = math.exp %77 : vector<64x48xf32>
    %79 = arith.subf %75, %78 : vector<64x48xf32>
    %cst_30 = arith.constant 5.000000e-01 : f32
    %80 = vector.broadcast %cst_30 : f32 to vector<64x48xf32>
    %81 = arith.mulf %80, %79 : vector<64x48xf32>
    %cst_31 = arith.constant 1.000000e+00 : f32
    %82 = vector.broadcast %cst_31 : f32 to vector<64x48xf32>
    %83 = arith.mulf %82, %81 : vector<64x48xf32>
    %84 = arith.mulf %83, %67 : vector<64x48xf32>
    %85 = arith.mulf %61, %84 : vector<64x48xf32>
    %86 = arith.mulf %84, %84 : vector<64x48xf32>
    %87 = arith.mulf %86, %64 : vector<64x48xf32>
    %88 = vector.extract_strided_slice %85 {offsets = [0, 0], sizes = [64, 32], strides = [1, 1]} : vector<64x48xf32> to vector<64x32xf32>
    %c0_32 = arith.constant 0 : index
    %c0_33 = arith.constant 0 : index
    %89 = vector.load %arg5[%c0_32, %c0_33] : memref<32x40xf32, #tpu.memory_space<vmem>>, vector<32x40xf32>
    %cst_34 = arith.constant dense<0.000000e+00> : vector<64x40xf32>
    %90 = tpu.matmul %88, %89, %cst_34 {dimension_numbers = #tpu.dot_dimension_numbers<[1], [0], [0], [1], [0, 0, 1, 1], [], []>} : vector<64x32xf32>, vector<32x40xf32>, vector<64x40xf32> -> vector<64x40xf32>
    %91 = vector.extract_strided_slice %87 {offsets = [0, 0], sizes = [64, 32], strides = [1, 1]} : vector<64x48xf32> to vector<64x32xf32>
    %cst_35 = arith.constant 1.000000e+00 : f32
    %92 = vector.broadcast %cst_35 : f32 to vector<64x32xf32>
    %93 = arith.mulf %91, %92 : vector<64x32xf32>
    %cst_36 = arith.constant 0.000000e+00 : f32
    %94 = vector.broadcast %cst_36 : f32 to vector<64x32xf32>
    %95 = arith.subf %94, %93 : vector<64x32xf32>
    %c0_37 = arith.constant 0 : index
    %c0_38 = arith.constant 0 : index
    %96 = vector.load %arg6[%c0_37, %c0_38] : memref<32x40xf32, #tpu.memory_space<vmem>>, vector<32x40xf32>
    %cst_39 = arith.constant dense<0.000000e+00> : vector<64x40xf32>
    %97 = tpu.matmul %95, %96, %cst_39 {dimension_numbers = #tpu.dot_dimension_numbers<[1], [0], [0], [1], [0, 0, 1, 1], [], []>} : vector<64x32xf32>, vector<32x40xf32>, vector<64x40xf32> -> vector<64x40xf32>
    %98 = arith.addf %90, %97 : vector<64x40xf32>
    %99 = math.exp %98 : vector<64x40xf32>
    %cst_40 = arith.constant 0.377964467 : f32
    %100 = vector.broadcast %cst_40 : f32 to vector<64x40xf32>
    %101 = arith.mulf %99, %100 : vector<64x40xf32>
    %102 = vector.extract_strided_slice %85 {offsets = [0, 32], sizes = [64, 16], strides = [1, 1]} : vector<64x48xf32> to vector<64x16xf32>
    %103 = vector.extract_strided_slice %87 {offsets = [0, 32], sizes = [64, 16], strides = [1, 1]} : vector<64x48xf32> to vector<64x16xf32>
    %cst_41 = arith.constant 1.000000e+00 : f32
    %104 = vector.broadcast %cst_41 : f32 to vector<64x16xf32>
    %105 = arith.addf %104, %103 : vector<64x16xf32>
    %cst_42 = arith.constant 1.000000e-07 : f32
    %106 = vector.broadcast %cst_42 : f32 to vector<64x16xf32>
    %107 = arith.maximumf %105, %106 : vector<64x16xf32>
    %108 = math.sqrt %107 : vector<64x16xf32>
    %109 = tpu.iota {dimensions = array<i32: 1>} : vector<64x16xi32>
    %c0_i32_43 = arith.constant 0 : i32
    %110 = vector.broadcast %c0_i32_43 : i32 to vector<64x16xi32>
    %111 = arith.cmpi eq, %109, %110 : vector<64x16xi32>
    %c8_i32 = arith.constant 8 : i32
    %112 = vector.broadcast %c8_i32 : i32 to vector<64x16xi32>
    %113 = arith.cmpi eq, %109, %112 : vector<64x16xi32>
    %114 = arith.ori %111, %113 : vector<64x16xi1>
    %115 = arith.select %114, %108, %102 : vector<64x16xi1>, vector<64x16xf32>
    %cst_44 = arith.constant 0.000000e+00 : f32
    %116 = vector.broadcast %cst_44 : f32 to vector<64x8xf32>
    %117 = vector.extract_strided_slice %101 {offsets = [0, 0], sizes = [32, 40], strides = [1, 1]} : vector<64x40xf32> to vector<32x40xf32>
    %118 = vector.extract_strided_slice %115 {offsets = [0, 0], sizes = [32, 16], strides = [1, 1]} : vector<64x16xf32> to vector<32x16xf32>
    %119 = vector.extract_strided_slice %117 {offsets = [0, 0], sizes = [32, 10], strides = [1, 1]} : vector<32x40xf32> to vector<32x10xf32>
    %120 = vector.extract_strided_slice %117 {offsets = [0, 10], sizes = [32, 10], strides = [1, 1]} : vector<32x40xf32> to vector<32x10xf32>
    %121 = tpu.concatenate %119, %120 in 0 : vector<32x10xf32>, vector<32x10xf32> -> vector<64x10xf32>
    %122 = vector.extract_strided_slice %118 {offsets = [0, 0], sizes = [32, 8], strides = [1, 1]} : vector<32x16xf32> to vector<32x8xf32>
    %123 = vector.extract_strided_slice %118 {offsets = [0, 8], sizes = [32, 8], strides = [1, 1]} : vector<32x16xf32> to vector<32x8xf32>
    %124 = tpu.concatenate %122, %123 in 0 : vector<32x8xf32>, vector<32x8xf32> -> vector<64x8xf32>
    %cst_45 = arith.constant dense<0.000000e+00> : vector<10x8xf32>
    %125 = tpu.matmul %121, %124, %cst_45 {dimension_numbers = #tpu.dot_dimension_numbers<[0], [0], [1], [1], [0, 1, 1, 1], [], []>} : vector<64x10xf32>, vector<64x8xf32>, vector<10x8xf32> -> vector<10x8xf32>
    %126 = vector.extract_strided_slice %117 {offsets = [0, 20], sizes = [32, 10], strides = [1, 1]} : vector<32x40xf32> to vector<32x10xf32>
    %127 = vector.extract_strided_slice %117 {offsets = [0, 30], sizes = [32, 10], strides = [1, 1]} : vector<32x40xf32> to vector<32x10xf32>
    %128 = tpu.concatenate %126, %127 in 0 : vector<32x10xf32>, vector<32x10xf32> -> vector<64x10xf32>
    %cst_46 = arith.constant dense<0.000000e+00> : vector<64x8xf32>
    %129 = tpu.matmul %128, %125, %cst_46 {dimension_numbers = #tpu.dot_dimension_numbers<[1], [0], [0], [1], [0, 0, 1, 1], [], []>} : vector<64x10xf32>, vector<10x8xf32>, vector<64x8xf32> -> vector<64x8xf32>
    %130 = arith.mulf %129, %129 : vector<64x8xf32>
    %cst_47 = arith.constant dense<0.000000e+00> : vector<64xf32>
    %131 = vector.multi_reduction <add>, %130, %cst_47 [1] : vector<64x8xf32> to vector<64xf32>
    %132 = vector.shape_cast %131 : vector<64xf32> to vector<64x1xf32>
    %133 = vector.extract_strided_slice %130 {offsets = [0, 0], sizes = [64, 1], strides = [1, 1]} : vector<64x8xf32> to vector<64x1xf32>
    %cst_48 = arith.constant 2.000000e+00 : f32
    %134 = vector.broadcast %cst_48 : f32 to vector<64x1xf32>
    %135 = arith.mulf %134, %133 : vector<64x1xf32>
    %136 = arith.subf %132, %135 : vector<64x1xf32>
    %137 = math.absf %136 : vector<64x1xf32>
    %cst_49 = arith.constant 1.000000e-15 : f32
    %138 = vector.broadcast %cst_49 : f32 to vector<64x1xf32>
    %139 = arith.maximumf %137, %138 : vector<64x1xf32>
    %140 = math.rsqrt %139 : vector<64x1xf32>
    %cst_50 = arith.constant 1.000000e+00 : f32
    %141 = vector.broadcast %cst_50 : f32 to vector<64x1xf32>
    %142 = arith.mulf %141, %140 : vector<64x1xf32>
    %143 = vector.broadcast %142 : vector<64x1xf32> to vector<64x8xf32>
    %144 = arith.mulf %129, %143 : vector<64x8xf32>
    %145 = arith.addf %116, %144 : vector<64x8xf32>
    %146 = vector.extract_strided_slice %101 {offsets = [32, 0], sizes = [32, 40], strides = [1, 1]} : vector<64x40xf32> to vector<32x40xf32>
    %147 = vector.extract_strided_slice %115 {offsets = [32, 0], sizes = [32, 16], strides = [1, 1]} : vector<64x16xf32> to vector<32x16xf32>
    %148 = vector.extract_strided_slice %146 {offsets = [0, 0], sizes = [32, 10], strides = [1, 1]} : vector<32x40xf32> to vector<32x10xf32>
    %149 = vector.extract_strided_slice %146 {offsets = [0, 10], sizes = [32, 10], strides = [1, 1]} : vector<32x40xf32> to vector<32x10xf32>
    %150 = tpu.concatenate %148, %149 in 0 : vector<32x10xf32>, vector<32x10xf32> -> vector<64x10xf32>
    %151 = vector.extract_strided_slice %147 {offsets = [0, 0], sizes = [32, 8], strides = [1, 1]} : vector<32x16xf32> to vector<32x8xf32>
    %152 = vector.extract_strided_slice %147 {offsets = [0, 8], sizes = [32, 8], strides = [1, 1]} : vector<32x16xf32> to vector<32x8xf32>
    %153 = tpu.concatenate %151, %152 in 0 : vector<32x8xf32>, vector<32x8xf32> -> vector<64x8xf32>
    %cst_51 = arith.constant dense<0.000000e+00> : vector<10x8xf32>
    %154 = tpu.matmul %150, %153, %cst_51 {dimension_numbers = #tpu.dot_dimension_numbers<[0], [0], [1], [1], [0, 1, 1, 1], [], []>} : vector<64x10xf32>, vector<64x8xf32>, vector<10x8xf32> -> vector<10x8xf32>
    %155 = vector.extract_strided_slice %146 {offsets = [0, 20], sizes = [32, 10], strides = [1, 1]} : vector<32x40xf32> to vector<32x10xf32>
    %156 = vector.extract_strided_slice %146 {offsets = [0, 30], sizes = [32, 10], strides = [1, 1]} : vector<32x40xf32> to vector<32x10xf32>
    %157 = tpu.concatenate %155, %156 in 0 : vector<32x10xf32>, vector<32x10xf32> -> vector<64x10xf32>
    %cst_52 = arith.constant dense<0.000000e+00> : vector<64x8xf32>
    %158 = tpu.matmul %157, %154, %cst_52 {dimension_numbers = #tpu.dot_dimension_numbers<[1], [0], [0], [1], [0, 0, 1, 1], [], []>} : vector<64x10xf32>, vector<10x8xf32>, vector<64x8xf32> -> vector<64x8xf32>
    %159 = arith.mulf %158, %158 : vector<64x8xf32>
    %cst_53 = arith.constant dense<0.000000e+00> : vector<64xf32>
    %160 = vector.multi_reduction <add>, %159, %cst_53 [1] : vector<64x8xf32> to vector<64xf32>
    %161 = vector.shape_cast %160 : vector<64xf32> to vector<64x1xf32>
    %162 = vector.extract_strided_slice %159 {offsets = [0, 0], sizes = [64, 1], strides = [1, 1]} : vector<64x8xf32> to vector<64x1xf32>
    %cst_54 = arith.constant 2.000000e+00 : f32
    %163 = vector.broadcast %cst_54 : f32 to vector<64x1xf32>
    %164 = arith.mulf %163, %162 : vector<64x1xf32>
    %165 = arith.subf %161, %164 : vector<64x1xf32>
    %166 = math.absf %165 : vector<64x1xf32>
    %cst_55 = arith.constant 1.000000e-15 : f32
    %167 = vector.broadcast %cst_55 : f32 to vector<64x1xf32>
    %168 = arith.maximumf %166, %167 : vector<64x1xf32>
    %169 = math.rsqrt %168 : vector<64x1xf32>
    %cst_56 = arith.constant 1.000000e+00 : f32
    %170 = vector.broadcast %cst_56 : f32 to vector<64x1xf32>
    %171 = arith.mulf %170, %169 : vector<64x1xf32>
    %172 = vector.broadcast %171 : vector<64x1xf32> to vector<64x8xf32>
    %173 = arith.mulf %158, %172 : vector<64x8xf32>
    %174 = arith.addf %145, %173 : vector<64x8xf32>
    %cst_57 = arith.constant 5.000000e-01 : f32
    %175 = vector.broadcast %cst_57 : f32 to vector<64x8xf32>
    %176 = arith.mulf %174, %175 : vector<64x8xf32>
    %177 = arith.mulf %176, %176 : vector<64x8xf32>
    %cst_58 = arith.constant dense<0.000000e+00> : vector<64xf32>
    %178 = vector.multi_reduction <add>, %177, %cst_58 [1] : vector<64x8xf32> to vector<64xf32>
    %179 = vector.shape_cast %178 : vector<64xf32> to vector<64x1xf32>
    %180 = vector.extract_strided_slice %177 {offsets = [0, 0], sizes = [64, 1], strides = [1, 1]} : vector<64x8xf32> to vector<64x1xf32>
    %cst_59 = arith.constant 2.000000e+00 : f32
    %181 = vector.broadcast %cst_59 : f32 to vector<64x1xf32>
    %182 = arith.mulf %181, %180 : vector<64x1xf32>
    %183 = arith.subf %179, %182 : vector<64x1xf32>
    %184 = math.absf %183 : vector<64x1xf32>
    %cst_60 = arith.constant 1.000000e-15 : f32
    %185 = vector.broadcast %cst_60 : f32 to vector<64x1xf32>
    %186 = arith.maximumf %184, %185 : vector<64x1xf32>
    %187 = math.rsqrt %186 : vector<64x1xf32>
    %cst_61 = arith.constant 1.000000e+00 : f32
    %188 = vector.broadcast %cst_61 : f32 to vector<64x1xf32>
    %189 = arith.mulf %188, %187 : vector<64x1xf32>
    %190 = vector.broadcast %189 : vector<64x1xf32> to vector<64x8xf32>
    %191 = arith.mulf %176, %190 : vector<64x8xf32>
    %c0_62 = arith.constant 0 : index
    %c0_63 = arith.constant 0 : index
    %192 = vector.load %arg7[%c0_62, %c0_63] : memref<64x8xf32, #tpu.memory_space<vmem>>, vector<64x8xf32>
    tpu.vector_store %arg7[%c0_62, %c0_63], %191 {strides = array<i32>} : memref<64x8xf32, #tpu.memory_space<vmem>>, vector<64x8xf32>,
    return
  }
  func.func @transform_0(%arg0: i32) -> (i32, i32) {
    %c0_i32 = arith.constant 0 : i32
    %c0_i32_0 = arith.constant 0 : i32
    %c0_i32_1 = arith.constant 0 : i32
    return %c0_i32, %c0_i32_0 : i32, i32
  }
  func.func @transform_1(%arg0: i32) -> (i32, i32) {
    %c0_i32 = arith.constant 0 : i32
    %c0_i32_0 = arith.constant 0 : i32
    %c0_i32_1 = arith.constant 0 : i32
    return %c0_i32, %c0_i32_0 : i32, i32
  }
  func.func @transform_2(%arg0: i32) -> (i32, i32) {
    %c0_i32 = arith.constant 0 : i32
    %c0_i32_0 = arith.constant 0 : i32
    %c0_i32_1 = arith.constant 0 : i32
    return %c0_i32, %c0_i32_0 : i32, i32
  }
  func.func @transform_3(%arg0: i32) -> (i32, i32) {
    %c0_i32 = arith.constant 0 : i32
    %c0_i32_0 = arith.constant 0 : i32
    %c0_i32_1 = arith.constant 0 : i32
    return %c0_i32, %c0_i32_0 : i32, i32
  }
  func.func @transform_4(%arg0: i32) -> (i32, i32) {
    %c0_i32 = arith.constant 0 : i32
    %c0_i32_0 = arith.constant 0 : i32
    %c0_i32_1 = arith.constant 0 : i32
    return %c0_i32, %c0_i32_0 : i32, i32
  }
  func.func @transform_5(%arg0: i32) -> (i32, i32) {
    %c0_i32 = arith.constant 0 : i32
    %c0_i32_0 = arith.constant 0 : i32
    %c0_i32_1 = arith.constant 0 : i32
    return %c0_i32, %c0_i32_0 : i32, i32
  }
  func.func @transform_6(%arg0: i32) -> (i32, i32) {
    %c0_i32 = arith.constant 0 : i32
    %c0_i32_0 = arith.constant 0 : i32
    %c0_i32_1 = arith.constant 0 : i32
    return %c0_i32, %c0_i32_0 : i32, i32
  }
}

</mosaic_0001>

<bundles_post_ra>
// kernel: light_hyperformer_forward.1
= control target key start
LH: loop header
LB: loop body
LE: loop exit
PB: predicated region body
PF: predicated region fallthrough
CT: control target
= control target key end

     0   :  { %v31_v0 = vlaneseq  ;;  %vm50_vm1 = vcmask 64512   ;;  %s2703_s14 = smov 118   ;;  %s2704_s15 = smov 120   ;;  %s4213_s0 = inlined_call_operand.vmem [shape: f32[64,8], index: 0, kind: input, shape index: {}]   ;;  %s4214_s2 = inlined_call_operand.vmem [shape: f32[1,48], index: 2, kind: input, shape index: {}]   ;;  %s4215_s1 = inlined_call_operand.vmem [shape: f32[8,48], index: 1, kind: input, shape index: {}]   ;;  %s4216_s3 = inlined_call_operand.vmem [shape: f32[48,48], index: 3, kind: input, shape index: {}]   ;;  %s4217_s5 = inlined_call_operand.vmem [shape: f32[32,40], index: 5, kind: input, shape index: {}]   ;;  %s4218_s4 = inlined_call_operand.vmem [shape: f32[32,40], index: 4, kind: input, shape index: {}]   ;;  %s4219_s6 = inlined_call_operand.vmem [shape: f32[64,8], index: 6, kind: output, shape index: {}]  }
   0x1   :  { %v27_v1 = vld [vmem:[%s4213_s0 + $0x20] sm:$0xff]  ;;  %v25_v3 = vld [vmem:[%s4213_s0 + $0x10] sm:$0xff]  ;;  %v28_v5 = vld [vmem:[%s4213_s0 + $0x28] sm:$0xff]  ;;  %s2705_s16 = smov 108  }
   0x2   :  { %v2745_v2 = vand.u32 127, %v31_v0  ;;  %v23_v4 = vld [vmem:[%s4213_s0] sm:$0xff]  ;;  %v26_v6 = vld [vmem:[%s4213_s0 + $0x18] sm:$0xff]  ;;  %v24_v10 = vld [vmem:[%s4213_s0 + $0x8] sm:$0xff] }
   0x3   :  { %v30_v23 = vld [vmem:[%s4213_s0 + $0x38] sm:$0xff]  ;;  %v29_v24 = vld [vmem:[%s4213_s0 + $0x30] sm:$0xff] }
   0x4   :  { %vm33_vm0 = vcmp.ne.s32.totalorder %v2745_v2, 0 }
   0x5   :  { %v2762_v7 = vsel %vm33_vm0, %v27_v1, 0.0  ;;  %v2766_v8 = vsel %vm33_vm0, %v25_v3, 0.0  ;;  %v2770_v9 = vsel %vm33_vm0, %v23_v4, 0.0  ;;  %v2783_v14 = vsel %vm33_vm0, %v28_v5, 0.0 }
   0x6   :  { %v46_v11 = vmul.f32 %v2762_v7, %v2762_v7  ;;  %v44_v12 = vmul.f32 %v2766_v8, %v2766_v8  ;;  %v42_v13 = vmul.f32 %v2770_v9, %v2770_v9  ;;  %v2787_v15 = vsel %vm33_vm0, %v26_v6, 0.0 }
   0x7   :  { %v2794_v19 = vsel %vm33_vm0, %v24_v10, 0.0  ;;  %v47_v20 = vmul.f32 %v2783_v14, %v2783_v14  ;;  %v45_v21 = vmul.f32 %v2787_v15, %v2787_v15  ;;  %v2813_v28 = vsel %vm33_vm0, %v30_v23, 0.0 }
   0x8   :  { %v63_v16 = vsel %vm50_vm1, %v46_v11, 0.0  ;;  %v57_v17 = vsel %vm50_vm1, %v44_v12, 0.0  ;;  %v51_v18 = vsel %vm50_vm1, %v42_v13, 0.0  ;;  %v43_v22 = vmul.f32 %v2794_v19, %v2794_v19 }
   0x9   :  { %64 = vadd.xlane.f32.xlu2 %v63_v16  ;;  %58 = vadd.xlane.f32.xlu1 %v57_v17  ;;  %v66_v25 = vsel %vm50_vm1, %v47_v20, 0.0  ;;  %v60_v26 = vsel %vm50_vm1, %v45_v21, 0.0  ;;  %v2817_v29 = vsel %vm33_vm0, %v29_v24, 0.0  ;;  %v49_v30 = vmul.f32 %v2813_v28, %v2813_v28 }
   0xa   :  { %52 = vadd.xlane.f32.xlu0 %v51_v18  ;;  %v54_v27 = vsel %vm50_vm1, %v43_v22, 0.0  ;;  %v48_v31 = vmul.f32 %v2817_v29, %v2817_v29 }
   0xb   :  { %v72_v32 = vsel %vm50_vm1, %v49_v30, 0.0 }
   0xc   :  { %v69_v33 = vsel %vm50_vm1, %v48_v31, 0.0 }
  0x11   :  { %67 = vadd.xlane.f32.xlu2 %v66_v25  ;;  %61 = vadd.xlane.f32.xlu1 %v60_v26 }
  0x12   :  { %55 = vadd.xlane.f32.xlu0 %v54_v27 }
  0x19   :  { %73 = vadd.xlane.f32.xlu1 %v72_v32 }
  0x1a   :  { %70 = vadd.xlane.f32.xlu0 %v69_v33 }
  0x7c   :  { %v65_v34 = vpop.xlane.xlu2 %64  ;;  %v59_v35 = vpop.xlane.xlu1 %58 }
  0x7d   :  { %v2825_v36 = vmax.f32 %v65_v34, 1e-30  ;;  %v2827_v37 = vmax.f32 %v59_v35, 1e-30  ;;  %v53_v38 = vpop.xlane.xlu0 %52 }
  0x7e   :  { %v2829_v39 = vmax.f32 %v53_v38, 1e-30 }
  0x7f   :  { %2462 = vrsqrt.f32 %v2825_v36  ;;  %vm129_vm2 = vweird.f32 %v2825_v36  ;;  %vm109_vm3 = vweird.f32 %v2827_v37 }
  0x80   :  { %2464 = vrsqrt.f32 %v2827_v37  ;;  %vm89_vm6 = vweird.f32 %v2829_v39 }
  0x81   :  { %2466 = vrsqrt.f32 %v2829_v39 }
  0x84   :  { %v68_v40 = vpop.xlane.xlu2 %67  ;;  %v62_v41 = vpop.xlane.xlu1 %61 }
  0x85   :  { %v2834_v42 = vpop.eup %2462  ;;  %v2836_v43 = vmax.f32 %v68_v40, 1e-30  ;;  %v2838_v44 = vmax.f32 %v62_v41, 1e-30  ;;  %v56_v45 = vpop.xlane.xlu0 %55 }
  0x86   :  { %v2465_v46 = vpop.eup %2464  ;;  %v124_v47 = vmul.f32 %v2834_v42, %v2825_v36  ;;  %v2842_v48 = vmax.f32 %v56_v45, 1e-30  ;;  %vm130_vm4 = vweird.f32 %v2834_v42 }
  0x87   :  { %v2467_v49 = vpop.eup %2466  ;;  %v104_v50 = vmul.f32 %v2465_v46, %v2827_v37  ;;  %2468 = vrsqrt.f32 %v2836_v43  ;;  %vm110_vm5 = vweird.f32 %v2465_v46  ;;  %vm139_vm9 = vweird.f32 %v2836_v43  ;;  %vm2884_vm10 = vmor %vm129_vm2, %vm130_vm4 }
  0x88   :  { %v125_v51 = vmul.f32 %v2834_v42, %v124_v47  ;;  %v84_v52 = vmul.f32 %v2467_v49, %v2829_v39  ;;  %2470 = vrsqrt.f32 %v2838_v44  ;;  %vm90_vm7 = vweird.f32 %v2467_v49  ;;  %vm2871_vm8 = vmor %vm109_vm3, %vm110_vm5 }
  0x89   :  { %v105_v53 = vmul.f32 %v2465_v46, %v104_v50  ;;  %2472 = vrsqrt.f32 %v2842_v48  ;;  %vm119_vm11 = vweird.f32 %v2838_v44  ;;  %vm91_vm12 = vmor %vm89_vm6, %vm90_vm7  ;;  %vm99_vm15 = vweird.f32 %v2842_v48 }
  0x8a   :  { %v126_v54 = vmul.f32 0.5, %v125_v51  ;;  %v85_v55 = vmul.f32 %v2467_v49, %v84_v52 }
  0x8b   :  { %v106_v56 = vmul.f32 0.5, %v105_v53 }
  0x8c   :  { %v86_v57 = vmul.f32 0.5, %v85_v55  ;;  %v74_v58 = vpop.xlane.xlu1 %73  ;;  %v127_v0 = vsub.f32 1.5, %v126_v54 }
  0x8d   :  { %v2852_v59 = vpop.eup %2468  ;;  %v107_v60 = vsub.f32 1.5, %v106_v56  ;;  %v71_v61 = vpop.xlane.xlu0 %70  ;;  %v2855_v62 = vmax.f32 %v74_v58, 1e-30 }
  0x8e   :  { %v2857_v63 = vpop.eup %2470  ;;  %v87_v1 = vsub.f32 1.5, %v86_v57  ;;  %v134_v3 = vmul.f32 %v2852_v59, %v2836_v43  ;;  %v2861_v4 = vmax.f32 %v71_v61, 1e-30  ;;  %vm140_vm13 = vweird.f32 %v2852_v59 }
  0x8f   :  { %v2863_v5 = vpop.eup %2472  ;;  %v114_v6 = vmul.f32 %v2857_v63, %v2838_v44  ;;  %2474 = vrsqrt.f32 %v2855_v62  ;;  %v108_v17 = vmul.f32 %v2465_v46, %v107_v60  ;;  %v128_v22 = vmul.f32 %v2834_v42, %v127_v0  ;;  %vm2919_vm4 = vmor %vm139_vm9, %vm140_vm13 }
  0x90   :  { %v135_v11 = vmul.f32 %v2852_v59, %v134_v3  ;;  %v94_v12 = vmul.f32 %v2863_v5, %v2842_v48  ;;  %2476 = vrsqrt.f32 %v2861_v4  ;;  %v88_v18 = vmul.f32 %v2467_v49, %v87_v1 }
  0x91   :  { %v115_v16 = vmul.f32 %v2857_v63, %v114_v6  ;;  %vm120_vm14 = vweird.f32 %v2857_v63  ;;  %v2896_v24 = vsel %vm2871_vm8, %v2465_v46, %v108_v17  ;;  %vm159_vm0 = vweird.f32 %v2855_v62 }
  0x92   :  { %v136_v20 = vmul.f32 0.5, %v135_v11  ;;  %v95_v21 = vmul.f32 %v2863_v5, %v94_v12  ;;  %v2898_v25 = vsel %vm91_vm12, %v2467_v49, %v88_v18  ;;  %v165_v30 = vmul.f32 %v2896_v24, %v2827_v37  ;;  %vm2932_vm7 = vmor %vm119_vm11, %vm120_vm14 }
  0x93   :  { %v116_v23 = vmul.f32 0.5, %v115_v16  ;;  %v163_v31 = vmul.f32 %v2898_v25, %v2829_v39  ;;  %vm100_vm2 = vweird.f32 %v2863_v5  ;;  %vm149_vm3 = vweird.f32 %v2861_v4 }
  0x94   :  { %v137_v26 = vsub.f32 1.5, %v136_v20  ;;  %v96_v27 = vmul.f32 0.5, %v95_v21  ;;  %v2913_v34 = vsel %vm2884_vm10, %v2834_v42, %v128_v22  ;;  %v2306_v40 = vclamps-f32 %v165_v30, 15.0  ;;  %vm101_vm8 = vmor %vm99_vm15, %vm100_vm2 }
  0x95   :  { %v2906_v32 = vpop.eup %2474  ;;  %v117_v33 = vsub.f32 1.5, %v116_v23  ;;  %v2304_v42 = vclamps-f32 %v163_v31, 15.0  ;;  %v167_v10 = vmul.f32 %v2913_v34, %v2825_v36 }
  0x96   :  { %v2477_v35 = vpop.eup %2476  ;;  %v97_v38 = vsub.f32 1.5, %v96_v27  ;;  %v154_v39 = vmul.f32 %v2906_v32, %v2855_v62  ;;  %vm160_vm5 = vweird.f32 %v2906_v32  ;;  %v138_v45 = vmul.f32 %v2852_v59, %v137_v26 }
  0x97   :  { %v144_v41 = vmul.f32 %v2477_v35, %v2861_v4  ;;  %vm150_vm6 = vweird.f32 %v2477_v35  ;;  %v191_v49 = vmul.f32 1.442695, %v2306_v40  ;;  %v205_v50 = vsub.f32 0.0, %v2306_v40  ;;  %vm2971_vm10 = vmor %vm159_vm0, %vm160_vm5 }
  0x98   :  { %v155_v47 = vmul.f32 %v2906_v32, %v154_v39  ;;  %v118_v51 = vmul.f32 %v2857_v63, %v117_v33  ;;  %v187_v53 = vmul.f32 1.442695, %v2304_v42  ;;  %v203_v54 = vsub.f32 0.0, %v2304_v42  ;;  %vm2962_vm9 = vmor %vm149_vm3, %vm150_vm6 }
  0x99   :  { %v145_v52 = vmul.f32 %v2477_v35, %v144_v41  ;;  %v2941_v55 = vsel %vm2919_vm4, %v2852_v59, %v138_v45  ;;  %2478 = vpow2.f32 %v191_v49  ;;  %v215_v57 = vmul.f32 1.442695, %v205_v50 }
  0x9a   :  { %v156_v56 = vmul.f32 0.5, %v155_v47  ;;  %v168_v58 = vmul.f32 %v2941_v55, %v2836_v43  ;;  %2480 = vpow2.f32 %v187_v53  ;;  %v211_v61 = vmul.f32 1.442695, %v203_v54 }
  0x9b   :  { %v146_v60 = vmul.f32 0.5, %v145_v52  ;;  %v2948_v0 = vsel %vm2932_vm7, %v2857_v63, %v118_v51  ;;  %2482 = vpow2.f32 %v215_v57  ;;  %v98_v6 = vmul.f32 %v2863_v5, %v97_v38 }
  0x9c   :  { %v157_v1 = vsub.f32 1.5, %v156_v56  ;;  %v2309_v3 = vclamps-f32 %v168_v58, 15.0  ;;  %v166_v59 = vmul.f32 %v2948_v0, %v2838_v44  ;;  %2484 = vpow2.f32 %v211_v61 }
  0x9d   :  { %v147_v43 = vsub.f32 1.5, %v146_v60  ;;  %v2976_v36 = vsel %vm101_vm8, %v2863_v5, %v98_v6  ;;  %v2308_v17 = vclamps-f32 %v167_v10, 15.0 }
  0x9e   :  { %v197_v44 = vmul.f32 1.442695, %v2309_v3  ;;  %v208_v11 = vsub.f32 0.0, %v2309_v3  ;;  %v2307_v12 = vclamps-f32 %v166_v59, 15.0  ;;  %v158_v13 = vmul.f32 %v2906_v32, %v157_v1 }
  0x9f   :  { %v148_v18 = vmul.f32 %v2477_v35, %v147_v43  ;;  %v2479_v20 = vpop.eup %2478  ;;  %v164_v27 = vmul.f32 %v2976_v36, %v2842_v48  ;;  %v195_v30 = vmul.f32 1.442695, %v2308_v17  ;;  %v207_v31 = vsub.f32 0.0, %v2308_v17 }
  0xa0   :  { %2486 = vpow2.f32 %v197_v44  ;;  %v221_v21 = vmul.f32 1.442695, %v208_v11  ;;  %v193_v22 = vmul.f32 1.442695, %v2307_v12  ;;  %v206_v23 = vsub.f32 0.0, %v2307_v12  ;;  %v2481_v26 = vpop.eup %2480 }
  0xa1   :  { %v2982_v33 = vsel %vm2962_vm9, %v2477_v35, %v148_v18  ;;  %v2483_v37 = vpop.eup %2482  ;;  %v2989_v39 = vsel %vm2971_vm10, %v2906_v32, %v158_v13  ;;  %v2305_v48 = vclamps-f32 %v164_v27, 15.0  ;;  %v219_v42 = vmul.f32 1.442695, %v207_v31 }
  0xa2   :  { %2488 = vpow2.f32 %v221_v21  ;;  %v217_v5 = vmul.f32 1.442695, %v206_v23  ;;  %v169_v38 = vmul.f32 %v2982_v33, %v2861_v4  ;;  %v2485_v40 = vpop.eup %2484  ;;  %v229_v41 = vsub.f32 %v2479_v20, %v2483_v37 }
  0xa3   :  { %2490 = vpow2.f32 %v193_v22  ;;  %v227_v45 = vsub.f32 %v2481_v26, %v2485_v40  ;;  %v170_v46 = vmul.f32 %v2989_v39, %v2855_v62  ;;  %v189_v49 = vmul.f32 1.442695, %v2305_v48 }
  0xa4   :  { %2492 = vpow2.f32 %v217_v5  ;;  %v2310_v35 = vclamps-f32 %v169_v38, 15.0  ;;  %v237_v47 = vmul.f32 0.5, %v229_v41  ;;  %v204_v50 = vsub.f32 0.0, %v2305_v48 }
  0xa5   :  { %2494 = vpow2.f32 %v195_v30  ;;  %v235_v51 = vmul.f32 0.5, %v227_v45  ;;  %v2311_v56 = vclamps-f32 %v170_v46, 15.0 }
  0xa6   :  { %v2487_v4 = vpop.eup %2486  ;;  %2496 = vpow2.f32 %v219_v42  ;;  %v199_v32 = vmul.f32 1.442695, %v2310_v35  ;;  %v209_v52 = vsub.f32 0.0, %v2310_v35  ;;  %v245_v53 = vmul.f32 %v237_v47, %v2896_v24 }
  0xa7   :  { %2498 = vpow2.f32 %v189_v49  ;;  %v213_v54 = vmul.f32 1.442695, %v204_v50  ;;  %v243_v58 = vmul.f32 %v235_v51, %v2898_v25  ;;  %v201_v3 = vmul.f32 1.442695, %v2311_v56 }
  0xa8   :  { %v2489_v57 = vpop.eup %2488  ;;  %2500 = vpow2.f32 %v199_v32  ;;  %v223_v60 = vmul.f32 1.442695, %v209_v52  ;;  %v2996_v61 = vmul.f32 %v245_v53, %v2766_v8  ;;  %v210_v24 = vsub.f32 0.0, %v2311_v56 }
  0xa9   :  { %v2491_v62 = vpop.eup %2490  ;;  %v232_v1 = vsub.f32 %v2487_v4, %v2489_v57  ;;  %2502 = vpow2.f32 %v213_v54  ;;  %v2999_v43 = vmul.f32 %v243_v58, %v2770_v9 }
  0xaa   :  { %v2493_v59 = vpop.eup %2492  ;;  %2504 = vpow2.f32 %v223_v60  ;;  %v261_v10 = vmul.f32 %v2996_v61, %v2996_v61  ;;  %v225_v11 = vmul.f32 1.442695, %v210_v24 }
  0xab   :  { %v2495_v6 = vpop.eup %2494  ;;  %v240_v25 = vmul.f32 0.5, %v232_v1  ;;  %v230_v63 = vsub.f32 %v2491_v62, %v2493_v59  ;;  %v259_v8 = vmul.f32 %v2999_v43, %v2999_v43  ;;  %2506 = vpow2.f32 %v201_v3 }
  0xac   :  { %v2497_v44 = vpop.eup %2496  ;;  %v273_v13 = vsel %vm50_vm1, %v261_v10, 0.0  ;;  %2508 = vpow2.f32 %v225_v11  ;;  %v651_v10 = vld [vmem:[%s4215_s1] sm:$0xff] }
  0xad   :  { %v2499_v12 = vpop.eup %2498  ;;  %v248_v16 = vmul.f32 %v240_v25, %v2941_v55  ;;  %v238_v9 = vmul.f32 0.5, %v230_v63  ;;  %274 = vadd.xlane.f32.xlu1 %v273_v13  ;;  %v267_v18 = vsel %vm50_vm1, %v259_v8, 0.0  ;;  %v231_v20 = vsub.f32 %v2495_v6, %v2497_v44  ;;  %695 = vmatpush.msra.mxu0 %v651_v10 }
  0xae   :  { %v2501_v17 = vpop.eup %2500  ;;  %268 = vadd.xlane.f32.xlu2 %v267_v18 }
  0xaf   :  { %v2503_v21 = vpop.eup %2502  ;;  %v3009_v22 = vmul.f32 %v248_v16, %v2783_v14  ;;  %v246_v23 = vmul.f32 %v238_v9, %v2948_v0  ;;  %v239_v5 = vmul.f32 0.5, %v231_v20 }
  0xb0   :  { %v2505_v26 = vpop.eup %2504  ;;  %v228_v27 = vsub.f32 %v2499_v12, %v2503_v21 }
  0xb1   :  { %v264_v55 = vmul.f32 %v3009_v22, %v3009_v22  ;;  %v3015_v30 = vmul.f32 %v246_v23, %v2787_v15  ;;  %v233_v31 = vsub.f32 %v2501_v17, %v2505_v26  ;;  %v2507_v38 = vpop.eup %2506  ;;  %v247_v35 = vmul.f32 %v239_v5, %v2913_v34 }
  0xb2   :  { %v236_v37 = vmul.f32 0.5, %v228_v27  ;;  %v2509_v48 = vpop.eup %2508 }
  0xb3   :  { %v282_v40 = vsel %vm50_vm1, %v264_v55, 0.0  ;;  %v262_v14 = vmul.f32 %v3015_v30, %v3015_v30  ;;  %v241_v41 = vmul.f32 0.5, %v233_v31  ;;  %v234_v46 = vsub.f32 %v2507_v38, %v2509_v48 }
  0xb4   :  { %v244_v0 = vmul.f32 %v236_v37, %v2976_v36 }
  0xb5   :  { %v276_v42 = vsel %vm50_vm1, %v262_v14, 0.0  ;;  %v249_v45 = vmul.f32 %v241_v41, %v2982_v33  ;;  %283 = vadd.xlane.f32.xlu1 %v282_v40  ;;  %v3036_v33 = vmul.f32 %v247_v35, %v2762_v7 }
  0xb6   :  { %v3024_v15 = vmul.f32 %v244_v0, %v2794_v19  ;;  %277 = vadd.xlane.f32.xlu2 %v276_v42  ;;  %v242_v19 = vmul.f32 0.5, %v234_v46 }
  0xb7   :  { %v3028_v47 = vmul.f32 %v249_v45, %v2817_v29  ;;  %v263_v4 = vmul.f32 %v3036_v33, %v3036_v33 }
  0xb8   :  { %v260_v49 = vmul.f32 %v3024_v15, %v3024_v15  ;;  %v250_v29 = vmul.f32 %v242_v19, %v2989_v39 }
  0xb9   :  { %v265_v36 = vmul.f32 %v3028_v47, %v3028_v47  ;;  %v279_v51 = vsel %vm50_vm1, %v263_v4, 0.0 }
  0xba   :  { %v270_v50 = vsel %vm50_vm1, %v260_v49, 0.0  ;;  %v3044_v32 = vmul.f32 %v250_v29, %v2813_v28 }
  0xbb   :  { %271 = vadd.xlane.f32.xlu0 %v270_v50  ;;  %v285_v34 = vsel %vm50_vm1, %v265_v36, 0.0 }
  0xbc   :  { %v266_v7 = vmul.f32 %v3044_v32, %v3044_v32 }
  0xbe   :  { %286 = vadd.xlane.f32.xlu2 %v285_v34  ;;  %v288_v52 = vsel %vm50_vm1, %v266_v7, 0.0 }
  0xc3   :  { %280 = vadd.xlane.f32.xlu0 %v279_v51 }
  0xcb   :  { %289 = vadd.xlane.f32.xlu0 %v288_v52 }
 0x120   :  { %v275_v53 = vpop.xlane.xlu1 %274 }
 0x121   :  { %v269_v54 = vpop.xlane.xlu2 %268  ;;  %v293_v57 = vadd.f32 1.0, %v275_v53  ;;  %v3062_v8 = vmax.f32 %v275_v53, 1e-30 }
 0x122   :  { %v291_v56 = vadd.f32 1.0, %v269_v54  ;;  %v3052_v1 = vmax.f32 %v269_v54, 1e-30 }
 0x123   :  { %v3049_v39 = vmax.f32 %v293_v57, 1e-07 }
 0x124   :  { %v299_v58 = vmax.f32 %v291_v56, 1e-07  ;;  %vm417_vm5 = vweird.f32 %v3052_v1 }
 0x125   :  { %vm338_vm13 = vcmp.eq.f32.partialorder %v3049_v39, inf  ;;  %vm340_vm14 = vcmp.eq.f32.partialorder %v3049_v39, 0.0 }
 0x126   :  { %2510 = vrsqrt.f32 %v299_v58  ;;  %vm314_vm11 = vcmp.eq.f32.partialorder %v299_v58, inf  ;;  %vm316_vm12 = vcmp.eq.f32.partialorder %v299_v58, 0.0  ;;  %v317_v40 = vand.u32 2147483648, %v299_v58 }
 0x127   :  { %2512 = vrsqrt.f32 %v3049_v39 }
 0x128   :  { %2514 = vrsqrt.f32 %v3052_v1  ;;  %v3074_v20 = vpop.xlane.xlu1 %283 }
 0x129   :  { %v278_v60 = vpop.xlane.xlu2 %277  ;;  %v296_v38 = vadd.f32 1.0, %v3074_v20 }
 0x12a   :  { %v294_v28 = vadd.f32 1.0, %v278_v60  ;;  %v3093_v49 = vmax.f32 %v278_v60, 1e-30 }
 0x12b   :  { %v3097_v19 = vmax.f32 %v296_v38, 1e-07 }
 0x12c   :  { %v2511_v62 = vpop.eup %2510  ;;  %v3054_v6 = vmax.f32 %v294_v28, 1e-07 }
 0x12d   :  { %v308_v59 = vmul.f32 %v2511_v62, %v299_v58  ;;  %v2513_v44 = vpop.eup %2512 }
 0x12e   :  { %v272_v3 = vpop.xlane.xlu0 %271  ;;  %v332_v13 = vmul.f32 %v2513_v44, %v3049_v39  ;;  %v3070_v9 = vpop.eup %2514  ;;  %vm350_vm3 = vcmp.eq.f32.partialorder %v3054_v6, inf  ;;  %vm352_vm4 = vcmp.eq.f32.partialorder %v3054_v6, 0.0 }
 0x12f   :  { %v292_v24 = vadd.f32 1.0, %v272_v3  ;;  %v309_v25 = vmul.f32 %v2511_v62, %v308_v59  ;;  %v3072_v17 = vmax.f32 %v272_v3, 1e-30  ;;  %v412_v55 = vmul.f32 %v3070_v9, %v3052_v1 }
 0x130   :  { %v333_v26 = vmul.f32 %v2513_v44, %v332_v13  ;;  %vm418_vm15 = vweird.f32 %v3070_v9  ;;  %v341_v59 = vand.u32 2147483648, %v3049_v39 }
 0x131   :  { %v3060_v63 = vmax.f32 %v292_v24, 1e-07  ;;  %v310_v11 = vmul.f32 0.5, %v309_v25  ;;  %v413_v45 = vmul.f32 %v3070_v9, %v412_v55  ;;  %v3099_v34 = vpop.xlane.xlu2 %286  ;;  %vm3188_vm6 = vmor %vm417_vm5, %vm418_vm15 }
 0x132   :  { %v334_v0 = vmul.f32 0.5, %v333_v26  ;;  %v297_v57 = vadd.f32 1.0, %v3099_v34 }
 0x133   :  { %2516 = vrsqrt.f32 %v3060_v63  ;;  %v311_v12 = vsub.f32 1.5, %v310_v11  ;;  %v414_v52 = vmul.f32 0.5, %v413_v45  ;;  %vm326_vm0 = vcmp.eq.f32.partialorder %v3060_v63, inf }
 0x134   :  { %2518 = vrsqrt.f32 %v3054_v6  ;;  %v335_v4 = vsub.f32 1.5, %v334_v0  ;;  %v3128_v11 = vmax.f32 %v297_v57, 1e-07  ;;  %v329_v13 = vand.u32 2147483648, %v3060_v63 }
 0x135   :  { %2520 = vrsqrt.f32 %v3062_v8  ;;  %v312_v23 = vmul.f32 %v2511_v62, %v311_v12  ;;  %v415_v24 = vsub.f32 1.5, %v414_v52  ;;  %vm328_vm2 = vcmp.eq.f32.partialorder %v3060_v63, 0.0 }
 0x136   :  { %v3068_v16 = vpop.xlane.xlu0 %280  ;;  %2522 = vrsqrt.f32 %v3072_v17  ;;  %v336_v54 = vmul.f32 %v2513_v44, %v335_v4  ;;  %v353_v52 = vand.u32 2147483648, %v3054_v6  ;;  %v3183_v57 = vmax.f32 %v3074_v20, 1e-30 }
 0x137   :  { %v295_v21 = vadd.f32 1.0, %v3068_v16  ;;  %v313_v37 = vmul.f32 %v312_v23, %v299_v58  ;;  %v3156_v45 = vmul.f32 %v3070_v9, %v415_v24 }
 0x138   :  { %v337_v28 = vmul.f32 %v336_v54, %v3049_v39 }
 0x139   :  { %v2517_v18 = vpop.eup %2516  ;;  %v3086_v41 = vmax.f32 %v295_v21, 1e-07  ;;  %v315_v48 = vsel %vm314_vm11, %v299_v58, %v313_v37  ;;  %v420_v20 = vsel %vm3188_vm6, %v3070_v9, %v3156_v45 }
 0x13a   :  { %v3077_v27 = vpop.eup %2518  ;;  %v320_v31 = vmul.f32 %v2517_v18, %v3060_v63  ;;  %v318_v35 = vsel %vm316_vm12, %v317_v40, %v315_v48  ;;  %v339_v25 = vsel %vm338_vm13, %v3049_v39, %v337_v28 }
 0x13b   :  { %v3082_v5 = vpop.eup %2520  ;;  %v344_v42 = vmul.f32 %v3077_v27, %v3054_v6  ;;  %v3095_v36 = vmax.f32 %v318_v35, 1.0000001  ;;  %2524 = vrsqrt.f32 %v3086_v41  ;;  %v3162_v35 = vmax.f32 %v3068_v16, 1e-30 }
 0x13c   :  { %v321_v14 = vmul.f32 %v2517_v18, %v320_v31  ;;  %v432_v46 = vmul.f32 %v3082_v5, %v3062_v8  ;;  %v3106_v7 = vpop.eup %2522  ;;  %2526 = vrsqrt.f32 %v3093_v49  ;;  %vm362_vm9 = vcmp.eq.f32.partialorder %v3086_v41, inf }
 0x13d   :  { %v345_v29 = vmul.f32 %v3077_v27, %v344_v42  ;;  %v499_v51 = vmul.f32 %v3095_v36, %v3095_v36  ;;  %2528 = vrsqrt.f32 %v3097_v19  ;;  %v422_v3 = vmul.f32 %v3106_v7, %v3072_v17 }
 0x13e   :  { %v322_v50 = vmul.f32 0.5, %v321_v14  ;;  %v433_v56 = vmul.f32 %v3082_v5, %v432_v46  ;;  %v3130_v12 = vpop.xlane.xlu0 %289  ;;  %vm364_vm10 = vcmp.eq.f32.partialorder %v3086_v41, 0.0  ;;  %vm428_vm5 = vweird.f32 %v3106_v7 }
 0x13f   :  { %v3112_v58 = vadd.f32 -1.0, %v499_v51  ;;  %v346_v62 = vmul.f32 0.5, %v345_v29  ;;  %v423_v37 = vmul.f32 %v3106_v7, %v422_v3  ;;  %v298_v14 = vadd.f32 1.0, %v3130_v12 }
 0x140   :  { %v323_v53 = vsub.f32 1.5, %v322_v50  ;;  %v3135_v23 = vmul.f32 0.5, %v433_v56 }
 0x141   :  { %2530 = vrsqrt.f32 %v3112_v58  ;;  %v3126_v44 = vpop.eup %2524  ;;  %v347_v21 = vsub.f32 1.5, %v346_v62  ;;  %v3169_v29 = vmul.f32 0.5, %v423_v37  ;;  %v3176_v54 = vmax.f32 %v298_v14, 1e-07 }
 0x142   :  { %v324_v60 = vmul.f32 %v2517_v18, %v323_v53  ;;  %v342_v18 = vsel %vm340_vm14, %v341_v59, %v339_v25  ;;  %v3141_v31 = vpop.eup %2526  ;;  %v356_v0 = vmul.f32 %v3126_v44, %v3086_v41  ;;  %2532 = vrsqrt.f32 %v3128_v11 }
 0x143   :  { %v3139_v55 = vmax.f32 %v342_v18, 1.0000001  ;;  %v348_v40 = vmul.f32 %v3077_v27, %v347_v21  ;;  %v3146_v39 = vpop.eup %2528  ;;  %v435_v28 = vsub.f32 1.5, %v3135_v23  ;;  %v3194_v62 = vmul.f32 %v3141_v31, %v3093_v49 }
 0x144   :  { %v325_v10 = vmul.f32 %v324_v60, %v3060_v63  ;;  %v357_v53 = vmul.f32 %v3126_v44, %v356_v0  ;;  %vm522_vm7 = vcmp.eq.f32.partialorder %v3112_v58, inf  ;;  %vm524_vm8 = vcmp.eq.f32.partialorder %v3112_v58, 0.0 }
 0x145   :  { %v349_v27 = vmul.f32 %v348_v40, %v3054_v6  ;;  %vm374_vm14 = vcmp.eq.f32.partialorder %v3097_v19, inf }
 0x146   :  { %v327_v26 = vsel %vm326_vm0, %v3060_v63, %v325_v10  ;;  %v501_v63 = vmul.f32 %v3139_v55, %v3139_v55  ;;  %v358_v24 = vmul.f32 0.5, %v357_v53  ;;  %v425_v10 = vsub.f32 1.5, %v3169_v29 }
 0x147   :  { %v330_v38 = vsel %vm328_vm2, %v329_v13, %v327_v26  ;;  %v2531_v42 = vpop.eup %2530  ;;  %v351_v51 = vsel %vm350_vm3, %v3054_v6, %v349_v27  ;;  %v368_v13 = vmul.f32 %v3146_v39, %v3097_v19  ;;  %vm376_vm0 = vcmp.eq.f32.partialorder %v3097_v19, 0.0 }
 0x148   :  { %v3149_v48 = vmax.f32 %v330_v38, 1.0000001  ;;  %v516_v46 = vmul.f32 %v2531_v42, %v3112_v58  ;;  %v3167_v4 = vadd.f32 -1.0, %v501_v63  ;;  %v354_v60 = vsel %vm352_vm4, %v353_v52, %v351_v51  ;;  %v3197_v1 = vpop.eup %2532 }
 0x149   :  { %v3204_v59 = vmax.f32 %v354_v60, 1.0000001  ;;  %v359_v21 = vsub.f32 1.5, %v358_v24  ;;  %v525_v38 = vand.u32 2147483648, %v3112_v58  ;;  %v369_v40 = vmul.f32 %v3146_v39, %v368_v13 }
 0x14a   :  { %v500_v50 = vmul.f32 %v3149_v48, %v3149_v48  ;;  %v517_v16 = vmul.f32 %v2531_v42, %v516_v46  ;;  %2534 = vrsqrt.f32 %v3167_v4  ;;  %v380_v14 = vmul.f32 %v3197_v1, %v3128_v11 }
 0x14b   :  { %v502_v18 = vmul.f32 %v3204_v59, %v3204_v59  ;;  %v360_v27 = vmul.f32 %v3126_v44, %v359_v21  ;;  %v365_v60 = vand.u32 2147483648, %v3086_v41  ;;  %vm546_vm11 = vcmp.eq.f32.partialorder %v3167_v4, inf }
 0x14c   :  { %v3178_v56 = vadd.f32 -1.0, %v500_v50  ;;  %v518_v3 = vmul.f32 0.5, %v517_v16  ;;  %v381_v51 = vmul.f32 %v3197_v1, %v380_v14  ;;  %v549_v24 = vand.u32 2147483648, %v3167_v4 }
 0x14d   :  { %v3219_v0 = vadd.f32 -1.0, %v502_v18  ;;  %vm548_vm12 = vcmp.eq.f32.partialorder %v3167_v4, 0.0  ;;  %vm386_vm2 = vcmp.eq.f32.partialorder %v3128_v11, inf  ;;  %vm388_vm3 = vcmp.eq.f32.partialorder %v3128_v11, 0.0 }
 0x14e   :  { %2536 = vrsqrt.f32 %v3178_v56  ;;  %v519_v25 = vsub.f32 1.5, %v518_v3  ;;  %vm534_vm13 = vcmp.eq.f32.partialorder %v3178_v56, inf  ;;  %vm536_vm15 = vcmp.eq.f32.partialorder %v3178_v56, 0.0 }
 0x14f   :  { %2538 = vrsqrt.f32 %v3162_v35  ;;  %vm558_vm4 = vcmp.eq.f32.partialorder %v3219_v0, inf  ;;  %vm560_vm6 = vcmp.eq.f32.partialorder %v3219_v0, 0.0 }
 0x150   :  { %2540 = vrsqrt.f32 %v3176_v54  ;;  %v2535_v26 = vpop.eup %2534  ;;  %v520_v37 = vmul.f32 %v2531_v42, %v519_v25  ;;  %v370_v42 = vmul.f32 0.5, %v369_v40  ;;  %v361_v25 = vmul.f32 %v360_v27, %v3086_v41 }
 0x151   :  { %v540_v63 = vmul.f32 %v2535_v26, %v3167_v4  ;;  %2542 = vrsqrt.f32 %v3219_v0 }
 0x152   :  { %v521_v50 = vmul.f32 %v3112_v58, %v520_v37  ;;  %v371_v37 = vsub.f32 1.5, %v370_v42  ;;  %v363_v14 = vsel %vm362_vm9, %v3086_v41, %v361_v25 }
 0x153   :  { %v541_v16 = vmul.f32 %v2535_v26, %v540_v63  ;;  %v382_v63 = vmul.f32 0.5, %v381_v51 }
 0x154   :  { %v2537_v46 = vpop.eup %2536  ;;  %v523_v3 = vsel %vm522_vm7, %v3112_v58, %v521_v50  ;;  %v372_v50 = vmul.f32 %v3146_v39, %v371_v37  ;;  %vm438_vm7 = vweird.f32 %v3082_v5 }
 0x155   :  { %v3226_v52 = vpop.eup %2538  ;;  %v528_v53 = vmul.f32 %v2537_v46, %v3178_v56  ;;  %v526_v13 = vsel %vm524_vm8, %v525_v38, %v523_v3  ;;  %v542_v21 = vmul.f32 0.5, %v541_v16  ;;  %v366_v38 = vsel %vm364_vm10, %v365_v60, %v363_v14 }
 0x156   :  { %v3231_v44 = vpop.eup %2540  ;;  %v611_v40 = vadd.f32 %v526_v13, %v3095_v36  ;;  %v3252_v36 = vmax.f32 %v366_v38, 1.0000001  ;;  %v383_v42 = vsub.f32 1.5, %v382_v63  ;;  %v373_v51 = vmul.f32 %v372_v50, %v3097_v19 }
 0x157   :  { %v529_v18 = vmul.f32 %v2537_v46, %v528_v53  ;;  %v543_v58 = vsub.f32 1.5, %v542_v21  ;;  %v392_v53 = vmul.f32 %v3231_v44, %v3176_v54  ;;  %v2543_v16 = vpop.eup %2542  ;;  %v377_v13 = vand.u32 2147483648, %v3097_v19 }
 0x158   :  { %2544 = vlog2.f32 %v611_v40  ;;  %v503_v41 = vmul.f32 %v3252_v36, %v3252_v36  ;;  %v384_v39 = vmul.f32 %v3197_v1, %v383_v42  ;;  %v537_v40 = vand.u32 2147483648, %v3178_v56 }
 0x159   :  { %v530_v27 = vmul.f32 0.5, %v529_v18  ;;  %v544_v25 = vmul.f32 %v2535_v26, %v543_v58  ;;  %v552_v18 = vmul.f32 %v2543_v16, %v3219_v0  ;;  %v393_v60 = vmul.f32 %v3231_v44, %v392_v53 }
 0x15a   :  { %v375_v26 = vsel %vm374_vm14, %v3097_v19, %v373_v51  ;;  %v3269_v63 = vadd.f32 -1.0, %v503_v41  ;;  %v385_v38 = vmul.f32 %v384_v39, %v3128_v11  ;;  %vm427_vm8 = vweird.f32 %v3072_v17 }
 0x15b   :  { %v531_v3 = vsub.f32 1.5, %v530_v27  ;;  %v545_v37 = vmul.f32 %v3167_v4, %v544_v25  ;;  %v553_v14 = vmul.f32 %v2543_v16, %v552_v18  ;;  %v378_v27 = vsel %vm376_vm0, %v377_v13, %v375_v26  ;;  %vm3330_vm9 = vmor %vm427_vm8, %vm428_vm5 }
 0x15c   :  { %2546 = vrsqrt.f32 %v3269_v63  ;;  %v394_v53 = vmul.f32 0.5, %v393_v60  ;;  %v387_v60 = vsel %vm386_vm2, %v3128_v11, %v385_v38  ;;  %vm398_vm10 = vcmp.eq.f32.partialorder %v3176_v54, inf }
 0x15d   :  { %v532_v21 = vmul.f32 %v2537_v46, %v531_v3  ;;  %v547_v1 = vsel %vm546_vm11, %v3167_v4, %v545_v37  ;;  %v3275_v46 = vmax.f32 %v378_v27, 1.0000001  ;;  %v554_v42 = vmul.f32 0.5, %v553_v14 }
 0x15e   :  { %v2545_v50 = vpop.eup %2544  ;;  %v550_v19 = vsel %vm548_vm12, %v549_v24, %v547_v1  ;;  %v389_v24 = vand.u32 2147483648, %v3128_v11  ;;  %v395_v26 = vsub.f32 1.5, %v394_v53  ;;  %v561_v11 = vand.u32 2147483648, %v3219_v0 }
 0x15f   :  { %v533_v58 = vmul.f32 %v3178_v56, %v532_v21  ;;  %v620_v3 = vmul.f32 0.6931472, %v2545_v50  ;;  %v555_v13 = vsub.f32 1.5, %v554_v42  ;;  %v504_v4 = vmul.f32 %v3275_v46, %v3275_v46 }
 0x160   :  { %v613_v39 = vadd.f32 %v550_v19, %v3139_v55  ;;  %v390_v37 = vsel %vm388_vm3, %v389_v24, %v387_v60  ;;  %v396_v45 = vmul.f32 %v3231_v44, %v395_v26  ;;  %v436_v44 = vmul.f32 %v3082_v5, %v435_v28 }
 0x161   :  { %v535_v25 = vsel %vm534_vm13, %v3178_v56, %v533_v58  ;;  %v635_v18 = vmul.f32 %v620_v3, %v420_v20  ;;  %v556_v56 = vmul.f32 %v2543_v16, %v555_v13  ;;  %v3299_v21 = vadd.f32 -1.0, %v504_v4 }
 0x162   :  { %v538_v51 = vsel %vm536_vm15, %v537_v40, %v535_v25  ;;  %v443_v40 = vmul.f32 %v3141_v31, %v3194_v62  ;;  %v3304_v14 = vmax.f32 %v390_v37, 1.0000001  ;;  %v2547_v9 = vpop.eup %2546  ;;  %v426_v62 = vmul.f32 %v3106_v7, %v425_v10 }
 0x163   :  { %v612_v41 = vadd.f32 %v538_v51, %v3149_v48  ;;  %v643_v6 = vmul.f32 %v635_v18, %v2999_v43  ;;  %v557_v48 = vmul.f32 %v3219_v0, %v556_v56  ;;  %v564_v55 = vmul.f32 %v2547_v9, %v3269_v63 }
 0x164   :  { %v505_v43 = vmul.f32 %v3304_v14, %v3304_v14  ;;  %v397_v1 = vmul.f32 %v396_v45, %v3176_v54  ;;  %v444_v10 = vmul.f32 0.5, %v443_v40  ;;  %v430_v28 = vsel %vm3330_vm9, %v3106_v7, %v426_v62 }
 0x165   :  { %2548 = vlog2.f32 %v612_v41  ;;  %2320 = vmatmul.msk.f32.vlgmr.msra.gmra.mxu0 %vm50_vm1, %v643_v6  ;;  %v559_v20 = vsel %vm558_vm4, %v3219_v0, %v557_v48  ;;  %v565_v27 = vmul.f32 %v2547_v9, %v564_v55  ;;  %v401_v17 = vand.u32 2147483648, %v3176_v54 }
 0x166   :  { %2550 = vrsqrt.f32 %v3299_v21  ;;  %v562_v16 = vsel %vm560_vm6, %v561_v11, %v559_v20  ;;  %v3321_v58 = vadd.f32 -1.0, %v505_v43  ;;  %v399_v25 = vsel %vm398_vm10, %v3176_v54, %v397_v1 }
 0x167   :  { %2552 = vlog2.f32 %v613_v39  ;;  %v614_v38 = vadd.f32 %v562_v16, %v3204_v59  ;;  %v566_v50 = vmul.f32 0.5, %v565_v27  ;;  %vm400_vm11 = vcmp.eq.f32.partialorder %v3176_v54, 0.0 }
 0x168   :  { %2554 = vrsqrt.f32 %v3183_v57  ;;  %vm437_vm12 = vweird.f32 %v3062_v8  ;;  %v452_v59 = vmul.f32 %v3226_v52, %v3162_v35  ;;  %v402_v7 = vsel %vm400_vm11, %v401_v17, %v399_v25 }
 0x169   :  { %2556 = vrsqrt.f32 %v3321_v58  ;;  %v567_v53 = vsub.f32 1.5, %v566_v50  ;;  %v3347_v24 = vmax.f32 %v402_v7, 1.0000001  ;;  %vm3353_vm13 = vmor %vm437_vm12, %vm438_vm7  ;;  %v445_v54 = vsub.f32 1.5, %v444_v10 }
 0x16a   :  { %2558 = vlog2.f32 %v614_v38  ;;  %v3358_v8 = vmax.f32 %v3099_v34, 1e-30  ;;  %v440_v37 = vsel %vm3353_vm13, %v3082_v5, %v436_v44  ;;  %vm570_vm14 = vcmp.eq.f32.partialorder %v3269_v63, inf }
 0x16b   :  { %v2549_v29 = vpop.eup %2548  ;;  %v568_v13 = vmul.f32 %v2547_v9, %v567_v53  ;;  %v506_v6 = vmul.f32 %v3347_v24, %v3347_v24  ;;  %v453_v9 = vmul.f32 %v3226_v52, %v452_v59  ;;  %vm572_vm15 = vcmp.eq.f32.partialorder %v3269_v63, 0.0 }
 0x16c   :  { %v2551_v23 = vpop.eup %2550  ;;  %v622_v19 = vmul.f32 0.6931472, %v2549_v29  ;;  %2560 = vrsqrt.f32 %v3358_v8  ;;  %v446_v1 = vmul.f32 %v3141_v31, %v445_v54  ;;  %vm448_vm0 = vweird.f32 %v3141_v31 }
 0x16d   :  { %v2553_v42 = vpop.eup %2552  ;;  %v576_v3 = vmul.f32 %v2551_v23, %v3299_v21  ;;  %v569_v26 = vmul.f32 %v3269_v63, %v568_v13  ;;  %v3374_v11 = vadd.f32 -1.0, %v506_v6  ;;  %v454_v44 = vmul.f32 0.5, %v453_v9 }
 0x16e   :  { %v636_v51 = vmul.f32 %v622_v19, %v430_v28  ;;  %v3349_v18 = vpop.eup %2554  ;;  %v624_v60 = vmul.f32 0.6931472, %v2553_v42  ;;  %vm582_vm2 = vcmp.eq.f32.partialorder %v3299_v21, inf  ;;  %v585_v38 = vand.u32 2147483648, %v3299_v21 }
 0x16f   :  { %v577_v4 = vmul.f32 %v2551_v23, %v576_v3  ;;  %v2557_v56 = vpop.eup %2556  ;;  %v571_v48 = vsel %vm570_vm14, %v3269_v63, %v569_v26  ;;  %v462_v20 = vmul.f32 %v3349_v18, %v3183_v57  ;;  %2562 = vrsqrt.f32 %v3374_v11 }
 0x170   :  { %v644_v39 = vmul.f32 %v636_v51, %v3024_v15  ;;  %v573_v15 = vand.u32 2147483648, %v3269_v63  ;;  %v588_v34 = vmul.f32 %v2557_v56, %v3321_v58  ;;  %v637_v55 = vmul.f32 %v624_v60, %v440_v37  ;;  %v2559_v62 = vpop.eup %2558 }
 0x171   :  { %v578_v40 = vmul.f32 0.5, %v577_v4  ;;  %v626_v0 = vmul.f32 0.6931472, %v2559_v62  ;;  %v463_v50 = vmul.f32 %v3349_v18, %v462_v20  ;;  %vm447_vm3 = vweird.f32 %v3093_v49 }
 0x172   :  { %2321 = vmatmul.msk.f32.gmra.mxu0 %vm50_vm1, %v644_v39  ;;  %v574_v43 = vsel %vm572_vm15, %v573_v15, %v571_v48  ;;  %v589_v45 = vmul.f32 %v2557_v56, %v588_v34  ;;  %v645_v10 = vmul.f32 %v637_v55, %v2996_v61  ;;  %vm584_vm4 = vcmp.eq.f32.partialorder %v3299_v21, 0.0  ;;  %v3391_v28 = vpop.eup %2560  ;;  %vm449_vm5 = vmor %vm447_vm3, %vm448_vm0  ;;  %v732_v34 = vld [vmem:[%s4216_s3 + $0x18] sm:$0xff] }
 0x173   :  { %v579_v5 = vsub.f32 1.5, %v578_v40  ;;  %v615_v16 = vadd.f32 %v574_v43, %v3252_v36  ;;  %v3396_v19 = vmax.f32 %v3130_v12, 1e-30  ;;  %v455_v53 = vsub.f32 1.5, %v454_v44  ;;  %v734_v40 = vld [vmem:[%s4216_s3 + $0x28] sm:$0xff] }
 0x174   :  { %v590_v63 = vmul.f32 0.5, %v589_v45  ;;  %v450_v49 = vsel %vm449_vm5, %v3141_v31, %v446_v1  ;;  %v464_v7 = vmul.f32 0.5, %v463_v50  ;;  %v472_v12 = vmul.f32 %v3391_v28, %v3358_v8  ;;  %770 = vmatpush.msrb.mxu0 %v734_v40  ;;  %2382 = vmatpush.msra.mxu1 %v734_v40 }
 0x175   :  { %v580_v27 = vmul.f32 %v2551_v23, %v579_v5  ;;  %2564 = vlog2.f32 %v615_v16  ;;  %v2563_v42 = vpop.eup %2562  ;;  %v638_v25 = vmul.f32 %v626_v0, %v450_v49  ;;  %vm594_vm6 = vcmp.eq.f32.partialorder %v3321_v58, inf }
 0x176   :  { %v591_v36 = vsub.f32 1.5, %v590_v63  ;;  %v600_v59 = vmul.f32 %v2563_v42, %v3374_v11  ;;  %2566 = vrsqrt.f32 %v3396_v19  ;;  %v597_v31 = vand.u32 2147483648, %v3321_v58 }
 0x177   :  { %v581_v29 = vmul.f32 %v3299_v21, %v580_v27  ;;  %vm458_vm7 = vweird.f32 %v3226_v52  ;;  %vm596_vm8 = vcmp.eq.f32.partialorder %v3321_v58, 0.0  ;;  %v646_v41 = vmul.f32 %v638_v25, %v3015_v30  ;;  %v733_v30 = vld [vmem:[%s4216_s3 + $0x20] sm:$0xff] }
 0x178   :  { %v592_v17 = vmul.f32 %v2557_v56, %v591_v36  ;;  %v601_v4 = vmul.f32 %v2563_v42, %v600_v59  ;;  %vm457_vm9 = vweird.f32 %v3162_v35  ;;  %v465_v56 = vsub.f32 1.5, %v464_v7  ;;  %771 = vmatpush.msrb.mxu0 %v733_v30  ;;  %2383 = vmatpush.msra.mxu1 %v733_v30 }
 0x179   :  { %v583_v23 = vsel %vm582_vm2, %v3299_v21, %v581_v29  ;;  %v473_v37 = vmul.f32 %v3391_v28, %v472_v12  ;;  %vm459_vm10 = vmor %vm457_vm9, %vm458_vm7  ;;  %vm468_vm11 = vweird.f32 %v3349_v18  ;;  %vm606_vm12 = vcmp.eq.f32.partialorder %v3374_v11, inf }
 0x17a   :  { %2322 = vmatmul.msk.f32.gmra.mxu0 %vm50_vm1, %v645_v10  ;;  %v586_v61 = vsel %vm584_vm4, %v585_v38, %v583_v23  ;;  %v593_v21 = vmul.f32 %v3321_v58, %v592_v17  ;;  %v602_v60 = vmul.f32 0.5, %v601_v4  ;;  %v466_v5 = vmul.f32 %v3349_v18, %v465_v56  ;;  %2384 = vmatpush.msra.mxu1 %v732_v34 }
 0x17b   :  { %v616_v3 = vadd.f32 %v586_v61, %v3275_v46  ;;  %v2565_v51 = vpop.eup %2564  ;;  %v456_v46 = vmul.f32 %v3226_v52, %v455_v53  ;;  %v474_v55 = vmul.f32 0.5, %v473_v37  ;;  %v609_v43 = vand.u32 2147483648, %v3374_v11  ;;  %772 = vmatpush.msrb.mxu0 %v732_v34 }
 0x17c   :  { %v595_v13 = vsel %vm594_vm6, %v3321_v58, %v593_v21  ;;  %v628_v54 = vmul.f32 0.6931472, %v2565_v51  ;;  %v603_v26 = vsub.f32 1.5, %v602_v60  ;;  %v2567_v35 = vpop.eup %2566  ;;  %vm608_vm13 = vcmp.eq.f32.partialorder %v3374_v11, 0.0 }
 0x17d   :  { %2568 = vlog2.f32 %v616_v3  ;;  %v598_v39 = vsel %vm596_vm8, %v597_v31, %v595_v13  ;;  %v460_v58 = vsel %vm459_vm10, %v3226_v52, %v456_v46  ;;  %vm467_vm14 = vweird.f32 %v3183_v57 }
 0x17e   :  { %v617_v6 = vadd.f32 %v598_v39, %v3304_v14  ;;  %v639_v9 = vmul.f32 %v628_v54, %v460_v58  ;;  %v604_v15 = vmul.f32 %v2563_v42, %v603_v26  ;;  %v482_v14 = vmul.f32 %v2567_v35, %v3396_v19  ;;  %vm469_vm15 = vmor %vm467_vm14, %vm468_vm11 }
 0x17f   :  { %v475_v27 = vsub.f32 1.5, %v474_v55  ;;  %v470_v63 = vsel %vm469_vm15, %v3349_v18, %v466_v5  ;;  %vm478_vm0 = vweird.f32 %v3391_v28  ;;  %vm477_vm2 = vweird.f32 %v3358_v8 }
 0x180   :  { %v605_v52 = vmul.f32 %v3374_v11, %v604_v15  ;;  %2570 = vlog2.f32 %v617_v6  ;;  %v647_v45 = vmul.f32 %v639_v9, %v3036_v33  ;;  %v483_v1 = vmul.f32 %v2567_v35, %v482_v14  ;;  %vm479_vm3 = vmor %vm477_vm2, %vm478_vm0 }
 0x181   :  { %v476_v10 = vmul.f32 %v3391_v28, %v475_v27  ;;  %vm488_vm4 = vweird.f32 %v2567_v35  ;;  %vm487_vm5 = vweird.f32 %v3396_v19  ;;  %v729_v19 = vld [vmem:[%s4216_s3] sm:$0xff]  ;;  %vm735_vm7 = vcmask 392192  }
 0x182   :  { %2323 = vmatmul.msk.f32.gmra.mxu0 %vm50_vm1, %v646_v41  ;;  %v607_v20 = vsel %vm606_vm12, %v3374_v11, %v605_v52  ;;  %v484_v11 = vmul.f32 0.5, %v483_v1  ;;  %vm489_vm6 = vmor %vm487_vm5, %vm488_vm4  ;;  %vm1017_vm5 = vcmask 261120  }
 0x183   :  { %v2569_v48 = vpop.eup %2568  ;;  %v610_v16 = vsel %vm608_vm13, %v609_v43, %v607_v20  ;;  %v480_v18 = vsel %vm479_vm3, %v3391_v28, %v476_v10  ;;  %v731_v28 = vld [vmem:[%s4216_s3 + $0x10] sm:$0xff] }
 0x184   :  { %v630_v62 = vmul.f32 0.6931472, %v2569_v48  ;;  %v618_v44 = vadd.f32 %v610_v16, %v3347_v24  ;;  %v485_v38 = vsub.f32 1.5, %v484_v11  ;;  %773 = vmatpush.msrb.mxu0 %v731_v28  ;;  %2385 = vmatpush.msra.mxu1 %v731_v28 }
 0x186   :  { %v640_v33 = vmul.f32 %v630_v62, %v470_v63  ;;  %v2571_v29 = vpop.eup %2570  ;;  %2572 = vlog2.f32 %v618_v44  ;;  %v486_v50 = vmul.f32 %v2567_v35, %v485_v38 }
 0x187   :  { %v632_v0 = vmul.f32 0.6931472, %v2571_v29 }
 0x188   :  { %v648_v57 = vmul.f32 %v640_v33, %v3009_v22  ;;  %v490_v22 = vsel %vm489_vm6, %v2567_v35, %v486_v50 }
 0x189   :  { %v641_v24 = vmul.f32 %v632_v0, %v480_v18 }
 0x18a   :  { %2324 = vmatmul.msk.f32.gmra.mxu0 %vm50_vm1, %v647_v45 }
 0x18b   :  { %v649_v23 = vmul.f32 %v641_v24, %v3028_v47  ;;  %v730_v47 = vld [vmem:[%s4216_s3 + $0x8] sm:$0xff] }
 0x18c   :  { %v2573_v36 = vpop.eup %2572  ;;  %774 = vmatpush.msrb.mxu0 %v730_v47  ;;  %2386 = vmatpush.msra.mxu1 %v730_v47 }
 0x18d   :  { %v634_v61 = vmul.f32 0.6931472, %v2573_v36 }
 0x18e   :  { %775 = vmatpush.msrb.mxu0 %v729_v19  ;;  %2387 = vmatpush.msra.mxu1 %v729_v19 }
 0x18f   :  { %v642_v8 = vmul.f32 %v634_v61, %v490_v22 }
 0x191   :  { %v650_v17 = vmul.f32 %v642_v8, %v3044_v32  ;;  %v2461_v32 = vld [vmem:[%s4214_s2] ss:$0 sm:$0xff] }
 0x192   :  { %2325 = vmatmul.msk.f32.gmra.mxu0 %vm50_vm1, %v648_v57 }
 0x19a   :  { %2326 = vmatmul.msk.f32.gmra.mxu0 %vm50_vm1, %v649_v23 }
 0x1a2   :  { %2327 = vmatmul.msk.f32.gmra.mxu0 %vm50_vm1, %v650_v17 }
 0x1e2   :  { %v697_v42 = vpop.f32.mrf.mxu0 }
 0x1e3   :  { %v3465_v53 = vadd.f32 %v2461_v32, %v697_v42 }
 0x1e5   :  { %v721_v49 = vmul.f32 %v3465_v53, %v3465_v53 }
 0x1e7   :  { %2328 = vmatmul.msk.f32.vlgmr.msrb.gmra.mxu0 %vm735_vm7, %v721_v49 }
 0x1ef   :  { %v700_v3 = vpop.f32.mrf.mxu0 }
 0x1f0   :  { %v3470_v25 = vadd.f32 %v2461_v32, %v700_v3 }
 0x1f2   :  { %v722_v21 = vmul.f32 %v3470_v25, %v3470_v25 }
 0x1f4   :  { %2329 = vmatmul.msk.f32.gmra.mxu0 %vm735_vm7, %v722_v21 }
 0x1f7   :  { %v703_v59 = vpop.f32.mrf.mxu0 }
 0x1f8   :  { %v3475_v51 = vadd.f32 %v2461_v32, %v703_v59 }
 0x1fa   :  { %v723_v7 = vmul.f32 %v3475_v51, %v3475_v51 }
 0x1fc   :  { %2330 = vmatmul.msk.f32.gmra.mxu0 %vm735_vm7, %v723_v7 }
 0x1ff   :  { %v706_v12 = vpop.f32.mrf.mxu0 }
 0x200   :  { %v3480_v13 = vadd.f32 %v2461_v32, %v706_v12 }
 0x202   :  { %v724_v31 = vmul.f32 %v3480_v13, %v3480_v13 }
 0x204   :  { %2331 = vmatmul.msk.f32.vlgmr.msra.gmra.mxu1 %vm735_vm7, %v724_v31 }
 0x207   :  { %v709_v4 = vpop.f32.mrf.mxu0 }
 0x208   :  { %v3485_v46 = vadd.f32 %v2461_v32, %v709_v4 }
 0x20a   :  { %v725_v41 = vmul.f32 %v3485_v46, %v3485_v46 }
 0x20c   :  { %2332 = vmatmul.msk.f32.gmra.mxu1 %vm735_vm7, %v725_v41 }
 0x20f   :  { %v712_v54 = vpop.f32.mrf.mxu0 }
 0x210   :  { %v3490_v39 = vadd.f32 %v2461_v32, %v712_v54 }
 0x212   :  { %v726_v60 = vmul.f32 %v3490_v39, %v3490_v39 }
 0x214   :  { %2333 = vmatmul.msk.f32.gmra.mxu1 %vm735_vm7, %v726_v60 }
 0x217   :  { %v715_v56 = vpop.f32.mrf.mxu0 }
 0x218   :  { %v3495_v37 = vadd.f32 %v2461_v32, %v715_v56 }
 0x21a   :  { %v727_v26 = vmul.f32 %v3495_v37, %v3495_v37 }
 0x21c   :  { %2334 = vmatmul.msk.f32.gmra.mxu1 %vm735_vm7, %v727_v26 }
 0x21f   :  { %v718_v40 = vpop.f32.mrf.mxu0 }
 0x220   :  { %v3500_v30 = vadd.f32 %v2461_v32, %v718_v40 }
 0x222   :  { %v728_v58 = vmul.f32 %v3500_v30, %v3500_v30 }
 0x224   :  { %2335 = vmatmul.msk.f32.gmra.mxu1 %vm735_vm7, %v728_v58 }
 0x264   :  { %v3505_v6 = vpop.f32.mrf.mxu0 }
 0x265   :  { %v801_v35 = vmax.f32 %v3505_v6, 1e-30 }
 0x267   :  { %2574 = vrsqrt.f32 %v801_v35  ;;  %vm815_vm9 = vweird.f32 %v801_v35 }
 0x26d   :  { %v2575_v9 = vpop.eup %2574 }
 0x26e   :  { %v810_v15 = vmul.f32 %v2575_v9, %v801_v35  ;;  %vm816_vm8 = vweird.f32 %v2575_v9 }
 0x26f   :  { %vm817_vm10 = vmor %vm815_vm9, %vm816_vm8 }
 0x270   :  { %v811_v34 = vmul.f32 %v2575_v9, %v810_v15 }
 0x271   :  { %v3508_v48 = vpop.f32.mrf.mxu0 }
 0x272   :  { %v812_v5 = vmul.f32 0.5, %v811_v34  ;;  %v802_v55 = vmax.f32 %v3508_v48, 1e-30 }
 0x274   :  { %v813_v52 = vsub.f32 1.5, %v812_v5  ;;  %2576 = vrsqrt.f32 %v802_v55  ;;  %vm825_vm12 = vweird.f32 %v802_v55 }
 0x276   :  { %v814_v14 = vmul.f32 %v2575_v9, %v813_v52 }
 0x278   :  { %v818_v43 = vsel %vm817_vm10, %v2575_v9, %v814_v14  ;;  %v1016_v9 = vld [vmem:[%s4217_s5 + $0x18] sm:$0xff]  ;;  %v1015_v14 = vld [vmem:[%s4217_s5 + $0x10] sm:$0xff] }
 0x279   :  { %v889_v45 = vmul.f32 %v818_v43, %v801_v35  ;;  %v3511_v62 = vpop.f32.mrf.mxu0  ;;  %1054 = vmatpush.msra.mxu2 %v1016_v9  ;;  %2388 = vmatpush.msra.mxu3 %v1016_v9 }
 0x27a   :  { %v2577_v20 = vpop.eup %2576  ;;  %v803_v16 = vmax.f32 %v3511_v62, 1e-30 }
 0x27b   :  { %v2336_v27 = vclamps-f32 %v889_v45, 15.0  ;;  %v820_v1 = vmul.f32 %v2577_v20, %v802_v55  ;;  %vm826_vm11 = vweird.f32 %v2577_v20  ;;  %1055 = vmatpush.msra.mxu2 %v1015_v14  ;;  %2389 = vmatpush.msra.mxu3 %v1015_v14 }
 0x27c   :  { %2578 = vrsqrt.f32 %v803_v16  ;;  %vm827_vm13 = vmor %vm825_vm12, %vm826_vm11  ;;  %vm835_vm15 = vweird.f32 %v803_v16 }
 0x27d   :  { %v913_v63 = vmul.f32 1.442695, %v2336_v27  ;;  %v929_v44 = vsub.f32 0.0, %v2336_v27  ;;  %v821_v33 = vmul.f32 %v2577_v20, %v820_v1 }
 0x27f   :  { %v937_v29 = vmul.f32 1.442695, %v929_v44  ;;  %v822_v10 = vmul.f32 0.5, %v821_v33  ;;  %2580 = vpow2.f32 %v913_v63  ;;  %v1014_v63 = vld [vmem:[%s4217_s5 + $0x8] sm:$0xff] }
 0x280   :  { %1056 = vmatpush.msra.mxu2 %v1014_v63  ;;  %2390 = vmatpush.msra.mxu3 %v1014_v63 }
 0x281   :  { %2582 = vpow2.f32 %v937_v29  ;;  %v823_v11 = vsub.f32 1.5, %v822_v10  ;;  %v3514_v57 = vpop.f32.mrf.mxu1  ;;  %v1013_v10 = vld [vmem:[%s4217_s5] sm:$0xff] }
 0x282   :  { %v2579_v0 = vpop.eup %2578  ;;  %v3517_v38 = vmax.f32 %v3514_v57, 1e-30  ;;  %1057 = vmatpush.msra.mxu2 %v1013_v10  ;;  %2391 = vmatpush.msra.mxu3 %v1013_v10 }
 0x283   :  { %v824_v18 = vmul.f32 %v2577_v20, %v823_v11  ;;  %v830_v24 = vmul.f32 %v2579_v0, %v803_v16  ;;  %vm836_vm14 = vweird.f32 %v2579_v0 }
 0x284   :  { %2584 = vrsqrt.f32 %v3517_v38  ;;  %vm837_vm0 = vmor %vm835_vm15, %vm836_vm14  ;;  %vm845_vm3 = vweird.f32 %v3517_v38 }
 0x285   :  { %v3520_v36 = vsel %vm827_vm13, %v2577_v20, %v824_v18  ;;  %v831_v50 = vmul.f32 %v2579_v0, %v830_v24  ;;  %v2581_v23 = vpop.eup %2580 }
 0x286   :  { %v890_v61 = vmul.f32 %v3520_v36, %v802_v55 }
 0x287   :  { %v2583_v22 = vpop.eup %2582  ;;  %v832_v8 = vmul.f32 0.5, %v831_v50 }
 0x288   :  { %v953_v17 = vsub.f32 %v2581_v23, %v2583_v22  ;;  %v2337_v28 = vclamps-f32 %v890_v61, 15.0 }
 0x289   :  { %v833_v47 = vsub.f32 1.5, %v832_v8  ;;  %v3523_v19 = vpop.f32.mrf.mxu1 }
 0x28a   :  { %v2585_v32 = vpop.eup %2584  ;;  %v961_v42 = vmul.f32 0.5, %v953_v17  ;;  %v915_v49 = vmul.f32 1.442695, %v2337_v28  ;;  %v930_v3 = vsub.f32 0.0, %v2337_v28  ;;  %v3526_v21 = vmax.f32 %v3523_v19, 1e-30 }
 0x28b   :  { %v834_v59 = vmul.f32 %v2579_v0, %v833_v47  ;;  %v840_v7 = vmul.f32 %v2585_v32, %v3517_v38  ;;  %vm846_vm2 = vweird.f32 %v2585_v32 }
 0x28c   :  { %v3529_v12 = vmul.f32 %v961_v42, %v818_v43  ;;  %2586 = vpow2.f32 %v915_v49  ;;  %v939_v31 = vmul.f32 1.442695, %v930_v3  ;;  %vm847_vm4 = vmor %vm845_vm3, %vm846_vm2  ;;  %vm855_vm7 = vweird.f32 %v3526_v21 }
 0x28d   :  { %v3531_v4 = vsel %vm837_vm0, %v2579_v0, %v834_v59  ;;  %v841_v41 = vmul.f32 %v2585_v32, %v840_v7  ;;  %2588 = vrsqrt.f32 %v3526_v21 }
 0x28e   :  { %v985_v54 = vmul.f32 %v3529_v12, %v3529_v12  ;;  %2590 = vpow2.f32 %v939_v31  ;;  %v891_v60 = vmul.f32 %v3531_v4, %v803_v16 }
 0x28f   :  { %v842_v56 = vmul.f32 0.5, %v841_v41 }
 0x290   :  { %v2338_v26 = vclamps-f32 %v891_v60, 15.0  ;;  %v3538_v40 = vmul.f32 %v985_v54, %v3505_v6 }
 0x291   :  { %v843_v58 = vsub.f32 1.5, %v842_v56  ;;  %v3540_v35 = vpop.f32.mrf.mxu1 }
 0x292   :  { %v2587_v15 = vpop.eup %2586  ;;  %v917_v34 = vmul.f32 1.442695, %v2338_v26  ;;  %v931_v5 = vsub.f32 0.0, %v2338_v26  ;;  %v3547_v6 = vmax.f32 %v3540_v35, 1e-30  ;;  %v1005_v16 = vsub.f32 0.0, %v3538_v40 }
 0x293   :  { %v2589_v55 = vpop.eup %2588  ;;  %v844_v52 = vmul.f32 %v2585_v32, %v843_v58 }
 0x294   :  { %v2591_v43 = vpop.eup %2590  ;;  %v941_v45 = vmul.f32 1.442695, %v931_v5  ;;  %v850_v20 = vmul.f32 %v2589_v55, %v3526_v21  ;;  %2592 = vrsqrt.f32 %v3547_v6  ;;  %vm856_vm6 = vweird.f32 %v2589_v55  ;;  %2344 = vmatmul.msk.f32.vlgmr.msra.gmra.mxu2 %vm1017_vm5, %v1005_v16 }
 0x295   :  { %v954_v27 = vsub.f32 %v2587_v15, %v2591_v43  ;;  %v3555_v1 = vsel %vm847_vm4, %v2585_v32, %v844_v52  ;;  %2594 = vpow2.f32 %v917_v34  ;;  %vm857_vm8 = vmor %vm855_vm7, %vm856_vm6  ;;  %vm865_vm10 = vweird.f32 %v3547_v6 }
 0x296   :  { %v892_v44 = vmul.f32 %v3555_v1, %v3517_v38  ;;  %v851_v33 = vmul.f32 %v2589_v55, %v850_v20  ;;  %2596 = vpow2.f32 %v941_v45 }
 0x297   :  { %v962_v29 = vmul.f32 0.5, %v954_v27 }
 0x298   :  { %v2339_v11 = vclamps-f32 %v892_v44, 15.0  ;;  %v852_v0 = vmul.f32 0.5, %v851_v33  ;;  %v1172_v44 = vadd.f32 1.0, %v3538_v40 }
 0x299   :  { %v3567_v18 = vmul.f32 %v962_v29, %v3520_v36  ;;  %v3569_v24 = vpop.f32.mrf.mxu1 }
 0x29a   :  { %v919_v38 = vmul.f32 1.442695, %v2339_v11  ;;  %v932_v50 = vsub.f32 0.0, %v2339_v11  ;;  %v853_v23 = vsub.f32 1.5, %v852_v0  ;;  %v3573_v61 = vmax.f32 %v3569_v24, 1e-30  ;;  %v2593_v22 = vpop.eup %2592 }
 0x29b   :  { %v986_v8 = vmul.f32 %v3567_v18, %v3567_v18  ;;  %v2595_v17 = vpop.eup %2594  ;;  %v860_v47 = vmul.f32 %v2593_v22, %v3547_v6  ;;  %vm866_vm9 = vweird.f32 %v2593_v22 }
 0x29c   :  { %2598 = vpow2.f32 %v919_v38  ;;  %v943_v36 = vmul.f32 1.442695, %v932_v50  ;;  %v854_v28 = vmul.f32 %v2589_v55, %v853_v23  ;;  %v2597_v32 = vpop.eup %2596  ;;  %vm867_vm11 = vmor %vm865_vm10, %vm866_vm9  ;;  %vm875_vm13 = vweird.f32 %v3573_v61 }
 0x29d   :  { %v994_v42 = vmul.f32 %v986_v8, %v3508_v48  ;;  %2600 = vrsqrt.f32 %v3573_v61  ;;  %v955_v49 = vsub.f32 %v2595_v17, %v2597_v32  ;;  %v861_v59 = vmul.f32 %v2593_v22, %v860_v47 }
 0x29e   :  { %2602 = vpow2.f32 %v943_v36  ;;  %v3582_v3 = vsel %vm857_vm8, %v2589_v55, %v854_v28  ;;  %v3612_v8 = vmax.f32 %v1172_v44, 1e-07 }
 0x29f   :  { %v1006_v7 = vsub.f32 0.0, %v994_v42  ;;  %v893_v31 = vmul.f32 %v3582_v3, %v3526_v21  ;;  %v963_v41 = vmul.f32 0.5, %v955_v49  ;;  %v862_v54 = vmul.f32 0.5, %v861_v59 }
 0x2a0   :  { %v1173_v0 = vadd.f32 1.0, %v994_v42  ;;  %vm1195_vm3 = vcmp.eq.f32.partialorder %v3612_v8, inf  ;;  %vm1197_vm4 = vcmp.eq.f32.partialorder %v3612_v8, 0.0 }
 0x2a1   :  { %v2340_v60 = vclamps-f32 %v893_v31, 15.0  ;;  %v3586_v56 = vpop.f32.mrf.mxu1  ;;  %2345 = vmatmul.msk.f32.gmra.mxu2 %vm1017_vm5, %v1006_v7  ;;  %v3590_v26 = vmul.f32 %v963_v41, %v3531_v4  ;;  %v863_v58 = vsub.f32 1.5, %v862_v54 }
 0x2a2   :  { %v2599_v48 = vpop.eup %2598  ;;  %v3593_v9 = vmax.f32 %v3586_v56, 1e-30  ;;  %v3619_v47 = vmax.f32 %v1173_v0, 1e-07 }
 0x2a3   :  { %v2601_v15 = vpop.eup %2600  ;;  %v921_v34 = vmul.f32 1.442695, %v2340_v60  ;;  %v933_v5 = vsub.f32 0.0, %v2340_v60  ;;  %v987_v55 = vmul.f32 %v3590_v26, %v3590_v26  ;;  %v864_v52 = vmul.f32 %v2593_v22, %v863_v58 }
 0x2a4   :  { %v2603_v21 = vpop.eup %2602  ;;  %v870_v14 = vmul.f32 %v2601_v15, %v3573_v61  ;;  %vm876_vm12 = vweird.f32 %v2601_v15  ;;  %vm885_vm0 = vweird.f32 %v3593_v9  ;;  %vm1207_vm6 = vcmp.eq.f32.partialorder %v3619_v47, inf }
 0x2a5   :  { %v956_v43 = vsub.f32 %v2599_v48, %v2603_v21  ;;  %2604 = vpow2.f32 %v921_v34  ;;  %v945_v4 = vmul.f32 1.442695, %v933_v5  ;;  %v995_v45 = vmul.f32 %v987_v55, %v3511_v62  ;;  %vm877_vm14 = vmor %vm875_vm13, %vm876_vm12 }
 0x2a6   :  { %v3600_v20 = vsel %vm867_vm11, %v2593_v22, %v864_v52  ;;  %v871_v16 = vmul.f32 %v2601_v15, %v870_v14  ;;  %2606 = vrsqrt.f32 %v3593_v9  ;;  %vm1209_vm8 = vcmp.eq.f32.partialorder %v3619_v47, 0.0 }
 0x2a7   :  { %v964_v27 = vmul.f32 0.5, %v956_v43  ;;  %2608 = vpow2.f32 %v945_v4  ;;  %v894_v63 = vmul.f32 %v3600_v20, %v3547_v6  ;;  %v1007_v33 = vsub.f32 0.0, %v995_v45  ;;  %v1004_v43 = vld [vmem:[%s4218_s4 + $0x18] sm:$0xff]  ;;  %v1003_v4 = vld [vmem:[%s4218_s4 + $0x10] sm:$0xff] }
 0x2a8   :  { %v872_v29 = vmul.f32 0.5, %v871_v16  ;;  %v1174_v60 = vadd.f32 1.0, %v995_v45  ;;  %1119 = vmatpush.msrb.mxu3 %v1004_v43 }
 0x2a9   :  { %v3607_v10 = vmul.f32 %v964_v27, %v3555_v1  ;;  %v2341_v11 = vclamps-f32 %v894_v63, 15.0  ;;  %2346 = vmatmul.msk.f32.gmra.mxu2 %vm1017_vm5, %v1007_v33  ;;  %v1002_v33 = vld [vmem:[%s4218_s4 + $0x8] sm:$0xff] }
 0x2aa   :  { %v873_v62 = vsub.f32 1.5, %v872_v29  ;;  %v3644_v45 = vmax.f32 %v1174_v60, 1e-07  ;;  %1120 = vmatpush.msrb.mxu3 %v1003_v4 }
 0x2ab   :  { %v2605_v38 = vpop.eup %2604  ;;  %v988_v50 = vmul.f32 %v3607_v10, %v3607_v10  ;;  %v923_v23 = vmul.f32 1.442695, %v2341_v11  ;;  %v934_v22 = vsub.f32 0.0, %v2341_v11 }
 0x2ac   :  { %v2607_v6 = vpop.eup %2606  ;;  %v874_v40 = vmul.f32 %v2601_v15, %v873_v62  ;;  %1121 = vmatpush.msrb.mxu3 %v1002_v33  ;;  %vm1219_vm12 = vcmp.eq.f32.partialorder %v3644_v45, inf  ;;  %vm1221_vm13 = vcmp.eq.f32.partialorder %v3644_v45, 0.0 }
 0x2ad   :  { %v2609_v1 = vpop.eup %2608  ;;  %v3616_v17 = vmul.f32 %v988_v50, %v3514_v57  ;;  %v947_v36 = vmul.f32 1.442695, %v934_v22  ;;  %v880_v28 = vmul.f32 %v2607_v6, %v3593_v9  ;;  %2610 = vpow2.f32 %v923_v23 }
 0x2ae   :  { %v957_v32 = vsub.f32 %v2605_v38, %v2609_v1  ;;  %v3621_v42 = vsel %vm877_vm14, %v2601_v15, %v874_v40  ;;  %vm886_vm15 = vweird.f32 %v2607_v6  ;;  %v1001_v38 = vld [vmem:[%s4218_s4] sm:$0xff]  ;;  %s2702_s4 = smov 96  }
 0x2af   :  { %v1008_v49 = vsub.f32 0.0, %v3616_v17  ;;  %2612 = vpow2.f32 %v947_v36  ;;  %v895_v59 = vmul.f32 %v3621_v42, %v3573_v61  ;;  %v881_v7 = vmul.f32 %v2607_v6, %v880_v28  ;;  %vm887_vm2 = vmor %vm885_vm0, %vm886_vm15  ;;  %1122 = vmatpush.msrb.mxu3 %v1001_v38 }
 0x2b0   :  { %2614 = vrsqrt.f32 %v3612_v8  ;;  %v965_v57 = vmul.f32 0.5, %v957_v32  ;;  %v1175_v32 = vadd.f32 1.0, %v3616_v17 }
 0x2b1   :  { %v2342_v31 = vclamps-f32 %v895_v59, 15.0  ;;  %2616 = vrsqrt.f32 %v3619_v47  ;;  %v882_v54 = vmul.f32 0.5, %v881_v7  ;;  %2347 = vmatmul.msk.f32.gmra.mxu2 %vm1017_vm5, %v1008_v49 }
 0x2b2   :  { %v3629_v41 = vmul.f32 %v965_v57, %v3582_v3  ;;  %v3684_v60 = vmax.f32 %v1175_v32, 1e-07 }
 0x2b3   :  { %v925_v48 = vmul.f32 1.442695, %v2342_v31  ;;  %v935_v58 = vsub.f32 0.0, %v2342_v31  ;;  %v2611_v15 = vpop.eup %2610  ;;  %v883_v34 = vsub.f32 1.5, %v882_v54 }
 0x2b4   :  { %v989_v61 = vmul.f32 %v3629_v41, %v3629_v41  ;;  %vm1231_vm0 = vcmp.eq.f32.partialorder %v3684_v60, inf }
 0x2b5   :  { %v2613_v5 = vpop.eup %2612  ;;  %v949_v21 = vmul.f32 1.442695, %v935_v58  ;;  %2618 = vpow2.f32 %v925_v48  ;;  %v884_v14 = vmul.f32 %v2607_v6, %v883_v34 }
 0x2b6   :  { %v3635_v55 = vpop.eup %2614  ;;  %v997_v3 = vmul.f32 %v989_v61, %v3523_v19  ;;  %v958_v52 = vsub.f32 %v2611_v15, %v2613_v5  ;;  %v3692_v15 = vmul.f32 %v3590_v26, %v3475_v51 }
 0x2b7   :  { %2620 = vpow2.f32 %v949_v21  ;;  %v3646_v16 = vpop.eup %2616  ;;  %v3648_v44 = vsel %vm887_vm2, %v2607_v6, %v884_v14  ;;  %v1189_v11 = vmul.f32 %v3635_v55, %v3612_v8 }
 0x2b8   :  { %v1009_v27 = vsub.f32 0.0, %v997_v3  ;;  %v1176_v19 = vadd.f32 1.0, %v997_v3  ;;  %v966_v63 = vmul.f32 0.5, %v958_v52  ;;  %v896_v29 = vmul.f32 %v3648_v44, %v3593_v9 }
 0x2b9   :  { %2622 = vrsqrt.f32 %v3644_v45  ;;  %v1201_v9 = vmul.f32 %v3646_v16, %v3619_v47  ;;  %v1190_v28 = vmul.f32 %v3635_v55, %v1189_v11 }
 0x2ba   :  { %v3657_v0 = vmax.f32 %v1176_v19, 1e-07  ;;  %v974_v62 = vmul.f32 %v966_v63, %v3600_v20  ;;  %2348 = vmatmul.msk.f32.gmra.mxu2 %vm1017_vm5, %v1009_v27  ;;  %v2343_v50 = vclamps-f32 %v896_v29, 15.0  ;;  %v3670_v20 = vmul.f32 %v3567_v18, %v3470_v25 }
 0x2bb   :  { %v2619_v23 = vpop.eup %2618  ;;  %v1202_v25 = vmul.f32 %v3646_v16, %v1201_v9  ;;  %v1191_v58 = vmul.f32 0.5, %v1190_v28 }
 0x2bc   :  { %2624 = vrsqrt.f32 %v3657_v0  ;;  %v990_v22 = vmul.f32 %v974_v62, %v974_v62  ;;  %v3673_v6 = vmul.f32 %v974_v62, %v3490_v39  ;;  %v927_v1 = vmul.f32 1.442695, %v2343_v50 }
 0x2bd   :  { %v2621_v40 = vpop.eup %2620  ;;  %v936_v36 = vsub.f32 0.0, %v2343_v50  ;;  %v1203_v21 = vmul.f32 0.5, %v1202_v25  ;;  %v1192_v26 = vsub.f32 1.5, %v1191_v58  ;;  %vm1243_vm7 = vcmp.eq.f32.partialorder %v3657_v0, inf }
 0x2be   :  { %v998_v49 = vmul.f32 %v990_v22, %v3540_v35  ;;  %v959_v59 = vsub.f32 %v2619_v23, %v2621_v40  ;;  %v2398_v57 = vpack.i.bf16 %v3673_v6, %v3670_v20  ;;  %2626 = vpow2.f32 %v927_v1 }
 0x2bf   :  { %v951_v7 = vmul.f32 1.442695, %v936_v36  ;;  %v3682_v54 = vpop.eup %2622  ;;  %v1204_v63 = vsub.f32 1.5, %v1203_v21  ;;  %v3719_v1 = vmul.f32 %v3607_v10, %v3480_v13  ;;  %vm1245_vm9 = vcmp.eq.f32.partialorder %v3657_v0, 0.0 }
 0x2c0   :  { %v1010_v18 = vsub.f32 0.0, %v998_v49  ;;  %v1177_v39 = vadd.f32 1.0, %v998_v49  ;;  %v967_v31 = vmul.f32 0.5, %v959_v59  ;;  %2399 = vrot.lane.b32.xlu0 %v2398_v57, %s2702_s4 }
 0x2c1   :  { %2628 = vpow2.f32 %v951_v7  ;;  %v1205_v40 = vmul.f32 %v3646_v16, %v1204_v63  ;;  %v1198_v16 = vand.u32 2147483648, %v3612_v8 }
 0x2c2   :  { %v2625_v17 = vpop.eup %2624  ;;  %v3686_v35 = vmax.f32 %v1177_v39, 1e-07  ;;  %v975_v48 = vmul.f32 %v967_v31, %v3621_v42  ;;  %2349 = vmatmul.msk.f32.vlgmr.msra.gmra.mxu3 %vm1017_vm5, %v1010_v18  ;;  %v1213_v42 = vmul.f32 %v3682_v54, %v3644_v45 }
 0x2c3   :  { %v1237_v61 = vmul.f32 %v2625_v17, %v3657_v0 }
 0x2c4   :  { %2630 = vrsqrt.f32 %v3686_v35  ;;  %v991_v34 = vmul.f32 %v975_v48, %v975_v48  ;;  %v3697_v5 = vmul.f32 %v975_v48, %v3495_v37  ;;  %v2627_v52 = vpop.eup %2626  ;;  %v1214_v29 = vmul.f32 %v3682_v54, %v1213_v42 }
 0x2c5   :  { %v1238_v3 = vmul.f32 %v2625_v17, %v1237_v61  ;;  %2632 = vrsqrt.f32 %v3684_v60  ;;  %v1246_v48 = vand.u32 2147483648, %v3657_v0  ;;  %v1210_v42 = vand.u32 2147483648, %v3619_v47 }
 0x2c6   :  { %v999_v14 = vmul.f32 %v991_v34, %v3569_v24  ;;  %v2403_v51 = vpack.i.bf16 %v3697_v5, %v3692_v15  ;;  %v1193_v24 = vmul.f32 %v3635_v55, %v1192_v26  ;;  %v1215_v28 = vmul.f32 0.5, %v1214_v29 }
 0x2c7   :  { %v2629_v43 = vpop.eup %2628  ;;  %v1239_v4 = vmul.f32 0.5, %v1238_v3  ;;  %vm1255_vm10 = vcmp.eq.f32.partialorder %v3686_v35, inf  ;;  %vm1257_vm11 = vcmp.eq.f32.partialorder %v3686_v35, 0.0 }
 0x2c8   :  { %v1011_v27 = vsub.f32 0.0, %v999_v14  ;;  %v1178_v19 = vadd.f32 1.0, %v999_v14  ;;  %v960_v37 = vsub.f32 %v2627_v52, %v2629_v43  ;;  %2404 = vrot.lane.b32.xlu2 %v2403_v51, %s2702_s4  ;;  %v1194_v49 = vmul.f32 %v1193_v24, %v3612_v8 }
 0x2c9   :  { %v1240_v33 = vsub.f32 1.5, %v1239_v4  ;;  %v1216_v25 = vsub.f32 1.5, %v1215_v28 }
 0x2ca   :  { %v2631_v11 = vpop.eup %2630  ;;  %v3707_v62 = vmax.f32 %v1178_v19, 1e-07  ;;  %v968_v38 = vmul.f32 0.5, %v960_v37  ;;  %2350 = vmatmul.msk.f32.gmra.mxu3 %vm1017_vm5, %v1011_v27 }
 0x2cb   :  { %v1241_v50 = vmul.f32 %v2625_v17, %v1240_v33  ;;  %v1249_v9 = vmul.f32 %v2631_v11, %v3686_v35  ;;  %v3712_v23 = vpop.eup %2632  ;;  %v1217_v51 = vmul.f32 %v3682_v54, %v1216_v25  ;;  %v981_v25 = vmul.f32 %v3629_v41, %v3485_v46 }
 0x2cc   :  { %2634 = vrsqrt.f32 %v3707_v62  ;;  %v976_v22 = vmul.f32 %v968_v38, %v3648_v44  ;;  %v1225_v13 = vmul.f32 %v3712_v23, %v3684_v60  ;;  %vm1267_vm14 = vcmp.eq.f32.partialorder %v3707_v62, inf }
 0x2cd   :  { %v1250_v36 = vmul.f32 %v2631_v11, %v1249_v9  ;;  %v1242_v59 = vmul.f32 %v1241_v50, %v3657_v0  ;;  %v1218_v29 = vmul.f32 %v1217_v51, %v3644_v45  ;;  %vm1269_vm15 = vcmp.eq.f32.partialorder %v3707_v62, 0.0 }
 0x2ce   :  { %v992_v55 = vmul.f32 %v976_v22, %v976_v22  ;;  %v3723_v32 = vmul.f32 %v976_v22, %v3500_v30  ;;  %v1206_v30 = vmul.f32 %v1205_v40, %v3619_v47  ;;  %v1226_v34 = vmul.f32 %v3712_v23, %v1225_v13 }
 0x2cf   :  { %v1251_v44 = vmul.f32 0.5, %v1250_v36  ;;  %v1244_v17 = vsel %vm1243_vm7, %v3657_v0, %v1242_v59  ;;  %v1258_v0 = vand.u32 2147483648, %v3686_v35  ;;  %v1222_v22 = vand.u32 2147483648, %v3644_v45 }
 0x2d0   :  { %v1000_v10 = vmul.f32 %v992_v55, %v3586_v56  ;;  %v2408_v57 = vpack.i.bf16 %v3723_v32, %v3719_v1  ;;  %v1196_v56 = vsel %vm1195_vm3, %v3612_v8, %v1194_v49  ;;  %v1208_v3 = vsel %vm1207_vm6, %v3619_v47, %v1206_v30 }
 0x2d1   :  { %v1252_v7 = vsub.f32 1.5, %v1251_v44  ;;  %v1247_v52 = vsel %vm1245_vm9, %v1246_v48, %v1244_v17  ;;  %v1199_v43 = vsel %vm1197_vm4, %v1198_v16, %v1196_v56  ;;  %v1227_v19 = vmul.f32 0.5, %v1226_v34 }
 0x2d2   :  { %v2635_v18 = vpop.eup %2634  ;;  %v1012_v39 = vsub.f32 0.0, %v1000_v10  ;;  %v1179_v31 = vadd.f32 1.0, %v1000_v10  ;;  %2409 = vrot.lane.b32.xlu2 %v2408_v57, %s2702_s4  ;;  %v2413_v37 = vpack.i.bf16 %v1247_v52, %v1199_v43  ;;  %v1211_v54 = vsel %vm1209_vm8, %v1210_v42, %v1208_v3 }
 0x2d3   :  { %v1253_v58 = vmul.f32 %v2631_v11, %v1252_v7  ;;  %v1261_v61 = vmul.f32 %v2635_v18, %v3707_v62  ;;  %v977_v11 = vmul.f32 %v3529_v12, %v3465_v53  ;;  %v1220_v47 = vsel %vm1219_vm12, %v3644_v45, %v1218_v29 }
 0x2d4   :  { %v3746_v21 = vmax.f32 %v1179_v31, 1e-07  ;;  %2351 = vmatmul.msk.f32.gmra.mxu3 %vm1017_vm5, %v1012_v39  ;;  %v1270_v53 = vand.u32 2147483648, %v3707_v62  ;;  %v1223_v28 = vsel %vm1221_vm13, %v1222_v22, %v1220_v47  ;;  %v1234_v13 = vand.u32 2147483648, %v3684_v60 }
 0x2d5   :  { %v1254_v14 = vmul.f32 %v1253_v58, %v3686_v35  ;;  %v1262_v26 = vmul.f32 %v2635_v18, %v1261_v61  ;;  %vm1233_vm3 = vcmp.eq.f32.partialorder %v3684_v60, 0.0  ;;  %vm1285_vm6 = vcmp.eq.s32.totalorder %v2745_v2, 8 }
 0x2d6   :  { %2636 = vrsqrt.f32 %v3746_v21  ;;  %vm1279_vm2 = vcmp.eq.f32.partialorder %v3746_v21, inf  ;;  %v1282_v10 = vand.u32 2147483648, %v3746_v21  ;;  %vm1281_vm4 = vcmp.eq.f32.partialorder %v3746_v21, 0.0 }
 0x2d7   :  { %v1256_v4 = vsel %vm1255_vm10, %v3686_v35, %v1254_v14  ;;  %v1263_v27 = vmul.f32 0.5, %v1262_v26  ;;  %v1228_v35 = vsub.f32 1.5, %v1227_v19  ;;  %vm1415_vm8 = vcmask 523264  }
 0x2d8   :  { %v1259_v63 = vsel %vm1257_vm11, %v1258_v0, %v1256_v4  ;;  %vm1478_vm9 = vcmask 1041408   ;;  %vm1461_vm10 = vcmask 80896  }
 0x2d9   :  { %v2418_v33 = vpack.i.bf16 %v1259_v63, %v1211_v54  ;;  %v1264_v8 = vsub.f32 1.5, %v1263_v27  ;;  %v1229_v40 = vmul.f32 %v3712_v23, %v1228_v35 }
 0x2da   :  { %2414 = vrot.lane.b32.xlu2 %v2413_v37, %s2702_s4 }
 0x2db   :  { %2419 = vrot.lane.b32.xlu1 %v2418_v33, %s2702_s4  ;;  %v1265_v38 = vmul.f32 %v2635_v18, %v1264_v8  ;;  %v1230_v16 = vmul.f32 %v1229_v40, %v3684_v60  ;;  %v2433_v18 = vpack.i.bf16 %v981_v25, %v977_v11 }
 0x2dc   :  { %v2637_v24 = vpop.eup %2636  ;;  %2352 = vmatmul.msk.f32.vlgmr.msrb.gmra.mxu3 %vm1017_vm5, %v977_v11 }
 0x2dd   :  { %v1266_v50 = vmul.f32 %v1265_v38, %v3707_v62  ;;  %v1273_v9 = vmul.f32 %v2637_v24, %v3746_v21 }
 0x2df   :  { %v1268_v12 = vsel %vm1267_vm14, %v3707_v62, %v1266_v50  ;;  %v1274_v36 = vmul.f32 %v2637_v24, %v1273_v9  ;;  %v1232_v62 = vsel %vm1231_vm0, %v3684_v60, %v1230_v16 }
 0x2e0   :  { %v1271_v55 = vsel %vm1269_vm15, %v1270_v53, %v1268_v12 }
 0x2e1   :  { %v2423_v49 = vpack.i.bf16 %v1271_v55, %v1223_v28  ;;  %v1275_v59 = vmul.f32 0.5, %v1274_v36 }
 0x2e3   :  { %2424 = vrot.lane.b32.xlu0 %v2423_v49, %s2702_s4  ;;  %v1276_v45 = vsub.f32 1.5, %v1275_v59 }
 0x2e4   :  { %2353 = vmatmul.msk.f32.gmra.mxu3 %vm1017_vm5, %v3670_v20  ;;  %v1235_v20 = vsel %vm1233_vm3, %v1234_v13, %v1232_v62 }
 0x2e5   :  { %v1277_v44 = vmul.f32 %v2637_v24, %v1276_v45 }
 0x2e7   :  { %v1278_v23 = vmul.f32 %v1277_v44, %v3746_v21 }
 0x2e9   :  { %v1280_v57 = vsel %vm1279_vm2, %v3746_v21, %v1278_v23 }
 0x2ea   :  { %v1283_v30 = vsel %vm1281_vm4, %v1282_v10, %v1280_v57 }
 0x2eb   :  { %v2428_v7 = vpack.i.bf16 %v1283_v30, %v1235_v20 }
 0x2ec   :  { %2354 = vmatmul.msk.f32.gmra.mxu3 %vm1017_vm5, %v3692_v15 }
 0x2ed   :  { %2429 = vrot.lane.b32.xlu1 %v2428_v7, %s2702_s4 }
 0x2f4   :  { %2355 = vmatmul.msk.f32.gmra.mxu3 %vm1017_vm5, %v3719_v1 }
 0x2f5   :  { %2434 = vrot.lane.b32.xlu1 %v2433_v18, %s2702_s4 }
 0x2fc   :  { %2356 = vmatmul.msk.f32.gmra.mxu3 %vm1017_vm5, %v981_v25 }
 0x304   :  { %2357 = vmatmul.msk.f32.gmra.mxu3 %vm1017_vm5, %v3673_v6 }
 0x30c   :  { %2358 = vmatmul.msk.f32.gmra.mxu3 %vm1017_vm5, %v3697_v5 }
 0x314   :  { %2359 = vmatmul.msk.f32.gmra.mxu3 %vm1017_vm5, %v3723_v32  ;;  %vm1284_vm5 = vcmp.eq.s32.totalorder %v2745_v2, 0 }
 0x315   :  { %vm3834_vm7 = vmor %vm1284_vm5, %vm1285_vm6 }
 0x317   :  { %v1059_v46 = vpop.f32.mrf.mxu2 }
 0x322   :  { %v2405_v12 = vpop.permute.xlu2 %2404 }
 0x323   :  { %v2407_v23 = vunpack.i.h.bf16 %v2405_v12  ;;  %v2406_v13 = vunpack.i.l.bf16 %v2405_v12 }
 0x324   :  { %v1062_v31 = vpop.f32.mrf.mxu2 }
 0x32c   :  { %v1065_v61 = vpop.f32.mrf.mxu2  ;;  %v2410_v25 = vpop.permute.xlu2 %2409 }
 0x332   :  { %v2400_v8 = vpop.permute.xlu0 %2399 }
 0x333   :  { %v2402_v22 = vunpack.i.h.bf16 %v2400_v8  ;;  %v2401_v53 = vunpack.i.l.bf16 %v2400_v8 }
 0x334   :  { %v1068_v52 = vpop.f32.mrf.mxu2 }
 0x33d   :  { %v1071_v4 = vpop.f32.mrf.mxu2 }
 0x345   :  { %v1074_v60 = vpop.f32.mrf.mxu3 }
 0x34d   :  { %v1077_v15 = vpop.f32.mrf.mxu3  ;;  %v2420_v11 = vpop.permute.xlu1 %2419 }
 0x34e   :  { %v2422_v47 = vunpack.i.h.bf16 %v2420_v11  ;;  %v2421_v50 = vunpack.i.l.bf16 %v2420_v11 }
 0x350   :  { %v3840_v2 = vsel %vm3834_vm7, %v2421_v50, %v2401_v53  ;;  %v3844_v28 = vsel %vm3834_vm7, %v2422_v47, %v2402_v22 }
 0x351   :  { %v2448_v45 = vpack.i.bf16 %v3844_v28, %v3840_v2 }
 0x355   :  { %v2425_v55 = vpop.permute.xlu0 %2424 }
 0x356   :  { %v2427_v44 = vunpack.i.h.bf16 %v2425_v55  ;;  %v2426_v62 = vunpack.i.l.bf16 %v2425_v55 }
 0x357   :  { %v3810_v41 = vpop.f32.mrf.mxu3 }
 0x358   :  { %v3853_v30 = vsel %vm3834_vm7, %v2426_v62, %v2406_v13  ;;  %v3857_v7 = vsel %vm3834_vm7, %v2427_v44, %v2407_v23 }
 0x35f   :  { %v1124_v39 = vpop.f32.mrf.mxu3  ;;  %v2430_v10 = vpop.permute.xlu1 %2429 }
 0x360   :  { %v1125_v1 = vadd.f32 %v1124_v39, %v1059_v46  ;;  %v2443_v46 = vpack.i.bf16 %v3857_v7, %v3853_v30  ;;  %v2432_v39 = vunpack.i.h.bf16 %v2430_v10 }
 0x362   :  { %v1148_v56 = vmul.f32 1.442695, %v1125_v1  ;;  %v2431_v1 = vunpack.i.l.bf16 %v2430_v10 }
 0x364   :  { %2638 = vpow2.f32 %v1148_v56 }
 0x367   :  { %v1127_v17 = vpop.f32.mrf.mxu3 }
 0x368   :  { %v1128_v48 = vadd.f32 %v1127_v17, %v1062_v31  ;;  %v2411_v31 = vunpack.i.l.bf16 %v2410_v25 }
 0x36a   :  { %v2639_v58 = vpop.eup %2638  ;;  %v1150_v6 = vmul.f32 1.442695, %v1128_v48  ;;  %v3865_v56 = vsel %vm3834_vm7, %v2431_v1, %v2411_v31  ;;  %v2435_v48 = vpop.permute.xlu1 %2434 }
 0x36b   :  { %v3812_v34 = vmul.f32 0.37796447, %v2639_v58 }
 0x36c   :  { %2640 = vpow2.f32 %v1150_v6  ;;  %v2415_v6 = vpop.permute.xlu2 %2414 }
 0x36d   :  { %1355 = vrot.lane.b32.xlu0 %v3812_v34, %s2703_s14 }
 0x36f   :  { %v1130_v5 = vpop.f32.mrf.mxu3 }
 0x370   :  { %v1131_v32 = vadd.f32 %v1130_v5, %v1065_v61 }
 0x372   :  { %v2641_v21 = vpop.eup %2640  ;;  %v1152_v3 = vmul.f32 1.442695, %v1131_v32  ;;  %v2437_v32 = vunpack.i.h.bf16 %v2435_v48 }
 0x373   :  { %v3816_v42 = vmul.f32 0.37796447, %v2641_v21  ;;  %v2436_v21 = vunpack.i.l.bf16 %v2435_v48 }
 0x374   :  { %2642 = vpow2.f32 %v1152_v3  ;;  %v2417_v3 = vunpack.i.h.bf16 %v2415_v6 }
 0x375   :  { %1357 = vrot.lane.b32.xlu1 %v3816_v42, %s2703_s14 }
 0x377   :  { %v1133_v14 = vpop.f32.mrf.mxu3 }
 0x378   :  { %v1134_v51 = vadd.f32 %v1133_v14, %v1068_v52  ;;  %v2416_v52 = vunpack.i.l.bf16 %v2415_v6 }
 0x37a   :  { %v2643_v26 = vpop.eup %2642  ;;  %v1154_v43 = vmul.f32 1.442695, %v1134_v51  ;;  %v3877_v14 = vsel %vm3834_vm7, %v2416_v52, %v2436_v21  ;;  %v3881_v51 = vsel %vm3834_vm7, %v2417_v3, %v2437_v32 }
 0x37b   :  { %v3820_v0 = vmul.f32 0.37796447, %v2643_v26  ;;  %v2453_v26 = vpack.i.bf16 %v3881_v51, %v3877_v14 }
 0x37c   :  { %2644 = vpow2.f32 %v1154_v43 }
 0x37d   :  { %1359 = vrot.lane.b32.xlu2 %v3820_v0, %s2703_s14 }
 0x37f   :  { %v1136_v27 = vpop.f32.mrf.mxu3 }
 0x380   :  { %v1137_v19 = vadd.f32 %v1136_v27, %v1071_v4 }
 0x382   :  { %v2645_v37 = vpop.eup %2644  ;;  %v1156_v54 = vmul.f32 1.442695, %v1137_v19 }
 0x383   :  { %v3824_v63 = vmul.f32 0.37796447, %v2645_v37 }
 0x384   :  { %2646 = vpow2.f32 %v1156_v54 }
 0x385   :  { %1361 = vrot.lane.b32.xlu0 %v3824_v63, %s2703_s14 }
 0x387   :  { %v1139_v33 = vpop.f32.mrf.mxu3 }
 0x388   :  { %v1140_v29 = vadd.f32 %v1139_v33, %v1074_v60 }
 0x38a   :  { %v2647_v38 = vpop.eup %2646  ;;  %v1158_v35 = vmul.f32 1.442695, %v1140_v29 }
 0x38b   :  { %v3830_v24 = vmul.f32 0.37796447, %v2647_v38 }
 0x38c   :  { %2648 = vpow2.f32 %v1158_v35 }
 0x38d   :  { %1727 = vrot.lane.b32.xlu2 %v3830_v24, %s2703_s14 }
 0x38f   :  { %v1142_v40 = vpop.f32.mrf.mxu3 }
 0x390   :  { %v1143_v36 = vadd.f32 %v1142_v40, %v1077_v15 }
 0x392   :  { %v2649_v49 = vpop.eup %2648  ;;  %v1160_v59 = vmul.f32 1.442695, %v1143_v36 }
 0x393   :  { %v1169_v16 = vmul.f32 0.37796447, %v2649_v49 }
 0x394   :  { %2650 = vpow2.f32 %v1160_v59 }
 0x395   :  { %1729 = vrot.lane.b32.xlu0 %v1169_v16, %s2703_s14  ;;  %2449 = vrot.lane.b32.xlu2 %v2448_v45, %s2704_s15 }
 0x397   :  { %v1145_v57 = vpop.f32.mrf.mxu3 }
 0x398   :  { %v1146_v20 = vadd.f32 %v1145_v57, %v3810_v41  ;;  %v2412_v41 = vunpack.i.h.bf16 %v2410_v25 }
 0x39a   :  { %v2651_v18 = vpop.eup %2650  ;;  %v1162_v60 = vmul.f32 1.442695, %v1146_v20  ;;  %v3869_v17 = vsel %vm3834_vm7, %v2432_v39, %v2412_v41 }
 0x39b   :  { %v1170_v15 = vmul.f32 0.37796447, %v2651_v18  ;;  %v2438_v5 = vpack.i.bf16 %v3869_v17, %v3865_v56 }
 0x39c   :  { %2652 = vpow2.f32 %v1162_v60 }
 0x39d   :  { %1731 = vrot.lane.b32.xlu1 %v1170_v15, %s2703_s14  ;;  %2444 = vrot.lane.b32.xlu0 %v2443_v46, %s2704_s15 }
 0x3a2   :  { %v2653_v58 = vpop.eup %2652 }
 0x3a3   :  { %v1171_v61 = vmul.f32 0.37796447, %v2653_v58 }
 0x3a5   :  { %2439 = vrot.lane.b32.xlu1 %v2438_v5, %s2704_s15  ;;  %1733 = vrot.lane.b32.xlu2 %v1171_v61, %s2703_s14 }
 0x3ad   :  { %2454 = vrot.lane.b32.xlu1 %v2453_v26, %s2704_s15 }
 0x3b5   :  { %1445 = vrot.lane.b32.xlu1 %v3812_v34, %s2705_s16 }
 0x3bd   :  { %1816 = vrot.lane.b32.xlu1 %v3830_v24, %s2705_s16 }
 0x3bf   :  { %1383 = vxpose.xlu0.b32.start [1/8] (short) (narrow) %v3812_v34, 16 }
 0x3c5   :  { %1447 = vrot.lane.b32.xlu1 %v3816_v42, %s2705_s16 }
 0x3c7   :  { %1384 = vxpose.xlu0.b32.cont [2/8] (short) (narrow) %v3816_v42, 16 }
 0x3cb   :  { %1755 = vxpose.xlu2.b32.start [1/8] (short) (narrow) %v3830_v24, 16 }
 0x3cd   :  { %1818 = vrot.lane.b32.xlu1 %v1169_v16, %s2705_s16 }
 0x3cf   :  { %1385 = vxpose.xlu0.b32.cont [3/8] (short) (narrow) %v3820_v0, 16 }
 0x3d3   :  { %1756 = vxpose.xlu2.b32.cont [2/8] (short) (narrow) %v1169_v16, 16 }
 0x3d5   :  { %1449 = vrot.lane.b32.xlu1 %v3820_v0, %s2705_s16 }
 0x3d7   :  { %1386 = vxpose.xlu0.b32.cont [4/8] (short) (narrow) %v3824_v63, 16  ;;  %v1360_v43 = vpop.permute.xlu2 %1359 }
 0x3db   :  { %1757 = vxpose.xlu2.b32.cont [3/8] (short) (narrow) %v1170_v15, 16 }
 0x3dd   :  { %1820 = vrot.lane.b32.xlu1 %v1170_v15, %s2705_s16 }
 0x3df   :  { %v1356_v34 = vpop.permute.xlu0 %1355 }
 0x3e0   :  { %1387 = vxpose.xlu0.b32.cont [5/8] (short) (narrow) %v1356_v34, 16 }
 0x3e3   :  { %1758 = vxpose.xlu2.b32.cont [4/8] (short) (narrow) %v1171_v61, 16 }
 0x3e5   :  { %1451 = vrot.lane.b32.xlu1 %v3824_v63, %s2705_s16 }
 0x3e7   :  { %v1358_v42 = vpop.permute.xlu1 %1357  ;;  %v1728_v4 = vpop.permute.xlu2 %1727 }
 0x3e8   :  { %1388 = vxpose.xlu0.b32.cont [6/8] (short) (narrow) %v1358_v42, 16 }
 0x3eb   :  { %1759 = vxpose.xlu2.b32.cont [5/8] (short) (narrow) %v1728_v4, 16 }
 0x3ed   :  { %1822 = vrot.lane.b32.xlu1 %v1171_v61, %s2705_s16 }
 0x3ef   :  { %v2450_v19 = vpop.permute.xlu2 %2449 }
 0x3f0   :  { %1389 = vxpose.xlu0.b32.cont [7/8] (short) (narrow) %v1360_v43, 16  ;;  %v2452_v35 = vunpack.i.h.bf16 %v2450_v19  ;;  %v2451_v24 = vunpack.i.l.bf16 %v2450_v19 }
 0x3f5   :  { %1453 = vrot.lane.b32.xlu1 %v1356_v34, %s2705_s16 }
 0x3f7   :  { %v1362_v0 = vpop.permute.xlu0 %1361 }
 0x3f8   :  { %1390 = vxpose.xlu0.b32.end [8/8] (short) (narrow) %v1362_v0, 16 }
 0x3fd   :  { %1824 = vrot.lane.b32.xlu1 %v1728_v4, %s2705_s16 }
 0x3ff   :  { %v1734_v54 = vpop.permute.xlu2 %1733 }
 0x405   :  { %1455 = vrot.lane.b32.xlu1 %v1358_v42, %s2705_s16 }
 0x407   :  { %v1730_v27 = vpop.permute.xlu0 %1729 }
 0x408   :  { %1760 = vxpose.xlu2.b32.cont [6/8] (short) (narrow) %v1730_v27, 16 }
 0x40d   :  { %1457 = vrot.lane.b32.xlu1 %v1360_v43, %s2705_s16 }
 0x40f   :  { %v1732_v37 = vpop.permute.xlu1 %1731  ;;  %v2445_v63 = vpop.permute.xlu0 %2444 }
 0x410   :  { %1761 = vxpose.xlu2.b32.cont [7/8] (short) (narrow) %v1732_v37, 16  ;;  %v2447_v11 = vunpack.i.h.bf16 %v2445_v63  ;;  %v2446_v38 = vunpack.i.l.bf16 %v2445_v63 }
 0x415   :  { %1459 = vrot.lane.b32.xlu1 %v1362_v0, %s2705_s16 }
 0x417   :  { %v2440_v33 = vpop.permute.xlu1 %2439 }
 0x418   :  { %v2442_v29 = vunpack.i.h.bf16 %v2440_v33  ;;  %v2441_v8 = vunpack.i.l.bf16 %v2440_v33  ;;  %1762 = vxpose.xlu2.b32.end [8/8] (short) (narrow) %v1734_v54, 16 }
 0x41a   :  { %1430 = vmatpush.msra.mxu0 %v2441_v8  ;;  %1801 = vmatpush.msra.mxu3 %v2442_v29 }
 0x41c   :  { %1431 = vmatpush.msra.mxu0 %v2446_v38  ;;  %1802 = vmatpush.msra.mxu3 %v2447_v11 }
 0x41d   :  { %1830 = vrot.lane.b32.xlu1 %v1734_v54, %s2705_s16 }
 0x41e   :  { %1432 = vmatpush.msra.mxu0 %v2451_v24  ;;  %1803 = vmatpush.msra.mxu3 %v2452_v35 }
 0x41f   :  { %v2455_v47 = vpop.permute.xlu1 %2454 }
 0x420   :  { %v2457_v50 = vunpack.i.h.bf16 %v2455_v47  ;;  %v2456_v9 = vunpack.i.l.bf16 %v2455_v47 }
 0x422   :  { %1433 = vmatpush.msra.mxu0 %v2456_v9  ;;  %1804 = vmatpush.msra.mxu3 %v2457_v50 }
 0x424   :  { %1434 = vmatpush.msra.mxu0 %v3865_v56  ;;  %1805 = vmatpush.msra.mxu3 %v3869_v17 }
 0x426   :  { %1435 = vmatpush.msra.mxu0 %v3853_v30  ;;  %1806 = vmatpush.msra.mxu3 %v3857_v7 }
 0x427   :  { %v1446_v36 = vpop.permute.xlu1 %1445 }
 0x428   :  { %1436 = vmatpush.msra.mxu0 %v3840_v2  ;;  %1807 = vmatpush.msra.mxu3 %v3844_v28 }
 0x42a   :  { %1437 = vmatpush.msra.mxu0 %v3877_v14  ;;  %1808 = vmatpush.msra.mxu3 %v3881_v51 }
 0x42f   :  { %v1817_v2 = vpop.permute.xlu1 %1816 }
 0x437   :  { %v1448_v28 = vpop.permute.xlu1 %1447 }
 0x43f   :  { %v1819_v55 = vpop.permute.xlu1 %1818 }
 0x447   :  { %v1450_v49 = vpop.permute.xlu1 %1449 }
 0x44f   :  { %v1821_v59 = vpop.permute.xlu1 %1820 }
 0x457   :  { %v1452_v45 = vpop.permute.xlu1 %1451 }
 0x45f   :  { %v1823_v62 = vpop.permute.xlu1 %1822 }
 0x464   :  { %v1399_v22 = vpop.trf.xlu0 }
 0x465   :  { %2360 = vmatmul.msk.f32.vlgmr.msra.gmra.mxu0 %vm1415_vm8, %v1399_v22 }
 0x466   :  { %1826 = vrot.lane.b32.xlu0 %v1730_v27, %s2705_s16 }
 0x467   :  { %v1454_v23 = vpop.permute.xlu1 %1453 }
 0x46c   :  { %v1400_v53 = vpop.trf.xlu0 }
 0x46d   :  { %2361 = vmatmul.msk.f32.gmra.mxu0 %vm1415_vm8, %v1400_v53 }
 0x46f   :  { %v1825_v57 = vpop.permute.xlu1 %1824 }
 0x477   :  { %v1456_v20 = vpop.permute.xlu1 %1455 }
 0x479   :  { %v1771_v12 = vpop.trf.xlu2 }
 0x47a   :  { %2371 = vmatmul.msk.f32.vlgmr.msra.gmra.mxu3 %vm1415_vm8, %v1771_v12 }
 0x47f   :  { %v1458_v30 = vpop.permute.xlu1 %1457 }
 0x481   :  { %1828 = vrot.lane.b32.xlu2 %v1732_v37, %s2705_s16  ;;  %v1772_v40 = vpop.trf.xlu2 }
 0x482   :  { %2372 = vmatmul.msk.f32.gmra.mxu3 %vm1415_vm8, %v1772_v40 }
 0x487   :  { %v1460_v7 = vpop.permute.xlu1 %1459 }
 0x48f   :  { %v1831_v60 = vpop.permute.xlu1 %1830 }
 0x4d8   :  { %v1827_v25 = vpop.permute.xlu0 %1826 }
 0x4db   :  { %v1829_v18 = vpop.permute.xlu2 %1828 }
 0x4e2   :  { %v1439_v16 = vpop.f32.mrf.mxu0 }
 0x4ea   :  { %v1442_v44 = vpop.f32.mrf.mxu0 }
 0x4eb   :  { %2362 = vmatpush.msk.msrb.mxu2 %vm1478_vm9, %v1442_v44 }
 0x4ed   :  { %1497 = vmatpush.msrb.mxu2 %v1439_v16 }
 0x4ee   :  { %2363 = vmatmul.msk.f32.vlgmr.msrb.gmra.mxu2 %vm1461_vm10, %v1446_v36 }
 0x4f6   :  { %2364 = vmatmul.msk.f32.gmra.mxu2 %vm1461_vm10, %v1448_v28 }
 0x4fd   :  { %v1810_v13 = vpop.f32.mrf.mxu3 }
 0x4fe   :  { %2365 = vmatmul.msk.f32.gmra.mxu2 %vm1461_vm10, %v1450_v49 }
 0x505   :  { %v1813_v10 = vpop.f32.mrf.mxu3 }
 0x506   :  { %2366 = vmatmul.msk.f32.gmra.mxu2 %vm1461_vm10, %v1452_v45  ;;  %2373 = vmatpush.msk.msrb.mxu1 %vm1478_vm9, %v1813_v10 }
 0x508   :  { %1866 = vmatpush.msrb.mxu1 %v1810_v13 }
 0x509   :  { %2374 = vmatmul.msk.f32.vlgmr.msrb.gmra.mxu1 %vm1461_vm10, %v1817_v2 }
 0x50e   :  { %2367 = vmatmul.msk.f32.gmra.mxu2 %vm1461_vm10, %v1454_v23 }
 0x511   :  { %2375 = vmatmul.msk.f32.gmra.mxu1 %vm1461_vm10, %v1819_v55 }
 0x516   :  { %2368 = vmatmul.msk.f32.gmra.mxu2 %vm1461_vm10, %v1456_v20 }
 0x519   :  { %2376 = vmatmul.msk.f32.gmra.mxu1 %vm1461_vm10, %v1821_v59 }
 0x51e   :  { %2369 = vmatmul.msk.f32.gmra.mxu2 %vm1461_vm10, %v1458_v30 }
 0x521   :  { %2377 = vmatmul.msk.f32.gmra.mxu1 %vm1461_vm10, %v1823_v62 }
 0x526   :  { %2370 = vmatmul.msk.f32.gmra.mxu2 %vm1461_vm10, %v1460_v7 }
 0x529   :  { %2378 = vmatmul.msk.f32.gmra.mxu1 %vm1461_vm10, %v1825_v57  ;;  %v2706_v57 = vmov 0  }
 0x52a   :  { %2458 = vset.pattern.permute.xlu2 %v2706_v57  ;;  %2459 = vset.pattern.permute.xlu1 %v2706_v57 }
 0x52b   :  { %2460 = vset.pattern.permute.xlu0 %v2706_v57 }
 0x531   :  { %2379 = vmatmul.msk.f32.gmra.mxu1 %vm1461_vm10, %v1827_v25 }
 0x539   :  { %2380 = vmatmul.msk.f32.gmra.mxu1 %vm1461_vm10, %v1829_v18 }
 0x541   :  { %2381 = vmatmul.msk.f32.gmra.mxu1 %vm1461_vm10, %v1831_v60 }
 0x571   :  { %v3936_v15 = vpop.f32.mrf.mxu2 }
 0x572   :  { %v1523_v46 = vmul.f32 %v3936_v15, %v3936_v15 }
 0x574   :  { %v1531_v39 = vsel %vm50_vm1, %v1523_v46, 0.0  ;;  %v1555_v49 = vmul.f32 2.0, %v1523_v46 }
 0x575   :  { %1532 = vadd.xlane.f32.xlu1 %v1531_v39 }
 0x579   :  { %v3941_v1 = vpop.f32.mrf.mxu2 }
 0x57a   :  { %v3945_v41 = vmul.f32 %v3941_v1, %v3941_v1 }
 0x57c   :  { %v1534_v31 = vsel %vm50_vm1, %v3945_v41, 0.0  ;;  %v1556_v62 = vmul.f32 2.0, %v3945_v41 }
 0x57d   :  { %1535 = vadd.xlane.f32.xlu1 %v1534_v31 }
 0x581   :  { %v3949_v56 = vpop.f32.mrf.mxu2 }
 0x582   :  { %v3953_v17 = vmul.f32 %v3949_v56, %v3949_v56 }
 0x584   :  { %v1537_v48 = vsel %vm50_vm1, %v3953_v17, 0.0  ;;  %v1557_v25 = vmul.f32 2.0, %v3953_v17 }
 0x585   :  { %1538 = vadd.xlane.f32.xlu1 %v1537_v48 }
 0x586   :  { %v3957_v58 = vpop.f32.mrf.mxu1 }
 0x587   :  { %v3961_v6 = vmul.f32 %v3957_v58, %v3957_v58 }
 0x589   :  { %v3963_v61 = vpop.f32.mrf.mxu2  ;;  %v1900_v5 = vsel %vm50_vm1, %v3961_v6, 0.0 }
 0x58a   :  { %v3969_v32 = vmul.f32 %v3963_v61, %v3963_v61  ;;  %1901 = vadd.xlane.f32.xlu0 %v1900_v5 }
 0x58c   :  { %v1540_v21 = vsel %vm50_vm1, %v3969_v32, 0.0 }
 0x58d   :  { %1541 = vadd.xlane.f32.xlu1 %v1540_v21  ;;  %v1924_v21 = vmul.f32 2.0, %v3961_v6 }
 0x58e   :  { %v3973_v3 = vpop.f32.mrf.mxu1 }
 0x58f   :  { %v3977_v52 = vmul.f32 %v3973_v3, %v3973_v3 }
 0x591   :  { %v3979_v14 = vpop.f32.mrf.mxu2  ;;  %v1903_v51 = vsel %vm50_vm1, %v3977_v52, 0.0 }
 0x592   :  { %v3985_v26 = vmul.f32 %v3979_v14, %v3979_v14  ;;  %1904 = vadd.xlane.f32.xlu2 %v1903_v51 }
 0x594   :  { %v1543_v34 = vsel %vm50_vm1, %v3985_v26, 0.0 }
 0x595   :  { %1544 = vadd.xlane.f32.xlu1 %v1543_v34 }
 0x596   :  { %v3995_v4 = vpop.f32.mrf.mxu1 }
 0x597   :  { %v4011_v63 = vmul.f32 %v3995_v4, %v3995_v4 }
 0x599   :  { %v3989_v43 = vpop.f32.mrf.mxu2  ;;  %v1906_v11 = vsel %vm50_vm1, %v4011_v63, 0.0 }
 0x59a   :  { %v3993_v42 = vmul.f32 %v3989_v43, %v3989_v43 }
 0x59c   :  { %v1546_v0 = vsel %vm50_vm1, %v3993_v42, 0.0 }
 0x59d   :  { %1547 = vadd.xlane.f32.xlu1 %v1546_v0 }
 0x59e   :  { %v4007_v54 = vpop.f32.mrf.mxu1 }
 0x59f   :  { %v4027_v35 = vmul.f32 %v4007_v54, %v4007_v54 }
 0x5a1   :  { %v3999_v27 = vpop.f32.mrf.mxu2  ;;  %v1909_v24 = vsel %vm50_vm1, %v4027_v35, 0.0 }
 0x5a2   :  { %v4003_v19 = vmul.f32 %v3999_v27, %v3999_v27 }
 0x5a4   :  { %v1549_v37 = vsel %vm50_vm1, %v4003_v19, 0.0 }
 0x5a5   :  { %1550 = vadd.xlane.f32.xlu1 %v1549_v37 }
 0x5a6   :  { %v4023_v38 = vpop.f32.mrf.mxu1 }
 0x5a7   :  { %v4033_v47 = vmul.f32 %v4023_v38, %v4023_v38 }
 0x5a9   :  { %v4013_v33 = vpop.f32.mrf.mxu2  ;;  %v1912_v9 = vsel %vm50_vm1, %v4033_v47, 0.0 }
 0x5aa   :  { %v4017_v29 = vmul.f32 %v4013_v33, %v4013_v33 }
 0x5ac   :  { %v1552_v8 = vsel %vm50_vm1, %v4017_v29, 0.0 }
 0x5ad   :  { %1553 = vadd.xlane.f32.xlu0 %v1552_v8  ;;  %1907 = vadd.xlane.f32.xlu1 %v1906_v11  ;;  %v1558_v8 = vmul.f32 2.0, %v3969_v32 }
 0x5ae   :  { %v4035_v50 = vpop.f32.mrf.mxu1 }
 0x5af   :  { %v4041_v22 = vmul.f32 %v4035_v50, %v4035_v50 }
 0x5b1   :  { %v1915_v12 = vsel %vm50_vm1, %v4041_v22, 0.0 }
 0x5b5   :  { %1910 = vadd.xlane.f32.xlu0 %v1909_v24 }
 0x5b6   :  { %v4043_v53 = vpop.f32.mrf.mxu1 }
 0x5b7   :  { %v4049_v40 = vmul.f32 %v4043_v53, %v4043_v53 }
 0x5b9   :  { %v1918_v36 = vsel %vm50_vm1, %v4049_v40, 0.0 }
 0x5bd   :  { %1913 = vadd.xlane.f32.xlu0 %v1912_v9 }
 0x5be   :  { %v4053_v2 = vpop.f32.mrf.mxu1 }
 0x5bf   :  { %v4057_v28 = vmul.f32 %v4053_v2, %v4053_v2 }
 0x5c1   :  { %v1921_v55 = vsel %vm50_vm1, %v4057_v28, 0.0 }
 0x5c5   :  { %1916 = vadd.xlane.f32.xlu0 %v1915_v12 }
 0x5cd   :  { %1919 = vadd.xlane.f32.xlu0 %v1918_v36 }
 0x5d5   :  { %1922 = vadd.xlane.f32.xlu0 %v1921_v55 }
 0x5e8   :  { %v1533_v59 = vpop.xlane.xlu1 %1532 }
 0x5e9   :  { %v1563_v16 = vsub.f32 %v1533_v59, %v1555_v49  ;;  %v1925_v49 = vmul.f32 2.0, %v3977_v52 }
 0x5eb   :  { %v1571_v45 = vand.u32 2147483647, %v1563_v16 }
 0x5ed   :  { %v1579_v44 = vmax.f32 %v1571_v45, 1e-15 }
 0x5ef   :  { %2654 = vrsqrt.f32 %v1579_v44  ;;  %vm1593_vm12 = vweird.f32 %v1579_v44 }
 0x5f0   :  { %v1536_v23 = vpop.xlane.xlu1 %1535 }
 0x5f1   :  { %v1564_v13 = vsub.f32 %v1536_v23, %v1556_v62 }
 0x5f3   :  { %v1572_v10 = vand.u32 2147483647, %v1564_v13  ;;  %v1559_v13 = vmul.f32 2.0, %v3985_v26  ;;  %v1560_v26 = vmul.f32 2.0, %v3993_v42 }
 0x5f5   :  { %v2655_v20 = vpop.eup %2654  ;;  %v1580_v30 = vmax.f32 %v1572_v10, 1e-15 }
 0x5f6   :  { %v1588_v7 = vmul.f32 %v2655_v20, %v1579_v44  ;;  %vm1594_vm11 = vweird.f32 %v2655_v20 }
 0x5f7   :  { %2656 = vrsqrt.f32 %v1580_v30  ;;  %vm1595_vm13 = vmor %vm1593_vm12, %vm1594_vm11  ;;  %vm1603_vm15 = vweird.f32 %v1580_v30 }
 0x5f8   :  { %v1589_v18 = vmul.f32 %v2655_v20, %v1588_v7  ;;  %v1539_v60 = vpop.xlane.xlu1 %1538 }
 0x5f9   :  { %v1565_v46 = vsub.f32 %v1539_v60, %v1557_v25 }
 0x5fa   :  { %v1590_v39 = vmul.f32 0.5, %v1589_v18 }
 0x5fb   :  { %v1573_v31 = vand.u32 2147483647, %v1565_v46 }
 0x5fc   :  { %v1591_v48 = vsub.f32 1.5, %v1590_v39 }
 0x5fd   :  { %v2657_v41 = vpop.eup %2656  ;;  %v1581_v5 = vmax.f32 %v1573_v31, 1e-15  ;;  %v1902_v51 = vpop.xlane.xlu0 %1901 }
 0x5fe   :  { %v1598_v34 = vmul.f32 %v2657_v41, %v1580_v30  ;;  %v1592_v0 = vmul.f32 %v2655_v20, %v1591_v48  ;;  %v1932_v37 = vsub.f32 %v1902_v51, %v1924_v21  ;;  %vm1604_vm14 = vweird.f32 %v2657_v41 }
 0x5ff   :  { %2658 = vrsqrt.f32 %v1581_v5  ;;  %vm1605_vm0 = vmor %vm1603_vm15, %vm1604_vm14  ;;  %vm1613_vm3 = vweird.f32 %v1581_v5 }
 0x600   :  { %v1599_v17 = vmul.f32 %v2657_v41, %v1598_v34  ;;  %v1542_v11 = vpop.xlane.xlu1 %1541  ;;  %v1596_v24 = vsel %vm1595_vm13, %v2655_v20, %v1592_v0  ;;  %v1940_v36 = vand.u32 2147483647, %v1932_v37 }
 0x601   :  { %v1566_v9 = vsub.f32 %v1542_v11, %v1558_v8  ;;  %1669 = vperm.xlu2 %2458, %v1596_v24  }
 0x602   :  { %v1600_v12 = vmul.f32 0.5, %v1599_v17  ;;  %v4066_v32 = vmax.f32 %v1940_v36, 1e-15 }
 0x603   :  { %v1574_v55 = vand.u32 2147483647, %v1566_v9 }
 0x604   :  { %v1601_v6 = vsub.f32 1.5, %v1600_v12 }
 0x605   :  { %v2659_v59 = vpop.eup %2658  ;;  %v1582_v16 = vmax.f32 %v1574_v55, 1e-15  ;;  %v1905_v45 = vpop.xlane.xlu2 %1904 }
 0x606   :  { %v1608_v44 = vmul.f32 %v2659_v59, %v1581_v5  ;;  %v1933_v62 = vsub.f32 %v1905_v45, %v1925_v49  ;;  %v1602_v23 = vmul.f32 %v2657_v41, %v1601_v6  ;;  %vm1614_vm2 = vweird.f32 %v2659_v59 }
 0x607   :  { %2660 = vrsqrt.f32 %v1582_v16  ;;  %vm1615_vm4 = vmor %vm1613_vm3, %vm1614_vm2  ;;  %vm1623_vm6 = vweird.f32 %v1582_v16  ;;  %v1561_v6 = vmul.f32 2.0, %v4003_v19 }
 0x608   :  { %v1609_v10 = vmul.f32 %v2659_v59, %v1608_v44  ;;  %v1941_v57 = vand.u32 2147483647, %v1933_v62  ;;  %v1545_v20 = vpop.xlane.xlu1 %1544  ;;  %v1606_v7 = vsel %vm1605_vm0, %v2657_v41, %v1602_v23  ;;  %2662 = vrsqrt.f32 %v4066_v32 }
 0x609   :  { %v1567_v52 = vsub.f32 %v1545_v20, %v1559_v13  ;;  %1674 = vperm.xlu1 %2459, %v1606_v7   ;;  %vm1962_vm0 = vweird.f32 %v4066_v32 }
 0x60a   :  { %v1610_v25 = vmul.f32 0.5, %v1609_v10  ;;  %v1949_v18 = vmax.f32 %v1941_v57, 1e-15 }
 0x60b   :  { %v1575_v60 = vand.u32 2147483647, %v1567_v52 }
 0x60c   :  { %2664 = vrsqrt.f32 %v1949_v18  ;;  %v1611_v46 = vsub.f32 1.5, %v1610_v25  ;;  %vm1972_vm9 = vweird.f32 %v1949_v18 }
 0x60d   :  { %v2661_v30 = vpop.eup %2660  ;;  %v1583_v39 = vmax.f32 %v1575_v60, 1e-15 }
 0x60e   :  { %v1618_v31 = vmul.f32 %v2661_v30, %v1582_v16  ;;  %v1612_v48 = vmul.f32 %v2659_v59, %v1611_v46  ;;  %v4071_v34 = vpop.eup %2662  ;;  %vm1624_vm5 = vweird.f32 %v2661_v30 }
 0x60f   :  { %2666 = vrsqrt.f32 %v1583_v39  ;;  %v1957_v24 = vmul.f32 %v4071_v34, %v4066_v32  ;;  %vm1625_vm7 = vmor %vm1623_vm6, %vm1624_vm5  ;;  %vm1633_vm12 = vweird.f32 %v1583_v39  ;;  %vm1963_vm14 = vweird.f32 %v4071_v34 }
 0x610   :  { %v1619_v41 = vmul.f32 %v2661_v30, %v1618_v31  ;;  %v1548_v21 = vpop.xlane.xlu1 %1547  ;;  %v1616_v51 = vsel %vm1615_vm4, %v2659_v59, %v1612_v48  ;;  %v1926_v31 = vmul.f32 2.0, %v4011_v63  ;;  %vm1964_vm2 = vmor %vm1962_vm0, %vm1963_vm14 }
 0x611   :  { %v1568_v0 = vsub.f32 %v1548_v21, %v1560_v26  ;;  %1679 = vperm.xlu2 %2458, %v1616_v51   ;;  %v1958_v59 = vmul.f32 %v4071_v34, %v1957_v24 }
 0x612   :  { %v2665_v37 = vpop.eup %2664  ;;  %v1620_v8 = vmul.f32 0.5, %v1619_v41 }
 0x613   :  { %v1967_v17 = vmul.f32 %v2665_v37, %v1949_v18  ;;  %v1576_v11 = vand.u32 2147483647, %v1568_v0  ;;  %vm1973_vm8 = vweird.f32 %v2665_v37  ;;  %v1959_v7 = vmul.f32 0.5, %v1958_v59 }
 0x614   :  { %v1621_v9 = vsub.f32 1.5, %v1620_v8  ;;  %vm1974_vm10 = vmor %vm1972_vm9, %vm1973_vm8 }
 0x615   :  { %v2667_v5 = vpop.eup %2666  ;;  %v1968_v12 = vmul.f32 %v2665_v37, %v1967_v17  ;;  %v1584_v42 = vmax.f32 %v1576_v11, 1e-15  ;;  %v1960_v21 = vsub.f32 1.5, %v1959_v7 }
 0x616   :  { %v1628_v36 = vmul.f32 %v2667_v5, %v1583_v39  ;;  %v1622_v55 = vmul.f32 %v2661_v30, %v1621_v9  ;;  %vm1634_vm11 = vweird.f32 %v2667_v5 }
 0x617   :  { %v1969_v49 = vmul.f32 0.5, %v1968_v12  ;;  %2668 = vrsqrt.f32 %v1584_v42  ;;  %vm1635_vm13 = vmor %vm1633_vm12, %vm1634_vm11  ;;  %v1961_v39 = vmul.f32 %v4071_v34, %v1960_v21  ;;  %vm1643_vm3 = vweird.f32 %v1584_v42 }
 0x618   :  { %v1629_v45 = vmul.f32 %v2667_v5, %v1628_v36  ;;  %v1551_v44 = vpop.xlane.xlu1 %1550  ;;  %v1626_v62 = vsel %vm1625_vm7, %v2661_v30, %v1622_v55  ;;  %v1562_v30 = vmul.f32 2.0, %v4017_v29  ;;  %v1927_v12 = vmul.f32 2.0, %v4027_v35 }
 0x619   :  { %v1569_v23 = vsub.f32 %v1551_v44, %v1561_v6  ;;  %1684 = vperm.xlu2 %2458, %v1626_v62   ;;  %v1970_v13 = vsub.f32 1.5, %v1969_v49  ;;  %v1965_v49 = vsel %vm1964_vm2, %v4071_v34, %v1961_v39 }
 0x61a   :  { %v1630_v10 = vmul.f32 0.5, %v1629_v45 }
 0x61b   :  { %v1577_v57 = vand.u32 2147483647, %v1569_v23  ;;  %v1971_v20 = vmul.f32 %v2665_v37, %v1970_v13 }
 0x61c   :  { %v1631_v16 = vsub.f32 1.5, %v1630_v10 }
 0x61d   :  { %v2669_v52 = vpop.eup %2668  ;;  %v1585_v19 = vmax.f32 %v1577_v57, 1e-15  ;;  %v1975_v25 = vsel %vm1974_vm10, %v2665_v37, %v1971_v20  ;;  %v1928_v57 = vmul.f32 2.0, %v4033_v47 }
 0x61e   :  { %v1638_v60 = vmul.f32 %v2669_v52, %v1584_v42  ;;  %2043 = vperm.xlu0 %2460, %v1975_v25   ;;  %v1632_v46 = vmul.f32 %v2667_v5, %v1631_v16  ;;  %vm1644_vm15 = vweird.f32 %v2669_v52 }
 0x61f   :  { %2670 = vrsqrt.f32 %v1585_v19  ;;  %vm1645_vm4 = vmor %vm1643_vm3, %vm1644_vm15  ;;  %vm1653_vm6 = vweird.f32 %v1585_v19 }
 0x620   :  { %v1639_v48 = vmul.f32 %v2669_v52, %v1638_v60  ;;  %v1554_v26 = vpop.xlane.xlu0 %1553  ;;  %v1908_v18 = vpop.xlane.xlu1 %1907  ;;  %v1636_v41 = vsel %vm1635_vm13, %v2667_v5, %v1632_v46 }
 0x621   :  { %v1570_v51 = vsub.f32 %v1554_v26, %v1562_v30  ;;  %v1934_v0 = vsub.f32 %v1908_v18, %v1926_v31  ;;  %1689 = vperm.xlu2 %2458, %v1636_v41  }
 0x622   :  { %v1640_v8 = vmul.f32 0.5, %v1639_v48 }
 0x623   :  { %v1578_v37 = vand.u32 2147483647, %v1570_v51  ;;  %v1942_v17 = vand.u32 2147483647, %v1934_v0 }
 0x624   :  { %v1641_v11 = vsub.f32 1.5, %v1640_v8 }
 0x625   :  { %v2671_v29 = vpop.eup %2670  ;;  %v4081_v63 = vmax.f32 %v1578_v37, 1e-15  ;;  %v1950_v24 = vmax.f32 %v1942_v17, 1e-15 }
 0x626   :  { %v1648_v9 = vmul.f32 %v2671_v29, %v1585_v19  ;;  %v1642_v5 = vmul.f32 %v2669_v52, %v1641_v11  ;;  %vm1654_vm5 = vweird.f32 %v2671_v29  ;;  %v1929_v19 = vmul.f32 2.0, %v4041_v22 }
 0x627   :  { %2672 = vrsqrt.f32 %v4081_v63  ;;  %vm1655_vm7 = vmor %vm1653_vm6, %vm1654_vm5  ;;  %vm1982_vm9 = vweird.f32 %v1950_v24  ;;  %v1930_v22 = vmul.f32 2.0, %v4049_v40  ;;  %vm1663_vm14 = vweird.f32 %v4081_v63 }
 0x628   :  { %v1649_v36 = vmul.f32 %v2671_v29, %v1648_v9  ;;  %2674 = vrsqrt.f32 %v1950_v24  ;;  %v1911_v55 = vpop.xlane.xlu0 %1910  ;;  %v1646_v6 = vsel %vm1645_vm4, %v2669_v52, %v1642_v5  ;;  %v1931_v40 = vmul.f32 2.0, %v4057_v28 }
 0x629   :  { %v1935_v59 = vsub.f32 %v1911_v55, %v1927_v12  ;;  %2038 = vperm.xlu2 %2458, %v1965_v49   ;;  %1694 = vperm.xlu1 %2459, %v1646_v6  }
 0x62a   :  { %v1650_v45 = vmul.f32 0.5, %v1649_v36 }
 0x62b   :  { %v1943_v32 = vand.u32 2147483647, %v1935_v59 }
 0x62c   :  { %v1651_v44 = vsub.f32 1.5, %v1650_v45 }
 0x62d   :  { %v2673_v62 = vpop.eup %2672  ;;  %v1951_v42 = vmax.f32 %v1943_v32, 1e-15 }
 0x62e   :  { %v2675_v23 = vpop.eup %2674  ;;  %v1658_v13 = vmul.f32 %v2673_v62, %v4081_v63  ;;  %v1652_v35 = vmul.f32 %v2671_v29, %v1651_v44  ;;  %vm1664_vm12 = vweird.f32 %v2673_v62 }
 0x62f   :  { %v1977_v10 = vmul.f32 %v2675_v23, %v1950_v24  ;;  %2676 = vrsqrt.f32 %v1951_v42  ;;  %vm1983_vm8 = vweird.f32 %v2675_v23  ;;  %vm1992_vm13 = vweird.f32 %v1951_v42  ;;  %vm1665_vm0 = vmor %vm1663_vm14, %vm1664_vm12 }
 0x630   :  { %v1914_v34 = vpop.xlane.xlu0 %1913  ;;  %v1656_v20 = vsel %vm1655_vm7, %v2671_v29, %v1652_v35  ;;  %v1659_v7 = vmul.f32 %v2673_v62, %v1658_v13  ;;  %vm1984_vm10 = vmor %vm1982_vm9, %vm1983_vm8 }
 0x631   :  { %v1978_v16 = vmul.f32 %v2675_v23, %v1977_v10  ;;  %v1936_v52 = vsub.f32 %v1914_v34, %v1928_v57  ;;  %1699 = vperm.xlu2 %2458, %v1656_v20  }
 0x632   :  { %v1660_v30 = vmul.f32 0.5, %v1659_v7 }
 0x633   :  { %v1979_v25 = vmul.f32 0.5, %v1978_v16  ;;  %v1944_v60 = vand.u32 2147483647, %v1936_v52 }
 0x634   :  { %v1661_v0 = vsub.f32 1.5, %v1660_v30 }
 0x635   :  { %v2677_v46 = vpop.eup %2676  ;;  %v1952_v31 = vmax.f32 %v1944_v60, 1e-15  ;;  %v1980_v48 = vsub.f32 1.5, %v1979_v25 }
 0x636   :  { %v1987_v26 = vmul.f32 %v2677_v46, %v1951_v42  ;;  %vm1993_vm11 = vweird.f32 %v2677_v46  ;;  %v1662_v29 = vmul.f32 %v2673_v62, %v1661_v0 }
 0x637   :  { %2678 = vrsqrt.f32 %v1952_v31  ;;  %v1981_v18 = vmul.f32 %v2675_v23, %v1980_v48  ;;  %vm1994_vm15 = vmor %vm1992_vm13, %vm1993_vm11  ;;  %vm2002_vm3 = vweird.f32 %v1952_v31 }
 0x638   :  { %v1988_v47 = vmul.f32 %v2677_v46, %v1987_v26  ;;  %v1917_v41 = vpop.xlane.xlu0 %1916  ;;  %v1666_v49 = vsel %vm1665_vm0, %v2673_v62, %v1662_v29 }
 0x639   :  { %v1937_v21 = vsub.f32 %v1917_v41, %v1929_v19  ;;  %v1985_v51 = vsel %vm1984_vm10, %v2675_v23, %v1981_v18 }
 0x63a   :  { %v1989_v8 = vmul.f32 0.5, %v1988_v47  ;;  %2048 = vperm.xlu1 %2459, %v1985_v51  }
 0x63b   :  { %v1945_v37 = vand.u32 2147483647, %v1937_v21 }
 0x63c   :  { %v1990_v17 = vsub.f32 1.5, %v1989_v8 }
 0x63d   :  { %v2679_v39 = vpop.eup %2678  ;;  %v1953_v11 = vmax.f32 %v1945_v37, 1e-15 }
 0x63e   :  { %v1997_v9 = vmul.f32 %v2679_v39, %v1952_v31  ;;  %v1991_v5 = vmul.f32 %v2677_v46, %v1990_v17  ;;  %vm2003_vm2 = vweird.f32 %v2679_v39 }
 0x63f   :  { %2680 = vrsqrt.f32 %v1953_v11  ;;  %vm2004_vm4 = vmor %vm2002_vm3, %vm2003_vm2  ;;  %vm2012_vm6 = vweird.f32 %v1953_v11 }
 0x640   :  { %v1998_v24 = vmul.f32 %v2679_v39, %v1997_v9  ;;  %v1920_v12 = vpop.xlane.xlu0 %1919  ;;  %v1995_v36 = vsel %vm1994_vm15, %v2677_v46, %v1991_v5 }
 0x641   :  { %v1938_v55 = vsub.f32 %v1920_v12, %v1930_v22  ;;  %2053 = vperm.xlu2 %2458, %v1995_v36  }
 0x642   :  { %v1999_v6 = vmul.f32 0.5, %v1998_v24  ;;  %1704 = vperm.xlu1 %2459, %v1666_v49  }
 0x643   :  { %v1946_v59 = vand.u32 2147483647, %v1938_v55 }
 0x644   :  { %v2000_v45 = vsub.f32 1.5, %v1999_v6 }
 0x645   :  { %v2681_v32 = vpop.eup %2680  ;;  %v1954_v44 = vmax.f32 %v1946_v59, 1e-15 }
 0x646   :  { %v2007_v42 = vmul.f32 %v2681_v32, %v1953_v11  ;;  %v2001_v23 = vmul.f32 %v2679_v39, %v2000_v45  ;;  %vm2013_vm5 = vweird.f32 %v2681_v32 }
 0x647   :  { %2682 = vrsqrt.f32 %v1954_v44  ;;  %vm2014_vm7 = vmor %vm2012_vm6, %vm2013_vm5  ;;  %vm2022_vm9 = vweird.f32 %v1954_v44 }
 0x648   :  { %v2008_v63 = vmul.f32 %v2681_v32, %v2007_v42  ;;  %v1923_v13 = vpop.xlane.xlu0 %1922  ;;  %v2005_v35 = vsel %vm2004_vm4, %v2679_v39, %v2001_v23 }
 0x649   :  { %v1939_v10 = vsub.f32 %v1923_v13, %v1931_v40 }
 0x64a   :  { %v2009_v62 = vmul.f32 0.5, %v2008_v63  ;;  %2058 = vperm.xlu1 %2459, %v2005_v35  }
 0x64b   :  { %v1947_v57 = vand.u32 2147483647, %v1939_v10 }
 0x64c   :  { %v2010_v34 = vsub.f32 1.5, %v2009_v62 }
 0x64d   :  { %v2683_v20 = vpop.eup %2682  ;;  %v1955_v7 = vmax.f32 %v1947_v57, 1e-15 }
 0x64e   :  { %v2017_v16 = vmul.f32 %v2683_v20, %v1954_v44  ;;  %v2011_v52 = vmul.f32 %v2681_v32, %v2010_v34  ;;  %vm2023_vm8 = vweird.f32 %v2683_v20 }
 0x64f   :  { %2684 = vrsqrt.f32 %v1955_v7  ;;  %vm2024_vm10 = vmor %vm2022_vm9, %vm2023_vm8  ;;  %vm2032_vm12 = vweird.f32 %v1955_v7 }
 0x650   :  { %v2018_v25 = vmul.f32 %v2683_v20, %v2017_v16  ;;  %v2015_v60 = vsel %vm2014_vm7, %v2681_v32, %v2011_v52 }
 0x651   :  { %2063 = vperm.xlu2 %2458, %v2015_v60  }
 0x652   :  { %v2019_v28 = vmul.f32 0.5, %v2018_v25 }
 0x654   :  { %v2020_v46 = vsub.f32 1.5, %v2019_v28 }
 0x655   :  { %v2685_v30 = vpop.eup %2684 }
 0x656   :  { %v2027_v31 = vmul.f32 %v2685_v30, %v1955_v7  ;;  %v2021_v48 = vmul.f32 %v2683_v20, %v2020_v46  ;;  %vm2033_vm11 = vweird.f32 %v2685_v30 }
 0x657   :  { %vm2034_vm13 = vmor %vm2032_vm12, %vm2033_vm11 }
 0x658   :  { %v2028_v26 = vmul.f32 %v2685_v30, %v2027_v31  ;;  %v2025_v19 = vsel %vm2024_vm10, %v2683_v20, %v2021_v48 }
 0x659   :  { %2068 = vperm.xlu1 %2459, %v2025_v19  }
 0x65a   :  { %v2029_v18 = vmul.f32 0.5, %v2028_v26 }
 0x65b   :  { %v1670_v51 = vpop.permute.xlu2 %1669 }
 0x65c   :  { %v2030_v47 = vsub.f32 1.5, %v2029_v18  ;;  %v1707_v39 = vmul.f32 %v1670_v51, %v3936_v15 }
 0x65e   :  { %v2031_v41 = vmul.f32 %v2685_v30, %v2030_v47 }
 0x660   :  { %v2035_v21 = vsel %vm2034_vm13, %v2685_v30, %v2031_v41 }
 0x661   :  { %2073 = vperm.xlu2 %2458, %v2035_v21  }
 0x66b   :  { %v1680_v0 = vpop.permute.xlu2 %1679 }
 0x66c   :  { %v1709_v35 = vmul.f32 %v1680_v0, %v3949_v56 }
 0x673   :  { %v1685_v8 = vpop.permute.xlu2 %1684 }
 0x674   :  { %v1710_v32 = vmul.f32 %v1685_v8, %v3963_v61 }
 0x67b   :  { %v1690_v37 = vpop.permute.xlu2 %1689  ;;  %v1675_v24 = vpop.permute.xlu1 %1674 }
 0x67c   :  { %v1708_v36 = vmul.f32 %v1675_v24, %v3941_v1  ;;  %v1711_v52 = vmul.f32 %v1690_v37, %v3979_v14 }
 0x683   :  { %v2039_v17 = vpop.permute.xlu2 %2038 }
 0x684   :  { %v2076_v11 = vmul.f32 %v2039_v17, %v3957_v58 }
 0x686   :  { %v2084_v29 = vadd.f32 %v2076_v11, %v1707_v39 }
 0x688   :  { %v4095_v9 = vmul.f32 0.5, %v2084_v29 }
 0x68a   :  { %v2100_v5 = vmul.f32 %v4095_v9, %v4095_v9 }
 0x68b   :  { %v1700_v49 = vpop.permute.xlu2 %1699 }
 0x68c   :  { %v2108_v22 = vsel %vm50_vm1, %v2100_v5, 0.0  ;;  %v2132_v8 = vmul.f32 2.0, %v2100_v5 }
 0x68d   :  { %2109 = vadd.xlane.f32.xlu0 %v2108_v22 }
 0x690   :  { %v2044_v12 = vpop.permute.xlu0 %2043 }
 0x691   :  { %v2077_v55 = vmul.f32 %v2044_v12, %v3973_v3 }
 0x693   :  { %v2085_v6 = vadd.f32 %v2077_v55, %v1708_v36 }
 0x695   :  { %v4102_v15 = vmul.f32 0.5, %v2085_v6 }
 0x697   :  { %v2101_v58 = vmul.f32 %v4102_v15, %v4102_v15 }
 0x699   :  { %v2111_v59 = vsel %vm50_vm1, %v2101_v58, 0.0  ;;  %v2133_v39 = vmul.f32 2.0, %v2101_v58 }
 0x69a   :  { %2112 = vadd.xlane.f32.xlu1 %v2111_v59 }
 0x69b   :  { %v2054_v45 = vpop.permute.xlu2 %2053  ;;  %v1695_v3 = vpop.permute.xlu1 %1694 }
 0x69c   :  { %v2079_v44 = vmul.f32 %v2054_v45, %v4007_v54  ;;  %v1712_v10 = vmul.f32 %v1695_v3, %v3989_v43 }
 0x69e   :  { %v2087_v42 = vadd.f32 %v2079_v44, %v1710_v32 }
 0x6a0   :  { %v4109_v23 = vmul.f32 0.5, %v2087_v42 }
 0x6a2   :  { %v4113_v1 = vmul.f32 %v4109_v23, %v4109_v23 }
 0x6a4   :  { %v2117_v40 = vsel %vm50_vm1, %v4113_v1, 0.0  ;;  %v2135_v5 = vmul.f32 2.0, %v4113_v1 }
 0x6a5   :  { %2118 = vadd.xlane.f32.xlu0 %v2117_v40 }
 0x6ab   :  { %v2064_v63 = vpop.permute.xlu2 %2063 }
 0x6ac   :  { %v2049_v13 = vpop.permute.xlu1 %2048  ;;  %v2081_v54 = vmul.f32 %v2064_v63, %v4035_v50 }
 0x6ad   :  { %v2078_v61 = vmul.f32 %v2049_v13, %v3995_v4 }
 0x6ae   :  { %v2089_v34 = vadd.f32 %v2081_v54, %v1712_v10 }
 0x6af   :  { %v2086_v62 = vadd.f32 %v2078_v61, %v1709_v35 }
 0x6b0   :  { %v4127_v16 = vmul.f32 0.5, %v2089_v34 }
 0x6b1   :  { %v4121_v57 = vmul.f32 0.5, %v2086_v62 }
 0x6b2   :  { %v4133_v4 = vmul.f32 %v4127_v16, %v4127_v16 }
 0x6b3   :  { %v4125_v20 = vmul.f32 %v4121_v57, %v4121_v57 }
 0x6b4   :  { %v1705_v7 = vpop.permute.xlu1 %1704  ;;  %v2123_v28 = vsel %vm50_vm1, %v4133_v4, 0.0 }
 0x6b5   :  { %v2114_v56 = vsel %vm50_vm1, %v4125_v20, 0.0  ;;  %v1714_v46 = vmul.f32 %v1705_v7, %v4013_v33  ;;  %v1713_v33 = vmul.f32 %v1700_v49, %v3999_v27  ;;  %v2134_v34 = vmul.f32 2.0, %v4125_v20 }
 0x6b6   :  { %2115 = vadd.xlane.f32.xlu2 %v2114_v56 }
 0x6bb   :  { %v2074_v43 = vpop.permute.xlu2 %2073 }
 0x6bc   :  { %v2059_v50 = vpop.permute.xlu1 %2058  ;;  %v2083_v60 = vmul.f32 %v2074_v43, %v4053_v2 }
 0x6bd   :  { %v2080_v25 = vmul.f32 %v2059_v50, %v4023_v38 }
 0x6be   :  { %2124 = vadd.xlane.f32.xlu2 %v2123_v28  ;;  %v2091_v48 = vadd.f32 %v2083_v60, %v1714_v46  ;;  %v2137_v28 = vmul.f32 2.0, %v4133_v4 }
 0x6bf   :  { %v2088_v30 = vadd.f32 %v2080_v25, %v1711_v52 }
 0x6c0   :  { %v4147_v19 = vmul.f32 0.5, %v2091_v48 }
 0x6c1   :  { %v4141_v31 = vmul.f32 0.5, %v2088_v30 }
 0x6c2   :  { %v4153_v38 = vmul.f32 %v4147_v19, %v4147_v19 }
 0x6c3   :  { %v4145_v26 = vmul.f32 %v4141_v31, %v4141_v31 }
 0x6c4   :  { %v2129_v47 = vsel %vm50_vm1, %v4153_v38, 0.0 }
 0x6c5   :  { %v2120_v14 = vsel %vm50_vm1, %v4145_v26, 0.0 }
 0x6c6   :  { %2121 = vadd.xlane.f32.xlu1 %v2120_v14 }
 0x6cb   :  { %v2069_v2 = vpop.permute.xlu1 %2068 }
 0x6cc   :  { %v2082_v18 = vmul.f32 %v2069_v2, %v4043_v53 }
 0x6ce   :  { %v2090_v41 = vadd.f32 %v2082_v18, %v1713_v33  ;;  %2130 = vadd.xlane.f32.xlu1 %v2129_v47  ;;  %v2136_v18 = vmul.f32 2.0, %v4145_v26 }
 0x6d0   :  { %v4159_v21 = vmul.f32 0.5, %v2090_v41 }
 0x6d2   :  { %v4163_v51 = vmul.f32 %v4159_v21, %v4159_v21 }
 0x6d4   :  { %v2126_v0 = vsel %vm50_vm1, %v4163_v51, 0.0 }
 0x6d5   :  { %2127 = vadd.xlane.f32.xlu0 %v2126_v0 }
 0x700   :  { %v2110_v37 = vpop.xlane.xlu0 %2109 }
 0x701   :  { %v2140_v27 = vsub.f32 %v2110_v37, %v2132_v8 }
 0x703   :  { %v2148_v17 = vand.u32 2147483647, %v2140_v27 }
 0x705   :  { %v2156_v53 = vmax.f32 %v2148_v17, 1e-15 }
 0x707   :  { %2686 = vrsqrt.f32 %v2156_v53  ;;  %vm2170_vm15 = vweird.f32 %v2156_v53 }
 0x70d   :  { %v2687_v11 = vpop.eup %2686  ;;  %v2113_v29 = vpop.xlane.xlu1 %2112 }
 0x70e   :  { %v2165_v22 = vmul.f32 %v2687_v11, %v2156_v53  ;;  %v2141_v24 = vsub.f32 %v2113_v29, %v2133_v39  ;;  %vm2171_vm14 = vweird.f32 %v2687_v11 }
 0x70f   :  { %vm2172_vm0 = vmor %vm2170_vm15, %vm2171_vm14 }
 0x710   :  { %v2166_v12 = vmul.f32 %v2687_v11, %v2165_v22  ;;  %v2149_v36 = vand.u32 2147483647, %v2141_v24 }
 0x712   :  { %v2167_v55 = vmul.f32 0.5, %v2166_v12  ;;  %v2157_v49 = vmax.f32 %v2149_v36, 1e-15 }
 0x714   :  { %2688 = vrsqrt.f32 %v2157_v49  ;;  %v2168_v6 = vsub.f32 1.5, %v2167_v55  ;;  %vm2180_vm3 = vweird.f32 %v2157_v49 }
 0x716   :  { %v2169_v59 = vmul.f32 %v2687_v11, %v2168_v6 }
 0x718   :  { %v2119_v45 = vpop.xlane.xlu0 %2118  ;;  %v2173_v32 = vsel %vm2172_vm0, %v2687_v11, %v2169_v59  ;;  %v2139_v11 = vmul.f32 2.0, %v4153_v38 }
 0x719   :  { %v2143_v44 = vsub.f32 %v2119_v45, %v2135_v5  ;;  %2246 = vperm.xlu2 %2458, %v2173_v32   ;;  %v2138_v5 = vmul.f32 2.0, %v4163_v51 }
 0x71a   :  { %v2689_v58 = vpop.eup %2688 }
 0x71b   :  { %v2175_v42 = vmul.f32 %v2689_v58, %v2157_v49  ;;  %v2151_v3 = vand.u32 2147483647, %v2143_v44  ;;  %vm2181_vm2 = vweird.f32 %v2689_v58 }
 0x71c   :  { %vm2182_vm4 = vmor %vm2180_vm3, %vm2181_vm2 }
 0x71d   :  { %v2176_v40 = vmul.f32 %v2689_v58, %v2175_v42  ;;  %v2159_v63 = vmax.f32 %v2151_v3, 1e-15 }
 0x71f   :  { %v2177_v13 = vmul.f32 0.5, %v2176_v40  ;;  %2690 = vrsqrt.f32 %v2159_v63  ;;  %vm2200_vm6 = vweird.f32 %v2159_v63 }
 0x721   :  { %v2178_v35 = vsub.f32 1.5, %v2177_v13 }
 0x723   :  { %v2179_v61 = vmul.f32 %v2689_v58, %v2178_v35 }
 0x725   :  { %v2691_v54 = vpop.eup %2690  ;;  %v2183_v10 = vsel %vm2182_vm4, %v2689_v58, %v2179_v61 }
 0x726   :  { %v2195_v1 = vmul.f32 %v2691_v54, %v2159_v63  ;;  %2251 = vperm.xlu0 %2460, %v2183_v10   ;;  %vm2201_vm5 = vweird.f32 %v2691_v54 }
 0x727   :  { %vm2202_vm7 = vmor %vm2200_vm6, %vm2201_vm5 }
 0x728   :  { %v2196_v62 = vmul.f32 %v2691_v54, %v2195_v1 }
 0x729   :  { %v2116_v7 = vpop.xlane.xlu2 %2115 }
 0x72a   :  { %v2197_v56 = vmul.f32 0.5, %v2196_v62  ;;  %v2142_v43 = vsub.f32 %v2116_v7, %v2134_v34 }
 0x72c   :  { %v2150_v50 = vand.u32 2147483647, %v2142_v43  ;;  %v2198_v52 = vsub.f32 1.5, %v2197_v56 }
 0x72e   :  { %v2158_v25 = vmax.f32 %v2150_v50, 1e-15  ;;  %v2199_v60 = vmul.f32 %v2691_v54, %v2198_v52 }
 0x730   :  { %2692 = vrsqrt.f32 %v2158_v25  ;;  %v2203_v46 = vsel %vm2202_vm7, %v2691_v54, %v2199_v60  ;;  %vm2190_vm9 = vweird.f32 %v2158_v25 }
 0x731   :  { %v2125_v30 = vpop.xlane.xlu2 %2124  ;;  %2261 = vperm.xlu2 %2458, %v2203_v46  }
 0x732   :  { %v2145_v48 = vsub.f32 %v2125_v30, %v2137_v28 }
 0x734   :  { %v2153_v14 = vand.u32 2147483647, %v2145_v48 }
 0x736   :  { %v2693_v2 = vpop.eup %2692  ;;  %v2161_v20 = vmax.f32 %v2153_v14, 1e-15 }
 0x737   :  { %v2185_v33 = vmul.f32 %v2693_v2, %v2158_v25  ;;  %vm2191_vm8 = vweird.f32 %v2693_v2 }
 0x738   :  { %2694 = vrsqrt.f32 %v2161_v20  ;;  %vm2192_vm10 = vmor %vm2190_vm9, %vm2191_vm8  ;;  %vm2220_vm12 = vweird.f32 %v2161_v20 }
 0x739   :  { %v2186_v47 = vmul.f32 %v2693_v2, %v2185_v33  ;;  %v2122_v41 = vpop.xlane.xlu1 %2121 }
 0x73a   :  { %v2144_v0 = vsub.f32 %v2122_v41, %v2136_v18 }
 0x73b   :  { %v2187_v8 = vmul.f32 0.5, %v2186_v47 }
 0x73c   :  { %v2152_v37 = vand.u32 2147483647, %v2144_v0 }
 0x73d   :  { %v2188_v27 = vsub.f32 1.5, %v2187_v8 }
 0x73e   :  { %v2695_v17 = vpop.eup %2694  ;;  %v2160_v4 = vmax.f32 %v2152_v37, 1e-15 }
 0x73f   :  { %v2215_v53 = vmul.f32 %v2695_v17, %v2161_v20  ;;  %v2189_v39 = vmul.f32 %v2693_v2, %v2188_v27  ;;  %vm2221_vm11 = vweird.f32 %v2695_v17 }
 0x740   :  { %2696 = vrsqrt.f32 %v2160_v4  ;;  %vm2222_vm13 = vmor %vm2220_vm12, %vm2221_vm11  ;;  %vm2210_vm15 = vweird.f32 %v2160_v4 }
 0x741   :  { %v2216_v29 = vmul.f32 %v2695_v17, %v2215_v53  ;;  %v2131_v22 = vpop.xlane.xlu1 %2130  ;;  %v2193_v24 = vsel %vm2192_vm10, %v2693_v2, %v2189_v39 }
 0x742   :  { %v2147_v26 = vsub.f32 %v2131_v22, %v2139_v11  ;;  %2256 = vperm.xlu1 %2459, %v2193_v24  }
 0x743   :  { %v2217_v12 = vmul.f32 0.5, %v2216_v29 }
 0x744   :  { %v2155_v36 = vand.u32 2147483647, %v2147_v26 }
 0x745   :  { %v2218_v55 = vsub.f32 1.5, %v2217_v12 }
 0x746   :  { %v2697_v49 = vpop.eup %2696  ;;  %v2163_v6 = vmax.f32 %v2155_v36, 1e-15 }
 0x747   :  { %v2205_v59 = vmul.f32 %v2697_v49, %v2160_v4  ;;  %v2219_v45 = vmul.f32 %v2695_v17, %v2218_v55  ;;  %vm2211_vm14 = vweird.f32 %v2697_v49 }
 0x748   :  { %2698 = vrsqrt.f32 %v2163_v6  ;;  %v2128_v32 = vpop.xlane.xlu0 %2127  ;;  %vm2212_vm0 = vmor %vm2210_vm15, %vm2211_vm14  ;;  %vm2240_vm3 = vweird.f32 %v2163_v6 }
 0x749   :  { %v2206_v38 = vmul.f32 %v2697_v49, %v2205_v59  ;;  %v2146_v44 = vsub.f32 %v2128_v32, %v2138_v5  ;;  %v2223_v58 = vsel %vm2222_vm13, %v2695_v17, %v2219_v45 }
 0x74a   :  { %2271 = vperm.xlu2 %2458, %v2223_v58  }
 0x74b   :  { %v2207_v42 = vmul.f32 0.5, %v2206_v38  ;;  %v2154_v3 = vand.u32 2147483647, %v2146_v44 }
 0x74d   :  { %v2162_v40 = vmax.f32 %v2154_v3, 1e-15  ;;  %v2208_v63 = vsub.f32 1.5, %v2207_v42 }
 0x74e   :  { %v2699_v13 = vpop.eup %2698 }
 0x74f   :  { %v2235_v35 = vmul.f32 %v2699_v13, %v2163_v6  ;;  %2700 = vrsqrt.f32 %v2162_v40  ;;  %v2209_v61 = vmul.f32 %v2697_v49, %v2208_v63  ;;  %vm2241_vm2 = vweird.f32 %v2699_v13 }
 0x750   :  { %vm2242_vm4 = vmor %vm2240_vm3, %vm2241_vm2  ;;  %vm2230_vm6 = vweird.f32 %v2162_v40 }
 0x751   :  { %v2236_v51 = vmul.f32 %v2699_v13, %v2235_v35  ;;  %v2213_v54 = vsel %vm2212_vm0, %v2697_v49, %v2209_v61 }
 0x752   :  { %2266 = vperm.xlu0 %2460, %v2213_v54  }
 0x753   :  { %v2237_v10 = vmul.f32 0.5, %v2236_v51 }
 0x755   :  { %v2701_v1 = vpop.eup %2700  ;;  %v2238_v62 = vsub.f32 1.5, %v2237_v10 }
 0x756   :  { %v2225_v34 = vmul.f32 %v2701_v1, %v2162_v40  ;;  %vm2231_vm5 = vweird.f32 %v2701_v1 }
 0x757   :  { %v2239_v7 = vmul.f32 %v2699_v13, %v2238_v62  ;;  %vm2232_vm7 = vmor %vm2230_vm6, %vm2231_vm5 }
 0x758   :  { %v2226_v56 = vmul.f32 %v2701_v1, %v2225_v34 }
 0x759   :  { %v2243_v43 = vsel %vm2242_vm4, %v2699_v13, %v2239_v7 }
 0x75a   :  { %v2227_v50 = vmul.f32 0.5, %v2226_v56  ;;  %2281 = vperm.xlu0 %2460, %v2243_v43  }
 0x75c   :  { %v2228_v52 = vsub.f32 1.5, %v2227_v50 }
 0x75e   :  { %v2229_v25 = vmul.f32 %v2701_v1, %v2228_v52 }
 0x760   :  { %v2233_v60 = vsel %vm2232_vm7, %v2701_v1, %v2229_v25 }
 0x761   :  { %2276 = vperm.xlu1 %2459, %v2233_v60  }
 0x773   :  { %v2247_v28 = vpop.permute.xlu2 %2246 }
 0x774   :  { %v2284_v46 = vmul.f32 %v2247_v28, %v4095_v9 }
 0x776   :  { %2292 = vst.msk [vmem:[%s4219_s6] sm:$0xff] %vm50_vm1, %v2284_v46 }
 0x78b   :  { %v2262_v30 = vpop.permute.xlu2 %2261 }
 0x78c   :  { %v2287_v48 = vmul.f32 %v2262_v30, %v4109_v23 }
 0x78e   :  { %2295 = vst.msk [vmem:[%s4219_s6 + $0x18] sm:$0xff] %vm50_vm1, %v2287_v48 }
 0x798   :  { %v2252_v14 = vpop.permute.xlu0 %2251 }
 0x799   :  { %v2285_v2 = vmul.f32 %v2252_v14, %v4102_v15 }
 0x79b   :  { %2293 = vst.msk [vmem:[%s4219_s6 + $0x8] sm:$0xff] %vm50_vm1, %v2285_v2 }
 0x7a4   :  { %v2272_v9 = vpop.permute.xlu2 %2271 }
 0x7a5   :  { %v2289_v20 = vmul.f32 %v2272_v9, %v4127_v16 }
 0x7a7   :  { %2297 = vst.msk [vmem:[%s4219_s6 + $0x28] sm:$0xff] %vm50_vm1, %v2289_v20 }
 0x7b4   :  { %v2257_v23 = vpop.permute.xlu1 %2256 }
 0x7b5   :  { %v2286_v33 = vmul.f32 %v2257_v23, %v4121_v57 }
 0x7b7   :  { %2294 = vst.msk [vmem:[%s4219_s6 + $0x10] sm:$0xff] %vm50_vm1, %v2286_v33 }
 0x7c4   :  { %v2267_v15 = vpop.permute.xlu0 %2266 }
 0x7c5   :  { %v2288_v18 = vmul.f32 %v2267_v15, %v4141_v31 }
 0x7c7   :  { %2296 = vst.msk [vmem:[%s4219_s6 + $0x20] sm:$0xff] %vm50_vm1, %v2288_v18 }
 0x7cc   :  { %v2282_v16 = vpop.permute.xlu0 %2281 }
 0x7cd   :  { %v2291_v47 = vmul.f32 %v2282_v16, %v4147_v19 }
 0x7cf   :  { %2299 = vst.msk [vmem:[%s4219_s6 + $0x38] sm:$0xff] %vm50_vm1, %v2291_v47 }
 0x7d3   :  { %v2277_v57 = vpop.permute.xlu1 %2276 }
 0x7d4   :  { %v2290_v41 = vmul.f32 %v2277_v57, %v4159_v21 }
 0x7d6   :  { %2298 = vst.msk [vmem:[%s4219_s6 + $0x30] sm:$0xff] %vm50_vm1, %v2290_v41 }

</bundles_post_ra>
